<compile_context>
chip_gen: v6e
topology: v6e:2x2x1
jax: 0.10.0
libtpu: 0.0.40
codegen_flags: <defaults>
</compile_context>

<pallas_src>
import functools

import jax
import jax.numpy as jnp
from jax.experimental import pallas as pl
from jax.experimental.pallas import tpu as pltpu

LN_EPS = 1e-5          # PyTorch nn.LayerNorm default eps
VEC_PER_LAYER = 8      # rows per layer in the packed (1, C) vector operand (order below)


def _layer_norm(x, w, b):
    # x: (S, C); w, b: (1, C). Biased variance + eps inside rsqrt == nn.LayerNorm.
    mu = jnp.mean(x, axis=-1, keepdims=True)
    var = jnp.mean((x - mu) ** 2, axis=-1, keepdims=True)
    return (x - mu) * jax.lax.rsqrt(var + LN_EPS) * w + b


def _prompt_layer(x, kv, p, *, B, N, M, H, hd, scale):
    """One PromptGeneratorLayer on batch-folded activations.

    x:  (B*N, C)  cls tokens (queries / residual stream)
    kv: (B*M, C)  image patch tokens (keys/values), unchanged across layers
    """
    C = x.shape[-1]
    BH = B * H

    # norm1(cls) -> queries, norm2(vid) -> keys/values (batch-folded 2-D LayerNorms).
    q_in = _layer_norm(x, p["ln1w"], p["ln1b"])        # (B*N, C)
    kv_in = _layer_norm(kv, p["ln2w"], p["ln2b"])      # (B*M, C)

    # Fold (batch, head) into ONE leading batch axis: every attention stage below is a single
    # 3-D batched matmul; no python batch loop, no lane slicing, no concat anywhere.
    q_bb = jnp.broadcast_to(q_in.reshape(B, 1, N, C), (B, H, N, C)).reshape(BH, N, C)
    kv_bb = jnp.broadcast_to(kv_in.reshape(B, 1, M, C), (B, H, M, C)).reshape(BH, M, C)
    wq_bb = jnp.broadcast_to(p["wq_h"][None], (B, H, C, hd)).reshape(BH, C, hd)
    wk_bb = jnp.broadcast_to(p["wk_h"][None], (B, H, C, hd)).reshape(BH, C, hd)
    wv_bb = jnp.broadcast_to(p["wv_h"][None], (B, H, C, hd)).reshape(BH, C, hd)
    wo_bb = jnp.broadcast_to(p["wo_h"][None], (B, H, hd, C)).reshape(BH, hd, C)

    qh = jnp.einsum('bnc,bcd->bnd', q_bb, wq_bb,
                    preferred_element_type=jnp.float32) * scale        # (BH, N, hd)
    kh = jnp.einsum('bmc,bcd->bmd', kv_bb, wk_bb,
                    preferred_element_type=jnp.float32)                # (BH, M, hd)
    vh = jnp.einsum('bmc,bcd->bmd', kv_bb, wv_bb,
                    preferred_element_type=jnp.float32)                # (BH, M, hd)

    s = jnp.einsum('bnd,bmd->bnm', qh, kh,
                   preferred_element_type=jnp.float32)                 # (BH, N, M)
    s = s - jnp.max(s, axis=-1, keepdims=True)
    prob = jnp.exp(s)
    prob = prob * pl.reciprocal(jnp.sum(prob, axis=-1, keepdims=True), approx=True)

    oh = jnp.einsum('bnm,bmd->bnd', prob, vh,
                    preferred_element_type=jnp.float32)                # (BH, N, hd)
    proj_h = jnp.einsum('bnd,bdc->bnc', oh, wo_bb,
                        preferred_element_type=jnp.float32)            # (BH, N, C)
    attn = jnp.sum(proj_h.reshape(B, H, N, C), axis=1).reshape(B * N, C) + p["bo"]

    # residual 1
    x = x + attn

    # MLP: norm3 -> Linear(C, 4C) -> QuickGELU -> Linear(4C, C); dropout p=0 -> identity.
    x3 = _layer_norm(x, p["ln3w"], p["ln3b"])
    h1 = jnp.dot(x3, p["w1"], preferred_element_type=jnp.float32) + p["b1"]   # (B*N, 4C)
    h1 = h1 * jax.nn.sigmoid(1.702 * h1)                                      # QuickGELU
    mlp = jnp.dot(h1, p["w2"], preferred_element_type=jnp.float32) + p["b2"]  # (B*N, C)

    # residual 2
    return x + mlp


def fused_kernel(cls_ref, vid_ref, vec_ref, b1_ref, wqkv_ref, wo_ref, w1_ref, w2_ref,
                 out_ref, *, B, N, M, H, scale, n_layers):
    C = cls_ref.shape[-1]
    hd = C // H

    x = cls_ref[...]        # (B*N, C)
    kv = vid_ref[...]       # (B*M, C)

    def vec_row(i):         # (1, C) row of the packed vector operand (static index)
        return vec_ref[pl.ds(i, 1), :]

    for layer in range(n_layers):
        base = layer * VEC_PER_LAYER
        p = dict(
            ln1w=vec_row(base + 0), ln1b=vec_row(base + 1),
            ln2w=vec_row(base + 2), ln2b=vec_row(base + 3),
            ln3w=vec_row(base + 4), ln3b=vec_row(base + 5),
            bo=vec_row(base + 6), b2=vec_row(base + 7),
            b1=b1_ref[pl.ds(layer, 1), :],
            wq_h=wqkv_ref[3 * layer + 0],
            wk_h=wqkv_ref[3 * layer + 1],
            wv_h=wqkv_ref[3 * layer + 2],
            wo_h=wo_ref[layer],
            w1=w1_ref[layer],
            w2=w2_ref[layer],
        )
        x = _prompt_layer(x, kv, p, B=B, N=N, M=M, H=H, hd=hd, scale=scale)

    # Final learnable per-channel scale; single store of the fused result.
    alpha = vec_row(n_layers * VEC_PER_LAYER)
    out_ref[...] = x * alpha
    # TODO(synk): at this toy size (16x32 f32) the 32-lane masked store is negligible; for
    # large N*C a lane-dense (B, N*C) output layout would avoid vst.msk partial stores.


def post_visual_to_textual(cls_embs, img_embs_p, layer_params, alpha, num_heads=8):
    B, N, C = cls_embs.shape
    _, M, _ = img_embs_p.shape
    H = num_heads
    hd = C // H
    scale = float(hd ** -0.5)
    n_layers = len(layer_params)

    # Batch-fold activations (wrapper-side reshape, free).
    cls2 = cls_embs.reshape(B * N, C)
    vid2 = img_embs_p.reshape(B * M, C)

    # Pack parameters into a few stacked operands (8 kernel inputs total). q/k/v/out-proj
    # weights go in head-major form so the kernel never slices head_dim out of the lane axis.
    vec_rows, b1_rows, wqkv, wo, w1, w2 = [], [], [], [], [], []
    for p in layer_params:
        vec_rows += [p["ln1w"], p["ln1b"], p["ln2w"], p["ln2b"],
                     p["ln3w"], p["ln3b"], p["bo"], p["b2"]]
        b1_rows.append(p["b1"])
        wqkv += [p["wq"].reshape(C, H, hd).transpose(1, 0, 2),   # (H, C, hd)
                 p["wk"].reshape(C, H, hd).transpose(1, 0, 2),
                 p["wv"].reshape(C, H, hd).transpose(1, 0, 2)]
        wo.append(p["wo"].reshape(H, hd, C))                     # (H, hd, C)
        w1.append(p["w1"])
        w2.append(p["w2"])
    vec = jnp.concatenate(vec_rows + [alpha.reshape(1, C)], axis=0)   # (8*L + 1, C)
    b1s = jnp.concatenate(b1_rows, axis=0)                            # (L, 4C)
    wqkv = jnp.stack(wqkv, axis=0)                                    # (3L, H, C, hd)
    wo = jnp.stack(wo, axis=0)                                        # (L, H, hd, C)
    w1 = jnp.stack(w1, axis=0)                                        # (L, C, 4C)
    w2 = jnp.stack(w2, axis=0)                                        # (L, 4C, C)

    kernel = functools.partial(fused_kernel, B=B, N=N, M=M, H=H, scale=scale,
                               n_layers=n_layers)
    vmem = pl.BlockSpec(memory_space=pltpu.MemorySpace.VMEM)

    out2d = pl.pallas_call(
        kernel,
        out_shape=jax.ShapeDtypeStruct((B * N, C), jnp.float32),
        in_specs=[vmem] * 8,
        out_specs=vmem,
    )(cls2, vid2, vec, b1s, wqkv, wo, w1, w2)
    return out2d.reshape(B, N, C)


# ---------------- deterministic parameter init (mimics module __init__) ----------------

def _trunc_normal(key, shape, std=0.02):
    return (std * jax.random.truncated_normal(key, -2.0, 2.0, shape)).astype(jnp.float32)


def init_layer_params(key, emb_dim):
    C = emb_dim
    ks = jax.random.split(key, 6)
    zeros = lambda *s: jnp.zeros(s, jnp.float32)
    ones = lambda *s: jnp.ones(s, jnp.float32)
    return {
        # LayerNorm: weight=1, bias=0 (kept 2-D (1, C) for VMEM friendliness)
        "ln1w": ones(1, C), "ln1b": zeros(1, C),
        "ln2w": ones(1, C), "ln2b": zeros(1, C),
        "ln3w": ones(1, C), "ln3b": zeros(1, C),
        # q/k/v projections (qkv_bias=False), stored as (in, out)
        "wq": _trunc_normal(ks[0], (C, C)),
        "wk": _trunc_normal(ks[1], (C, C)),
        "wv": _trunc_normal(ks[2], (C, C)),
        # output projection (+bias)
        "wo": _trunc_normal(ks[3], (C, C)), "bo": zeros(1, C),
        # MLP
        "w1": _trunc_normal(ks[4], (C, 4 * C)), "b1": zeros(1, 4 * C),
        "w2": _trunc_normal(ks[5], (4 * C, C)), "b2": zeros(1, C),
    }


def reference(cls_embs, img_embs_p, layer_params, alpha, num_heads):
    # Pure-JAX mirror of the PyTorch forward (weights already in (in, out) layout).
    B, N, C = cls_embs.shape
    _, M, _ = img_embs_p.shape
    H = num_heads
    hd = C // H
    scale = hd ** -0.5

    def ln(x, w, b):
        mu = x.mean(-1, keepdims=True)
        var = ((x - mu) ** 2).mean(-1, keepdims=True)
        return (x - mu) * jax.lax.rsqrt(var + LN_EPS) * w.reshape(-1) + b.reshape(-1)

    x = cls_embs
    for p in layer_params:
        q = ln(x, p["ln1w"], p["ln1b"])
        kv = ln(img_embs_p, p["ln2w"], p["ln2b"])
        qh = (q @ p["wq"]).reshape(B, N, H, hd).transpose(0, 2, 1, 3)
        kh = (kv @ p["wk"]).reshape(B, M, H, hd).transpose(0, 2, 1, 3)
        vh = (kv @ p["wv"]).reshape(B, M, H, hd).transpose(0, 2, 1, 3)
        s = jnp.einsum('bhnd,bhmd->bhnm', qh, kh) * scale
        a = jax.nn.softmax(s, axis=-1)
        o = jnp.einsum('bhnm,bhmd->bhnd', a, vh).transpose(0, 2, 1, 3).reshape(B, N, C)
        x = x + o @ p["wo"] + p["bo"].reshape(-1)
        h1 = ln(x, p["ln3w"], p["ln3b"]) @ p["w1"] + p["b1"].reshape(-1)
        h1 = h1 * jax.nn.sigmoid(1.702 * h1)
        x = x + h1 @ p["w2"] + p["b2"].reshape(-1)
    return x * alpha


if __name__ == "__main__":
    emb_dim = 32       # d_model
    num_heads = 8      # nhead
    B, N, M = 2, 8, 16  # batch, #cls tokens (queries), #image patch tokens (keys/values)

    root = jax.random.PRNGKey(0)
    k_cls, k_img, k_l0, k_l1 = jax.random.split(root, 4)

    cls_embs = jax.random.normal(k_cls, (B, N, emb_dim), dtype=jnp.float32)
    img_embs_p = jax.random.normal(k_img, (B, M, emb_dim), dtype=jnp.float32)

    layer_params = [init_layer_params(k_l0, emb_dim), init_layer_params(k_l1, emb_dim)]
    alpha = 0.1 * jnp.ones((emb_dim,), jnp.float32)

    out = post_visual_to_textual(cls_embs, img_embs_p, layer_params, alpha, num_heads=num_heads)
    out = jax.block_until_ready(out)

    assert out.shape == (B, N, emb_dim) and out.dtype == jnp.float32
    assert bool(jnp.all(jnp.isfinite(out)))

    ref = reference(cls_embs, img_embs_p, layer_params, alpha, num_heads)
    err = float(jnp.max(jnp.abs(out - ref)))
    assert err < 2e-2, f"max abs error vs reference: {err}"
    print("KERNEL_OK")
</pallas_src>

<mosaic_0001>
module attributes {stable_mosaic.version = 11 : i64} {
  func.func @fused_kernel(%arg0: memref<16x32xf32, #tpu.memory_space<vmem>>, %arg1: memref<32x32xf32, #tpu.memory_space<vmem>>, %arg2: memref<17x32xf32, #tpu.memory_space<vmem>>, %arg3: memref<2x128xf32, #tpu.memory_space<vmem>>, %arg4: memref<6x8x32x4xf32, #tpu.memory_space<vmem>>, %arg5: memref<2x8x4x32xf32, #tpu.memory_space<vmem>>, %arg6: memref<2x32x128xf32, #tpu.memory_space<vmem>>, %arg7: memref<2x128x32xf32, #tpu.memory_space<vmem>>, %arg8: memref<16x32xf32, #tpu.memory_space<vmem>>) attributes {dimension_semantics = [], scalar_prefetch = 0 : i64, scratch_operands = 0 : i64, tpu.core_type = #tpu.core_type<tc>} {
    %c0 = arith.constant 0 : index
    %c0_0 = arith.constant 0 : index
    %0 = vector.load %arg0[%c0, %c0_0] : memref<16x32xf32, #tpu.memory_space<vmem>>, vector<16x32xf32>
    %c0_1 = arith.constant 0 : index
    %c0_2 = arith.constant 0 : index
    %1 = vector.load %arg1[%c0_1, %c0_2] : memref<32x32xf32, #tpu.memory_space<vmem>>, vector<32x32xf32>
    %c0_3 = arith.constant 0 : index
    %c0_4 = arith.constant 0 : index
    %2 = vector.load %arg2[%c0_3, %c0_4] : memref<17x32xf32, #tpu.memory_space<vmem>>, vector<1x32xf32>
    %c1 = arith.constant 1 : index
    %c0_5 = arith.constant 0 : index
    %3 = vector.load %arg2[%c1, %c0_5] : memref<17x32xf32, #tpu.memory_space<vmem>>, vector<1x32xf32>
    %c2 = arith.constant 2 : index
    %c0_6 = arith.constant 0 : index
    %4 = vector.load %arg2[%c2, %c0_6] : memref<17x32xf32, #tpu.memory_space<vmem>>, vector<1x32xf32>
    %c3 = arith.constant 3 : index
    %c0_7 = arith.constant 0 : index
    %5 = vector.load %arg2[%c3, %c0_7] : memref<17x32xf32, #tpu.memory_space<vmem>>, vector<1x32xf32>
    %c4 = arith.constant 4 : index
    %c0_8 = arith.constant 0 : index
    %6 = vector.load %arg2[%c4, %c0_8] : memref<17x32xf32, #tpu.memory_space<vmem>>, vector<1x32xf32>
    %c5 = arith.constant 5 : index
    %c0_9 = arith.constant 0 : index
    %7 = vector.load %arg2[%c5, %c0_9] : memref<17x32xf32, #tpu.memory_space<vmem>>, vector<1x32xf32>
    %c6 = arith.constant 6 : index
    %c0_10 = arith.constant 0 : index
    %8 = vector.load %arg2[%c6, %c0_10] : memref<17x32xf32, #tpu.memory_space<vmem>>, vector<1x32xf32>
    %c7 = arith.constant 7 : index
    %c0_11 = arith.constant 0 : index
    %9 = vector.load %arg2[%c7, %c0_11] : memref<17x32xf32, #tpu.memory_space<vmem>>, vector<1x32xf32>
    %c0_12 = arith.constant 0 : index
    %c0_13 = arith.constant 0 : index
    %10 = vector.load %arg3[%c0_12, %c0_13] : memref<2x128xf32, #tpu.memory_space<vmem>>, vector<1x128xf32>
    %c0_14 = arith.constant 0 : index
    %c0_15 = arith.constant 0 : index
    %c0_16 = arith.constant 0 : index
    %c0_17 = arith.constant 0 : index
    %11 = vector.load %arg4[%c0_14, %c0_15, %c0_16, %c0_17] : memref<6x8x32x4xf32, #tpu.memory_space<vmem>>, vector<1x8x32x4xf32>
    %12 = vector.shape_cast %11 : vector<1x8x32x4xf32> to vector<8x32x4xf32>
    %c1_18 = arith.constant 1 : index
    %c0_19 = arith.constant 0 : index
    %c0_20 = arith.constant 0 : index
    %c0_21 = arith.constant 0 : index
    %13 = vector.load %arg4[%c1_18, %c0_19, %c0_20, %c0_21] : memref<6x8x32x4xf32, #tpu.memory_space<vmem>>, vector<1x8x32x4xf32>
    %14 = vector.shape_cast %13 : vector<1x8x32x4xf32> to vector<8x32x4xf32>
    %c2_22 = arith.constant 2 : index
    %c0_23 = arith.constant 0 : index
    %c0_24 = arith.constant 0 : index
    %c0_25 = arith.constant 0 : index
    %15 = vector.load %arg4[%c2_22, %c0_23, %c0_24, %c0_25] : memref<6x8x32x4xf32, #tpu.memory_space<vmem>>, vector<1x8x32x4xf32>
    %16 = vector.shape_cast %15 : vector<1x8x32x4xf32> to vector<8x32x4xf32>
    %c0_26 = arith.constant 0 : index
    %c0_27 = arith.constant 0 : index
    %c0_28 = arith.constant 0 : index
    %c0_29 = arith.constant 0 : index
    %17 = vector.load %arg5[%c0_26, %c0_27, %c0_28, %c0_29] : memref<2x8x4x32xf32, #tpu.memory_space<vmem>>, vector<1x8x4x32xf32>
    %18 = vector.shape_cast %17 : vector<1x8x4x32xf32> to vector<8x4x32xf32>
    %c0_30 = arith.constant 0 : index
    %c0_31 = arith.constant 0 : index
    %c0_32 = arith.constant 0 : index
    %19 = vector.load %arg6[%c0_30, %c0_31, %c0_32] : memref<2x32x128xf32, #tpu.memory_space<vmem>>, vector<1x32x128xf32>
    %20 = vector.shape_cast %19 : vector<1x32x128xf32> to vector<32x128xf32>
    %c0_33 = arith.constant 0 : index
    %c0_34 = arith.constant 0 : index
    %c0_35 = arith.constant 0 : index
    %21 = vector.load %arg7[%c0_33, %c0_34, %c0_35] : memref<2x128x32xf32, #tpu.memory_space<vmem>>, vector<1x128x32xf32>
    %22 = vector.shape_cast %21 : vector<1x128x32xf32> to vector<128x32xf32>
    %cst = arith.constant dense<0.000000e+00> : vector<16xf32>
    %23 = vector.multi_reduction <add>, %0, %cst [1] : vector<16x32xf32> to vector<16xf32>
    %24 = vector.shape_cast %23 : vector<16xf32> to vector<16x1xf32>
    %cst_36 = arith.constant 3.200000e+01 : f32
    %25 = vector.broadcast %cst_36 : f32 to vector<16x1xf32>
    %26 = arith.divf %24, %25 : vector<16x1xf32>
    %27 = vector.broadcast %26 : vector<16x1xf32> to vector<16x32xf32>
    %28 = arith.subf %0, %27 : vector<16x32xf32>
    %29 = arith.mulf %28, %28 : vector<16x32xf32>
    %cst_37 = arith.constant dense<0.000000e+00> : vector<16xf32>
    %30 = vector.multi_reduction <add>, %29, %cst_37 [1] : vector<16x32xf32> to vector<16xf32>
    %31 = vector.shape_cast %30 : vector<16xf32> to vector<16x1xf32>
    %cst_38 = arith.constant 3.200000e+01 : f32
    %32 = vector.broadcast %cst_38 : f32 to vector<16x1xf32>
    %33 = arith.divf %31, %32 : vector<16x1xf32>
    %34 = vector.broadcast %26 : vector<16x1xf32> to vector<16x32xf32>
    %35 = arith.subf %0, %34 : vector<16x32xf32>
    %cst_39 = arith.constant 9.99999974E-6 : f32
    %36 = vector.broadcast %cst_39 : f32 to vector<16x1xf32>
    %37 = arith.addf %33, %36 : vector<16x1xf32>
    %38 = math.rsqrt %37 : vector<16x1xf32>
    %39 = vector.broadcast %38 : vector<16x1xf32> to vector<16x32xf32>
    %40 = arith.mulf %35, %39 : vector<16x32xf32>
    %41 = vector.broadcast %2 : vector<1x32xf32> to vector<16x32xf32>
    %42 = arith.mulf %40, %41 : vector<16x32xf32>
    %43 = vector.broadcast %3 : vector<1x32xf32> to vector<16x32xf32>
    %44 = arith.addf %42, %43 : vector<16x32xf32>
    %cst_40 = arith.constant dense<0.000000e+00> : vector<32xf32>
    %45 = vector.multi_reduction <add>, %1, %cst_40 [1] : vector<32x32xf32> to vector<32xf32>
    %46 = vector.shape_cast %45 : vector<32xf32> to vector<32x1xf32>
    %cst_41 = arith.constant 3.200000e+01 : f32
    %47 = vector.broadcast %cst_41 : f32 to vector<32x1xf32>
    %48 = arith.divf %46, %47 : vector<32x1xf32>
    %49 = vector.broadcast %48 : vector<32x1xf32> to vector<32x32xf32>
    %50 = arith.subf %1, %49 : vector<32x32xf32>
    %51 = arith.mulf %50, %50 : vector<32x32xf32>
    %cst_42 = arith.constant dense<0.000000e+00> : vector<32xf32>
    %52 = vector.multi_reduction <add>, %51, %cst_42 [1] : vector<32x32xf32> to vector<32xf32>
    %53 = vector.shape_cast %52 : vector<32xf32> to vector<32x1xf32>
    %cst_43 = arith.constant 3.200000e+01 : f32
    %54 = vector.broadcast %cst_43 : f32 to vector<32x1xf32>
    %55 = arith.divf %53, %54 : vector<32x1xf32>
    %56 = vector.broadcast %48 : vector<32x1xf32> to vector<32x32xf32>
    %57 = arith.subf %1, %56 : vector<32x32xf32>
    %cst_44 = arith.constant 9.99999974E-6 : f32
    %58 = vector.broadcast %cst_44 : f32 to vector<32x1xf32>
    %59 = arith.addf %55, %58 : vector<32x1xf32>
    %60 = math.rsqrt %59 : vector<32x1xf32>
    %61 = vector.broadcast %60 : vector<32x1xf32> to vector<32x32xf32>
    %62 = arith.mulf %57, %61 : vector<32x32xf32>
    %63 = vector.broadcast %4 : vector<1x32xf32> to vector<32x32xf32>
    %64 = arith.mulf %62, %63 : vector<32x32xf32>
    %65 = vector.broadcast %5 : vector<1x32xf32> to vector<32x32xf32>
    %66 = arith.addf %64, %65 : vector<32x32xf32>
    %67 = vector.shape_cast %44 : vector<16x32xf32> to vector<2x1x8x32xf32>
    %68 = vector.shape_cast %67 : vector<2x1x8x32xf32> to vector<2x1x8x32xf32>
    %69 = vector.broadcast %68 : vector<2x1x8x32xf32> to vector<2x8x8x32xf32>
    %70 = vector.shape_cast %69 : vector<2x8x8x32xf32> to vector<16x8x32xf32>
    %71 = vector.shape_cast %66 : vector<32x32xf32> to vector<2x1x16x32xf32>
    %72 = vector.shape_cast %71 : vector<2x1x16x32xf32> to vector<2x1x16x32xf32>
    %73 = vector.broadcast %72 : vector<2x1x16x32xf32> to vector<2x8x16x32xf32>
    %74 = vector.shape_cast %73 : vector<2x8x16x32xf32> to vector<16x16x32xf32>
    %75 = vector.shape_cast %12 : vector<8x32x4xf32> to vector<1x8x32x4xf32>
    %76 = vector.shape_cast %75 : vector<1x8x32x4xf32> to vector<1x8x32x4xf32>
    %77 = vector.broadcast %76 : vector<1x8x32x4xf32> to vector<2x8x32x4xf32>
    %78 = vector.shape_cast %77 : vector<2x8x32x4xf32> to vector<16x32x4xf32>
    %79 = vector.shape_cast %14 : vector<8x32x4xf32> to vector<1x8x32x4xf32>
    %80 = vector.shape_cast %79 : vector<1x8x32x4xf32> to vector<1x8x32x4xf32>
    %81 = vector.broadcast %80 : vector<1x8x32x4xf32> to vector<2x8x32x4xf32>
    %82 = vector.shape_cast %81 : vector<2x8x32x4xf32> to vector<16x32x4xf32>
    %83 = vector.shape_cast %16 : vector<8x32x4xf32> to vector<1x8x32x4xf32>
    %84 = vector.shape_cast %83 : vector<1x8x32x4xf32> to vector<1x8x32x4xf32>
    %85 = vector.broadcast %84 : vector<1x8x32x4xf32> to vector<2x8x32x4xf32>
    %86 = vector.shape_cast %85 : vector<2x8x32x4xf32> to vector<16x32x4xf32>
    %87 = vector.shape_cast %18 : vector<8x4x32xf32> to vector<1x8x4x32xf32>
    %88 = vector.shape_cast %87 : vector<1x8x4x32xf32> to vector<1x8x4x32xf32>
    %89 = vector.broadcast %88 : vector<1x8x4x32xf32> to vector<2x8x4x32xf32>
    %90 = vector.shape_cast %89 : vector<2x8x4x32xf32> to vector<16x4x32xf32>
    "tpu.trace_start"() <{level = 10 : i32, message = "bnc,bcd->bnd"}> : () -> ()
    %cst_45 = arith.constant dense<0.000000e+00> : vector<16x8x4xf32>
    %91 = tpu.matmul %70, %78, %cst_45 {dimension_numbers = #tpu.dot_dimension_numbers<[2], [1], [1], [2], [0, 0, 0, 1, 1, 2], [0], [0]>} : vector<16x8x32xf32>, vector<16x32x4xf32>, vector<16x8x4xf32> -> vector<16x8x4xf32>
    "tpu.trace_stop"() : () -> ()
    %cst_46 = arith.constant 5.000000e-01 : f32
    %92 = vector.broadcast %cst_46 : f32 to vector<16x8x4xf32>
    %93 = arith.mulf %91, %92 : vector<16x8x4xf32>
    "tpu.trace_start"() <{level = 10 : i32, message = "bmc,bcd->bmd"}> : () -> ()
    %cst_47 = arith.constant dense<0.000000e+00> : vector<16x16x4xf32>
    %94 = tpu.matmul %74, %82, %cst_47 {dimension_numbers = #tpu.dot_dimension_numbers<[2], [1], [1], [2], [0, 0, 0, 1, 1, 2], [0], [0]>} : vector<16x16x32xf32>, vector<16x32x4xf32>, vector<16x16x4xf32> -> vector<16x16x4xf32>
    %cst_48 = arith.constant dense<0.000000e+00> : vector<16x16x4xf32>
    %95 = tpu.matmul %74, %86, %cst_48 {dimension_numbers = #tpu.dot_dimension_numbers<[2], [1], [1], [2], [0, 0, 0, 1, 1, 2], [0], [0]>} : vector<16x16x32xf32>, vector<16x32x4xf32>, vector<16x16x4xf32> -> vector<16x16x4xf32>
    "tpu.trace_stop"() : () -> ()
    "tpu.trace_start"() <{level = 10 : i32, message = "bnd,bmd->bnm"}> : () -> ()
    %cst_49 = arith.constant dense<0.000000e+00> : vector<16x8x16xf32>
    %96 = tpu.matmul %93, %94, %cst_49 {dimension_numbers = #tpu.dot_dimension_numbers<[2], [2], [1], [1], [0, 0, 0, 1, 1, 1], [0], [0]>} : vector<16x8x4xf32>, vector<16x16x4xf32>, vector<16x8x16xf32> -> vector<16x8x16xf32>
    "tpu.trace_stop"() : () -> ()
    %cst_50 = arith.constant dense<0xFF800000> : vector<16x8xf32>
    %97 = vector.multi_reduction <maximumf>, %96, %cst_50 [2] : vector<16x8x16xf32> to vector<16x8xf32>
    %98 = vector.shape_cast %97 : vector<16x8xf32> to vector<16x8x1xf32>
    %99 = vector.broadcast %98 : vector<16x8x1xf32> to vector<16x8x16xf32>
    %100 = arith.subf %96, %99 : vector<16x8x16xf32>
    %101 = math.exp %100 : vector<16x8x16xf32>
    %cst_51 = arith.constant dense<0.000000e+00> : vector<16x8xf32>
    %102 = vector.multi_reduction <add>, %101, %cst_51 [2] : vector<16x8x16xf32> to vector<16x8xf32>
    %103 = vector.shape_cast %102 : vector<16x8xf32> to vector<16x8x1xf32>
    %104 = tpu.reciprocal %103 {approx = true} : vector<16x8x1xf32> -> vector<16x8x1xf32>
    %105 = vector.broadcast %104 : vector<16x8x1xf32> to vector<16x8x16xf32>
    %106 = arith.mulf %101, %105 : vector<16x8x16xf32>
    "tpu.trace_start"() <{level = 10 : i32, message = "bnm,bmd->bnd"}> : () -> ()
    %cst_52 = arith.constant dense<0.000000e+00> : vector<16x8x4xf32>
    %107 = tpu.matmul %106, %95, %cst_52 {dimension_numbers = #tpu.dot_dimension_numbers<[2], [1], [1], [2], [0, 0, 0, 1, 1, 2], [0], [0]>} : vector<16x8x16xf32>, vector<16x16x4xf32>, vector<16x8x4xf32> -> vector<16x8x4xf32>
    "tpu.trace_stop"() : () -> ()
    "tpu.trace_start"() <{level = 10 : i32, message = "bnd,bdc->bnc"}> : () -> ()
    %cst_53 = arith.constant dense<0.000000e+00> : vector<16x8x32xf32>
    %108 = tpu.matmul %107, %90, %cst_53 {dimension_numbers = #tpu.dot_dimension_numbers<[2], [1], [1], [2], [0, 0, 0, 1, 1, 2], [0], [0]>} : vector<16x8x4xf32>, vector<16x4x32xf32>, vector<16x8x32xf32> -> vector<16x8x32xf32>
    "tpu.trace_stop"() : () -> ()
    %109 = vector.shape_cast %108 : vector<16x8x32xf32> to vector<2x8x8x32xf32>
    %cst_54 = arith.constant dense<0.000000e+00> : vector<2x8x32xf32>
    %110 = vector.multi_reduction <add>, %109, %cst_54 [1] : vector<2x8x8x32xf32> to vector<2x8x32xf32>
    %111 = vector.shape_cast %110 : vector<2x8x32xf32> to vector<16x32xf32>
    %112 = vector.broadcast %8 : vector<1x32xf32> to vector<16x32xf32>
    %113 = arith.addf %111, %112 : vector<16x32xf32>
    %114 = arith.addf %0, %113 : vector<16x32xf32>
    %cst_55 = arith.constant dense<0.000000e+00> : vector<16xf32>
    %115 = vector.multi_reduction <add>, %114, %cst_55 [1] : vector<16x32xf32> to vector<16xf32>
    %116 = vector.shape_cast %115 : vector<16xf32> to vector<16x1xf32>
    %cst_56 = arith.constant 3.200000e+01 : f32
    %117 = vector.broadcast %cst_56 : f32 to vector<16x1xf32>
    %118 = arith.divf %116, %117 : vector<16x1xf32>
    %119 = vector.broadcast %118 : vector<16x1xf32> to vector<16x32xf32>
    %120 = arith.subf %114, %119 : vector<16x32xf32>
    %121 = arith.mulf %120, %120 : vector<16x32xf32>
    %cst_57 = arith.constant dense<0.000000e+00> : vector<16xf32>
    %122 = vector.multi_reduction <add>, %121, %cst_57 [1] : vector<16x32xf32> to vector<16xf32>
    %123 = vector.shape_cast %122 : vector<16xf32> to vector<16x1xf32>
    %cst_58 = arith.constant 3.200000e+01 : f32
    %124 = vector.broadcast %cst_58 : f32 to vector<16x1xf32>
    %125 = arith.divf %123, %124 : vector<16x1xf32>
    %126 = vector.broadcast %118 : vector<16x1xf32> to vector<16x32xf32>
    %127 = arith.subf %114, %126 : vector<16x32xf32>
    %cst_59 = arith.constant 9.99999974E-6 : f32
    %128 = vector.broadcast %cst_59 : f32 to vector<16x1xf32>
    %129 = arith.addf %125, %128 : vector<16x1xf32>
    %130 = math.rsqrt %129 : vector<16x1xf32>
    %131 = vector.broadcast %130 : vector<16x1xf32> to vector<16x32xf32>
    %132 = arith.mulf %127, %131 : vector<16x32xf32>
    %133 = vector.broadcast %6 : vector<1x32xf32> to vector<16x32xf32>
    %134 = arith.mulf %132, %133 : vector<16x32xf32>
    %135 = vector.broadcast %7 : vector<1x32xf32> to vector<16x32xf32>
    %136 = arith.addf %134, %135 : vector<16x32xf32>
    %cst_60 = arith.constant dense<0.000000e+00> : vector<16x128xf32>
    %137 = tpu.matmul %136, %20, %cst_60 {dimension_numbers = #tpu.dot_dimension_numbers<[1], [0], [0], [1], [0, 0, 1, 1], [], []>} : vector<16x32xf32>, vector<32x128xf32>, vector<16x128xf32> -> vector<16x128xf32>
    %138 = vector.broadcast %10 : vector<1x128xf32> to vector<16x128xf32>
    %139 = arith.addf %137, %138 : vector<16x128xf32>
    %cst_61 = arith.constant 1.702000e+00 : f32
    %140 = vector.broadcast %cst_61 : f32 to vector<16x128xf32>
    %141 = arith.mulf %140, %139 : vector<16x128xf32>
    %142 = arith.negf %141 : vector<16x128xf32>
    %143 = math.exp %142 : vector<16x128xf32>
    %cst_62 = arith.constant 1.000000e+00 : f32
    %144 = vector.broadcast %cst_62 : f32 to vector<16x128xf32>
    %145 = arith.addf %144, %143 : vector<16x128xf32>
    %146 = arith.divf %144, %145 : vector<16x128xf32>
    %147 = arith.mulf %139, %146 : vector<16x128xf32>
    %cst_63 = arith.constant dense<0.000000e+00> : vector<16x32xf32>
    %148 = tpu.matmul %147, %22, %cst_63 {dimension_numbers = #tpu.dot_dimension_numbers<[1], [0], [0], [1], [0, 0, 1, 1], [], []>} : vector<16x128xf32>, vector<128x32xf32>, vector<16x32xf32> -> vector<16x32xf32>
    %149 = vector.broadcast %9 : vector<1x32xf32> to vector<16x32xf32>
    %150 = arith.addf %148, %149 : vector<16x32xf32>
    %151 = arith.addf %114, %150 : vector<16x32xf32>
    %c8 = arith.constant 8 : index
    %c0_64 = arith.constant 0 : index
    %152 = vector.load %arg2[%c8, %c0_64] : memref<17x32xf32, #tpu.memory_space<vmem>>, vector<1x32xf32>
    %c9 = arith.constant 9 : index
    %c0_65 = arith.constant 0 : index
    %153 = vector.load %arg2[%c9, %c0_65] : memref<17x32xf32, #tpu.memory_space<vmem>>, vector<1x32xf32>
    %c10 = arith.constant 10 : index
    %c0_66 = arith.constant 0 : index
    %154 = vector.load %arg2[%c10, %c0_66] : memref<17x32xf32, #tpu.memory_space<vmem>>, vector<1x32xf32>
    %c11 = arith.constant 11 : index
    %c0_67 = arith.constant 0 : index
    %155 = vector.load %arg2[%c11, %c0_67] : memref<17x32xf32, #tpu.memory_space<vmem>>, vector<1x32xf32>
    %c12 = arith.constant 12 : index
    %c0_68 = arith.constant 0 : index
    %156 = vector.load %arg2[%c12, %c0_68] : memref<17x32xf32, #tpu.memory_space<vmem>>, vector<1x32xf32>
    %c13 = arith.constant 13 : index
    %c0_69 = arith.constant 0 : index
    %157 = vector.load %arg2[%c13, %c0_69] : memref<17x32xf32, #tpu.memory_space<vmem>>, vector<1x32xf32>
    %c14 = arith.constant 14 : index
    %c0_70 = arith.constant 0 : index
    %158 = vector.load %arg2[%c14, %c0_70] : memref<17x32xf32, #tpu.memory_space<vmem>>, vector<1x32xf32>
    %c15 = arith.constant 15 : index
    %c0_71 = arith.constant 0 : index
    %159 = vector.load %arg2[%c15, %c0_71] : memref<17x32xf32, #tpu.memory_space<vmem>>, vector<1x32xf32>
    %c1_72 = arith.constant 1 : index
    %c0_73 = arith.constant 0 : index
    %160 = vector.load %arg3[%c1_72, %c0_73] : memref<2x128xf32, #tpu.memory_space<vmem>>, vector<1x128xf32>
    %c3_74 = arith.constant 3 : index
    %c0_75 = arith.constant 0 : index
    %c0_76 = arith.constant 0 : index
    %c0_77 = arith.constant 0 : index
    %161 = vector.load %arg4[%c3_74, %c0_75, %c0_76, %c0_77] : memref<6x8x32x4xf32, #tpu.memory_space<vmem>>, vector<1x8x32x4xf32>
    %162 = vector.shape_cast %161 : vector<1x8x32x4xf32> to vector<8x32x4xf32>
    %c4_78 = arith.constant 4 : index
    %c0_79 = arith.constant 0 : index
    %c0_80 = arith.constant 0 : index
    %c0_81 = arith.constant 0 : index
    %163 = vector.load %arg4[%c4_78, %c0_79, %c0_80, %c0_81] : memref<6x8x32x4xf32, #tpu.memory_space<vmem>>, vector<1x8x32x4xf32>
    %164 = vector.shape_cast %163 : vector<1x8x32x4xf32> to vector<8x32x4xf32>
    %c5_82 = arith.constant 5 : index
    %c0_83 = arith.constant 0 : index
    %c0_84 = arith.constant 0 : index
    %c0_85 = arith.constant 0 : index
    %165 = vector.load %arg4[%c5_82, %c0_83, %c0_84, %c0_85] : memref<6x8x32x4xf32, #tpu.memory_space<vmem>>, vector<1x8x32x4xf32>
    %166 = vector.shape_cast %165 : vector<1x8x32x4xf32> to vector<8x32x4xf32>
    %c1_86 = arith.constant 1 : index
    %c0_87 = arith.constant 0 : index
    %c0_88 = arith.constant 0 : index
    %c0_89 = arith.constant 0 : index
    %167 = vector.load %arg5[%c1_86, %c0_87, %c0_88, %c0_89] : memref<2x8x4x32xf32, #tpu.memory_space<vmem>>, vector<1x8x4x32xf32>
    %168 = vector.shape_cast %167 : vector<1x8x4x32xf32> to vector<8x4x32xf32>
    %c1_90 = arith.constant 1 : index
    %c0_91 = arith.constant 0 : index
    %c0_92 = arith.constant 0 : index
    %169 = vector.load %arg6[%c1_90, %c0_91, %c0_92] : memref<2x32x128xf32, #tpu.memory_space<vmem>>, vector<1x32x128xf32>
    %170 = vector.shape_cast %169 : vector<1x32x128xf32> to vector<32x128xf32>
    %c1_93 = arith.constant 1 : index
    %c0_94 = arith.constant 0 : index
    %c0_95 = arith.constant 0 : index
    %171 = vector.load %arg7[%c1_93, %c0_94, %c0_95] : memref<2x128x32xf32, #tpu.memory_space<vmem>>, vector<1x128x32xf32>
    %172 = vector.shape_cast %171 : vector<1x128x32xf32> to vector<128x32xf32>
    %cst_96 = arith.constant dense<0.000000e+00> : vector<16xf32>
    %173 = vector.multi_reduction <add>, %151, %cst_96 [1] : vector<16x32xf32> to vector<16xf32>
    %174 = vector.shape_cast %173 : vector<16xf32> to vector<16x1xf32>
    %cst_97 = arith.constant 3.200000e+01 : f32
    %175 = vector.broadcast %cst_97 : f32 to vector<16x1xf32>
    %176 = arith.divf %174, %175 : vector<16x1xf32>
    %177 = vector.broadcast %176 : vector<16x1xf32> to vector<16x32xf32>
    %178 = arith.subf %151, %177 : vector<16x32xf32>
    %179 = arith.mulf %178, %178 : vector<16x32xf32>
    %cst_98 = arith.constant dense<0.000000e+00> : vector<16xf32>
    %180 = vector.multi_reduction <add>, %179, %cst_98 [1] : vector<16x32xf32> to vector<16xf32>
    %181 = vector.shape_cast %180 : vector<16xf32> to vector<16x1xf32>
    %cst_99 = arith.constant 3.200000e+01 : f32
    %182 = vector.broadcast %cst_99 : f32 to vector<16x1xf32>
    %183 = arith.divf %181, %182 : vector<16x1xf32>
    %184 = vector.broadcast %176 : vector<16x1xf32> to vector<16x32xf32>
    %185 = arith.subf %151, %184 : vector<16x32xf32>
    %cst_100 = arith.constant 9.99999974E-6 : f32
    %186 = vector.broadcast %cst_100 : f32 to vector<16x1xf32>
    %187 = arith.addf %183, %186 : vector<16x1xf32>
    %188 = math.rsqrt %187 : vector<16x1xf32>
    %189 = vector.broadcast %188 : vector<16x1xf32> to vector<16x32xf32>
    %190 = arith.mulf %185, %189 : vector<16x32xf32>
    %191 = vector.broadcast %152 : vector<1x32xf32> to vector<16x32xf32>
    %192 = arith.mulf %190, %191 : vector<16x32xf32>
    %193 = vector.broadcast %153 : vector<1x32xf32> to vector<16x32xf32>
    %194 = arith.addf %192, %193 : vector<16x32xf32>
    %cst_101 = arith.constant dense<0.000000e+00> : vector<32xf32>
    %195 = vector.multi_reduction <add>, %1, %cst_101 [1] : vector<32x32xf32> to vector<32xf32>
    %196 = vector.shape_cast %195 : vector<32xf32> to vector<32x1xf32>
    %cst_102 = arith.constant 3.200000e+01 : f32
    %197 = vector.broadcast %cst_102 : f32 to vector<32x1xf32>
    %198 = arith.divf %196, %197 : vector<32x1xf32>
    %199 = vector.broadcast %198 : vector<32x1xf32> to vector<32x32xf32>
    %200 = arith.subf %1, %199 : vector<32x32xf32>
    %201 = arith.mulf %200, %200 : vector<32x32xf32>
    %cst_103 = arith.constant dense<0.000000e+00> : vector<32xf32>
    %202 = vector.multi_reduction <add>, %201, %cst_103 [1] : vector<32x32xf32> to vector<32xf32>
    %203 = vector.shape_cast %202 : vector<32xf32> to vector<32x1xf32>
    %cst_104 = arith.constant 3.200000e+01 : f32
    %204 = vector.broadcast %cst_104 : f32 to vector<32x1xf32>
    %205 = arith.divf %203, %204 : vector<32x1xf32>
    %206 = vector.broadcast %198 : vector<32x1xf32> to vector<32x32xf32>
    %207 = arith.subf %1, %206 : vector<32x32xf32>
    %cst_105 = arith.constant 9.99999974E-6 : f32
    %208 = vector.broadcast %cst_105 : f32 to vector<32x1xf32>
    %209 = arith.addf %205, %208 : vector<32x1xf32>
    %210 = math.rsqrt %209 : vector<32x1xf32>
    %211 = vector.broadcast %210 : vector<32x1xf32> to vector<32x32xf32>
    %212 = arith.mulf %207, %211 : vector<32x32xf32>
    %213 = vector.broadcast %154 : vector<1x32xf32> to vector<32x32xf32>
    %214 = arith.mulf %212, %213 : vector<32x32xf32>
    %215 = vector.broadcast %155 : vector<1x32xf32> to vector<32x32xf32>
    %216 = arith.addf %214, %215 : vector<32x32xf32>
    %217 = vector.shape_cast %194 : vector<16x32xf32> to vector<2x1x8x32xf32>
    %218 = vector.shape_cast %217 : vector<2x1x8x32xf32> to vector<2x1x8x32xf32>
    %219 = vector.broadcast %218 : vector<2x1x8x32xf32> to vector<2x8x8x32xf32>
    %220 = vector.shape_cast %219 : vector<2x8x8x32xf32> to vector<16x8x32xf32>
    %221 = vector.shape_cast %216 : vector<32x32xf32> to vector<2x1x16x32xf32>
    %222 = vector.shape_cast %221 : vector<2x1x16x32xf32> to vector<2x1x16x32xf32>
    %223 = vector.broadcast %222 : vector<2x1x16x32xf32> to vector<2x8x16x32xf32>
    %224 = vector.shape_cast %223 : vector<2x8x16x32xf32> to vector<16x16x32xf32>
    %225 = vector.shape_cast %162 : vector<8x32x4xf32> to vector<1x8x32x4xf32>
    %226 = vector.shape_cast %225 : vector<1x8x32x4xf32> to vector<1x8x32x4xf32>
    %227 = vector.broadcast %226 : vector<1x8x32x4xf32> to vector<2x8x32x4xf32>
    %228 = vector.shape_cast %227 : vector<2x8x32x4xf32> to vector<16x32x4xf32>
    %229 = vector.shape_cast %164 : vector<8x32x4xf32> to vector<1x8x32x4xf32>
    %230 = vector.shape_cast %229 : vector<1x8x32x4xf32> to vector<1x8x32x4xf32>
    %231 = vector.broadcast %230 : vector<1x8x32x4xf32> to vector<2x8x32x4xf32>
    %232 = vector.shape_cast %231 : vector<2x8x32x4xf32> to vector<16x32x4xf32>
    %233 = vector.shape_cast %166 : vector<8x32x4xf32> to vector<1x8x32x4xf32>
    %234 = vector.shape_cast %233 : vector<1x8x32x4xf32> to vector<1x8x32x4xf32>
    %235 = vector.broadcast %234 : vector<1x8x32x4xf32> to vector<2x8x32x4xf32>
    %236 = vector.shape_cast %235 : vector<2x8x32x4xf32> to vector<16x32x4xf32>
    %237 = vector.shape_cast %168 : vector<8x4x32xf32> to vector<1x8x4x32xf32>
    %238 = vector.shape_cast %237 : vector<1x8x4x32xf32> to vector<1x8x4x32xf32>
    %239 = vector.broadcast %238 : vector<1x8x4x32xf32> to vector<2x8x4x32xf32>
    %240 = vector.shape_cast %239 : vector<2x8x4x32xf32> to vector<16x4x32xf32>
    "tpu.trace_start"() <{level = 10 : i32, message = "bnc,bcd->bnd"}> : () -> ()
    %cst_106 = arith.constant dense<0.000000e+00> : vector<16x8x4xf32>
    %241 = tpu.matmul %220, %228, %cst_106 {dimension_numbers = #tpu.dot_dimension_numbers<[2], [1], [1], [2], [0, 0, 0, 1, 1, 2], [0], [0]>} : vector<16x8x32xf32>, vector<16x32x4xf32>, vector<16x8x4xf32> -> vector<16x8x4xf32>
    "tpu.trace_stop"() : () -> ()
    %cst_107 = arith.constant 5.000000e-01 : f32
    %242 = vector.broadcast %cst_107 : f32 to vector<16x8x4xf32>
    %243 = arith.mulf %241, %242 : vector<16x8x4xf32>
    "tpu.trace_start"() <{level = 10 : i32, message = "bmc,bcd->bmd"}> : () -> ()
    %cst_108 = arith.constant dense<0.000000e+00> : vector<16x16x4xf32>
    %244 = tpu.matmul %224, %232, %cst_108 {dimension_numbers = #tpu.dot_dimension_numbers<[2], [1], [1], [2], [0, 0, 0, 1, 1, 2], [0], [0]>} : vector<16x16x32xf32>, vector<16x32x4xf32>, vector<16x16x4xf32> -> vector<16x16x4xf32>
    %cst_109 = arith.constant dense<0.000000e+00> : vector<16x16x4xf32>
    %245 = tpu.matmul %224, %236, %cst_109 {dimension_numbers = #tpu.dot_dimension_numbers<[2], [1], [1], [2], [0, 0, 0, 1, 1, 2], [0], [0]>} : vector<16x16x32xf32>, vector<16x32x4xf32>, vector<16x16x4xf32> -> vector<16x16x4xf32>
    "tpu.trace_stop"() : () -> ()
    "tpu.trace_start"() <{level = 10 : i32, message = "bnd,bmd->bnm"}> : () -> ()
    %cst_110 = arith.constant dense<0.000000e+00> : vector<16x8x16xf32>
    %246 = tpu.matmul %243, %244, %cst_110 {dimension_numbers = #tpu.dot_dimension_numbers<[2], [2], [1], [1], [0, 0, 0, 1, 1, 1], [0], [0]>} : vector<16x8x4xf32>, vector<16x16x4xf32>, vector<16x8x16xf32> -> vector<16x8x16xf32>
    "tpu.trace_stop"() : () -> ()
    %cst_111 = arith.constant dense<0xFF800000> : vector<16x8xf32>
    %247 = vector.multi_reduction <maximumf>, %246, %cst_111 [2] : vector<16x8x16xf32> to vector<16x8xf32>
    %248 = vector.shape_cast %247 : vector<16x8xf32> to vector<16x8x1xf32>
    %249 = vector.broadcast %248 : vector<16x8x1xf32> to vector<16x8x16xf32>
    %250 = arith.subf %246, %249 : vector<16x8x16xf32>
    %251 = math.exp %250 : vector<16x8x16xf32>
    %cst_112 = arith.constant dense<0.000000e+00> : vector<16x8xf32>
    %252 = vector.multi_reduction <add>, %251, %cst_112 [2] : vector<16x8x16xf32> to vector<16x8xf32>
    %253 = vector.shape_cast %252 : vector<16x8xf32> to vector<16x8x1xf32>
    %254 = tpu.reciprocal %253 {approx = true} : vector<16x8x1xf32> -> vector<16x8x1xf32>
    %255 = vector.broadcast %254 : vector<16x8x1xf32> to vector<16x8x16xf32>
    %256 = arith.mulf %251, %255 : vector<16x8x16xf32>
    "tpu.trace_start"() <{level = 10 : i32, message = "bnm,bmd->bnd"}> : () -> ()
    %cst_113 = arith.constant dense<0.000000e+00> : vector<16x8x4xf32>
    %257 = tpu.matmul %256, %245, %cst_113 {dimension_numbers = #tpu.dot_dimension_numbers<[2], [1], [1], [2], [0, 0, 0, 1, 1, 2], [0], [0]>} : vector<16x8x16xf32>, vector<16x16x4xf32>, vector<16x8x4xf32> -> vector<16x8x4xf32>
    "tpu.trace_stop"() : () -> ()
    "tpu.trace_start"() <{level = 10 : i32, message = "bnd,bdc->bnc"}> : () -> ()
    %cst_114 = arith.constant dense<0.000000e+00> : vector<16x8x32xf32>
    %258 = tpu.matmul %257, %240, %cst_114 {dimension_numbers = #tpu.dot_dimension_numbers<[2], [1], [1], [2], [0, 0, 0, 1, 1, 2], [0], [0]>} : vector<16x8x4xf32>, vector<16x4x32xf32>, vector<16x8x32xf32> -> vector<16x8x32xf32>
    "tpu.trace_stop"() : () -> ()
    %259 = vector.shape_cast %258 : vector<16x8x32xf32> to vector<2x8x8x32xf32>
    %cst_115 = arith.constant dense<0.000000e+00> : vector<2x8x32xf32>
    %260 = vector.multi_reduction <add>, %259, %cst_115 [1] : vector<2x8x8x32xf32> to vector<2x8x32xf32>
    %261 = vector.shape_cast %260 : vector<2x8x32xf32> to vector<16x32xf32>
    %262 = vector.broadcast %158 : vector<1x32xf32> to vector<16x32xf32>
    %263 = arith.addf %261, %262 : vector<16x32xf32>
    %264 = arith.addf %151, %263 : vector<16x32xf32>
    %cst_116 = arith.constant dense<0.000000e+00> : vector<16xf32>
    %265 = vector.multi_reduction <add>, %264, %cst_116 [1] : vector<16x32xf32> to vector<16xf32>
    %266 = vector.shape_cast %265 : vector<16xf32> to vector<16x1xf32>
    %cst_117 = arith.constant 3.200000e+01 : f32
    %267 = vector.broadcast %cst_117 : f32 to vector<16x1xf32>
    %268 = arith.divf %266, %267 : vector<16x1xf32>
    %269 = vector.broadcast %268 : vector<16x1xf32> to vector<16x32xf32>
    %270 = arith.subf %264, %269 : vector<16x32xf32>
    %271 = arith.mulf %270, %270 : vector<16x32xf32>
    %cst_118 = arith.constant dense<0.000000e+00> : vector<16xf32>
    %272 = vector.multi_reduction <add>, %271, %cst_118 [1] : vector<16x32xf32> to vector<16xf32>
    %273 = vector.shape_cast %272 : vector<16xf32> to vector<16x1xf32>
    %cst_119 = arith.constant 3.200000e+01 : f32
    %274 = vector.broadcast %cst_119 : f32 to vector<16x1xf32>
    %275 = arith.divf %273, %274 : vector<16x1xf32>
    %276 = vector.broadcast %268 : vector<16x1xf32> to vector<16x32xf32>
    %277 = arith.subf %264, %276 : vector<16x32xf32>
    %cst_120 = arith.constant 9.99999974E-6 : f32
    %278 = vector.broadcast %cst_120 : f32 to vector<16x1xf32>
    %279 = arith.addf %275, %278 : vector<16x1xf32>
    %280 = math.rsqrt %279 : vector<16x1xf32>
    %281 = vector.broadcast %280 : vector<16x1xf32> to vector<16x32xf32>
    %282 = arith.mulf %277, %281 : vector<16x32xf32>
    %283 = vector.broadcast %156 : vector<1x32xf32> to vector<16x32xf32>
    %284 = arith.mulf %282, %283 : vector<16x32xf32>
    %285 = vector.broadcast %157 : vector<1x32xf32> to vector<16x32xf32>
    %286 = arith.addf %284, %285 : vector<16x32xf32>
    %cst_121 = arith.constant dense<0.000000e+00> : vector<16x128xf32>
    %287 = tpu.matmul %286, %170, %cst_121 {dimension_numbers = #tpu.dot_dimension_numbers<[1], [0], [0], [1], [0, 0, 1, 1], [], []>} : vector<16x32xf32>, vector<32x128xf32>, vector<16x128xf32> -> vector<16x128xf32>
    %288 = vector.broadcast %160 : vector<1x128xf32> to vector<16x128xf32>
    %289 = arith.addf %287, %288 : vector<16x128xf32>
    %cst_122 = arith.constant 1.702000e+00 : f32
    %290 = vector.broadcast %cst_122 : f32 to vector<16x128xf32>
    %291 = arith.mulf %290, %289 : vector<16x128xf32>
    %292 = arith.negf %291 : vector<16x128xf32>
    %293 = math.exp %292 : vector<16x128xf32>
    %cst_123 = arith.constant 1.000000e+00 : f32
    %294 = vector.broadcast %cst_123 : f32 to vector<16x128xf32>
    %295 = arith.addf %294, %293 : vector<16x128xf32>
    %296 = arith.divf %294, %295 : vector<16x128xf32>
    %297 = arith.mulf %289, %296 : vector<16x128xf32>
    %cst_124 = arith.constant dense<0.000000e+00> : vector<16x32xf32>
    %298 = tpu.matmul %297, %172, %cst_124 {dimension_numbers = #tpu.dot_dimension_numbers<[1], [0], [0], [1], [0, 0, 1, 1], [], []>} : vector<16x128xf32>, vector<128x32xf32>, vector<16x32xf32> -> vector<16x32xf32>
    %299 = vector.broadcast %159 : vector<1x32xf32> to vector<16x32xf32>
    %300 = arith.addf %298, %299 : vector<16x32xf32>
    %301 = arith.addf %264, %300 : vector<16x32xf32>
    %c16 = arith.constant 16 : index
    %c0_125 = arith.constant 0 : index
    %302 = vector.load %arg2[%c16, %c0_125] : memref<17x32xf32, #tpu.memory_space<vmem>>, vector<1x32xf32>
    %303 = vector.broadcast %302 : vector<1x32xf32> to vector<16x32xf32>
    %304 = arith.mulf %301, %303 : vector<16x32xf32>
    %c0_126 = arith.constant 0 : index
    %c0_127 = arith.constant 0 : index
    %305 = vector.load %arg8[%c0_126, %c0_127] : memref<16x32xf32, #tpu.memory_space<vmem>>, vector<16x32xf32>
    tpu.vector_store %arg8[%c0_126, %c0_127], %304 {strides = array<i32>} : memref<16x32xf32, #tpu.memory_space<vmem>>, vector<16x32xf32>,
    return
  }
}

</mosaic_0001>

<bundles_post_ra>
// kernel: tpu_custom_call.1
= control target key start
LH: loop header
LB: loop body
LE: loop exit
PB: predicated region body
PF: predicated region fallthrough
CT: control target
= control target key end

     0   :  { %vm171_vm0 = vcmask 261120   ;;  %s22825_s0 = inlined_call_operand.vmem [shape: f32[16,32], index: 0, kind: input, shape index: {}]   ;;  %s22826_s1 = inlined_call_operand.vmem [shape: f32[32,32], index: 1, kind: input, shape index: {}]   ;;  %s22827_s2 = inlined_call_operand.vmem [shape: f32[17,32], index: 2, kind: input, shape index: {}]   ;;  %s22828_s3 = inlined_call_operand.vmem [shape: f32[2,128], index: 3, kind: input, shape index: {}]   ;;  %s22829_s4 = inlined_call_operand.vmem [shape: f32[6,8,32,4], index: 4, kind: input, shape index: {}]   ;;  %s22830_s5 = inlined_call_operand.vmem [shape: f32[2,8,4,32], index: 5, kind: input, shape index: {}]   ;;  %s22831_s6 = inlined_call_operand.vmem [shape: f32[2,32,128], index: 6, kind: input, shape index: {}]   ;;  %s22832_s7 = inlined_call_operand.vmem [shape: f32[2,128,32], index: 7, kind: input, shape index: {}]   ;;  %s22833_s8 = inlined_call_operand.hbm [shape: f32[16,32], index: 8, kind: output, shape index: {}]  }
   0x1   :  { %v30_v0 = vld [vmem:[%s22825_s0] sm:$0xff]  ;;  %v31_v2 = vld [vmem:[%s22825_s0 + $0x8] sm:$0xff] }
   0x2   :  { %v32_v1 = vld [vmem:[%s22826_s1] sm:$0xff]  ;;  %v172_v3 = vsel %vm171_vm0, %v30_v0, 0.0  ;;  %v33_v5 = vld [vmem:[%s22826_s1 + $0x8] sm:$0xff] }
   0x3   :  { %v211_v4 = vsel %vm171_vm0, %v32_v1, 0.0  ;;  %173 = vadd.xlane.f32.xlu0 %v172_v3 }
   0x4   :  { %212 = vadd.xlane.f32.xlu1 %v211_v4 }
   0x5   :  { %13 = vsyncpa [#allocation3], 0  ;;  %v175_v6 = vsel %vm171_vm0, %v31_v2, 0.0  ;;  %v214_v7 = vsel %vm171_vm0, %v33_v5, 0.0  ;;  %v34_v8 = vld [vmem:[%s22826_s1 + $0x10] sm:$0xff]  ;;  %v35_v21 = vld [vmem:[%s22826_s1 + $0x18] sm:$0xff] }
   0x6   :  { %v217_v9 = vsel %vm171_vm0, %v34_v8, 0.0  ;;  %v220_v26 = vsel %vm171_vm0, %v35_v21, 0.0  ;;  %v19092_v37 = vmov 0.0   ;;  %v19196_v38 = vld [vmem:[%s22829_s4 + $0x18] sm:$0xff]  ;;  %v19210_v40 = vld [vmem:[%s22829_s4 + $0x10] sm:$0xff]  ;;  %v19224_v42 = vld [vmem:[%s22829_s4 + $0x8] sm:$0xff] }
   0x7   :  { %176 = vadd.xlane.f32.xlu0 %v175_v6  ;;  %17139 = vmatprep.subr.mxu0 %v19092_v37  ;;  %v19201_v39 = vld [vmem:[%s22829_s4 + $0x78] sm:$0xff]  ;;  %v19215_v41 = vld [vmem:[%s22829_s4 + $0x70] sm:$0xff]  ;;  %v19229_v43 = vld [vmem:[%s22829_s4 + $0x68] sm:$0xff]  ;;  %vm19093_vm1 = vmmov 0   ;;  %vm3833_vm2 = vcmask 31744   ;;  %vm5098_vm3 = vcmask 130048  }
   0x8   :  { %215 = vadd.xlane.f32.xlu1 %v214_v7  ;;  %17172 = vmatprep.subr.mxu1 %v19092_v37  ;;  %v19238_v44 = vld [vmem:[%s22829_s4] sm:$0xff]  ;;  %v19276_v62 = vld [vmem:[%s22829_s4 + $0x38] sm:$0xff]  ;;  %v19304_v3 = vld [vmem:[%s22829_s4 + $0x28] sm:$0xff]  ;;  %vm6446_vm4 = vcmask 1043456   ;;  %s19094_s26 = smov [#allocation2]  }
   0x9   :  { %17140 = vmatpush3.msra.mxu0 %v19196_v38  ;;  %17173 = vmatpush3.msra.mxu1 %v19201_v39  ;;  %v19243_v45 = vld [vmem:[%s22829_s4 + $0x60] sm:$0xff]  ;;  %v19281_v63 = vld [vmem:[%s22829_s4 + $0xb8] sm:$0xff]  ;;  %v19309_v4 = vld [vmem:[%s22829_s4 + $0xa8] sm:$0xff]  ;;  %s15713_s27 = sshll.u32 %s19094_s26, 4  ;;  %s15714_s27 = int_to_ptr.vmem [resolvable:$true] %s15713_s27 }
   0xa   :  { %17141 = vmatprep.subr.mxu0 %v19092_v37  ;;  %17174 = vmatprep.subr.mxu1 %v19092_v37  ;;  %v19261_v55 = vld [vmem:[%s22827_s2] ss:$0 sm:$0xff]  ;;  %v19267_v58 = vld [vmem:[%s22827_s2 + $0x1] ss:$0 sm:$0xff]  ;;  %v19338_v7 = vld [vmem:[%s22829_s4 + $0x58] sm:$0xff]  ;;  %s19070_s28 = scalar_lea.vmem %s15714_s27, 256  ;;  %p19075_p1 = scmp.lt.s32.totalorder %s15714_s27, %s15714_s27 }
   0xb   :  { %17142 = vmatpush3.msra.mxu0 %v19210_v40  ;;  %17175 = vmatpush3.msra.mxu1 %v19215_v41  ;;  %v19325_v6 = vld [vmem:[%s22829_s4 + $0xa0] sm:$0xff]  ;;  %p19071_p0 = scmp.ne.s32.totalorder %s15714_s27, %s19070_s28  ;;  %p19076_p2 = scmp.lt.s32.totalorder %s19070_s28, %s19070_s28 }
   0xc   :  { %218 = vadd.xlane.f32.xlu1 %v217_v9  ;;  %17143 = vmatprep.subr.mxu0 %v19092_v37  ;;  %v19354_v9 = vld [vmem:[%s22829_s4 + $0x50] sm:$0xff] }
   0xd   :  { %17176 = vmatprep.subr.mxu1 %v19092_v37  ;;  %17144 = vmatpush3.msra.mxu0 %v19224_v42  ;;  %p19077_p3 = por %p19076_p2, %p19075_p1 }
   0xe   :  { %17177 = vmatpush3.msra.mxu1 %v19229_v43  ;;  %17145 = vmatprep.subr.mxu0 %v19092_v37 }
   0xf   :  { %17178 = vmatprep.subr.mxu1 %v19092_v37  ;;  %17146 = vmatpush3.msra.mxu0 %v19238_v44  ;;  %p19078_p4 = pnand %p19077_p3, %p19071_p0 }
  0x10   :  { %17179 = vmatpush3.msra.mxu1 %v19243_v45  ;;  %17147 = vmatprep.mubr.msk.f32.mxu0 %vm19093_vm1, %v19092_v37 }
  0x11   :  { %17150 = vmatprep.subr.mxu0 %v19092_v37  ;;  %17180 = vmatprep.mubr.msk.f32.mxu1 %vm19093_vm1, %v19092_v37 }
  0x12   :  { %17194 = vmatprep.subr.mxu1 %v19092_v37 }
  0x8c   :  { %v174_v10 = vpop.xlane.xlu0 %173 }
  0x8d   :  { %v213_v11 = vpop.xlane.xlu1 %212  ;;  %v179_v12 = vmul.f32 0.03125, %v174_v10  ;;  %v19359_v10 = vld [vmem:[%s22829_s4 + $0xf0] sm:$0xff] }
  0x8e   :  { %v223_v13 = vmul.f32 0.03125, %v213_v11  ;;  %v19368_v11 = vld [vmem:[%s22829_s4 + $0x48] sm:$0xff] }
  0x8f   :  { %v19162_v14 = vsub.f32 %v30_v0, %v179_v12  ;;  %v19373_v12 = vld [vmem:[%s22829_s4 + $0xe8] sm:$0xff] }
  0x90   :  { %v177_v15 = vpop.xlane.xlu0 %176  ;;  %v19164_v17 = vsub.f32 %v32_v1, %v223_v13  ;;  %v19290_v1 = vld [vmem:[%s22829_s4 + $0x30] sm:$0xff]  ;;  %v19382_v13 = vld [vmem:[%s22829_s4 + $0x40] sm:$0xff] }
  0x91   :  { %v216_v16 = vpop.xlane.xlu1 %215  ;;  %v180_v18 = vmul.f32 0.03125, %v177_v15  ;;  %v183_v20 = vmul.f32 %v19162_v14, %v19162_v14 }
  0x92   :  { %v224_v19 = vmul.f32 0.03125, %v216_v16  ;;  %v231_v29 = vmul.f32 %v19164_v17, %v19164_v17  ;;  %v19402_v16 = vld [vmem:[%s22829_s4 + $0x98] sm:$0xff] }
  0x93   :  { %v19171_v22 = vsub.f32 %v31_v2, %v180_v18  ;;  %v185_v24 = vsel %vm171_vm0, %v183_v20, 0.0  ;;  %v19295_v2 = vld [vmem:[%s22829_s4 + $0xb0] sm:$0xff]  ;;  %v19423_v20 = vld [vmem:[%s22829_s4 + $0x88] sm:$0xff] }
  0x94   :  { %v19173_v23 = vsub.f32 %v33_v5, %v224_v19  ;;  %186 = vadd.xlane.f32.xlu0 %v185_v24  ;;  %v235_v33 = vsel %vm171_vm0, %v231_v29, 0.0  ;;  %v19318_v5 = vld [vmem:[%s22829_s4 + $0x20] sm:$0xff]  ;;  %v19414_v19 = vld [vmem:[%s22829_s4 + $0x90] sm:$0xff] }
  0x95   :  { %v219_v25 = vpop.xlane.xlu1 %218  ;;  %v184_v28 = vmul.f32 %v19171_v22, %v19171_v22 }
  0x96   :  { %v225_v27 = vmul.f32 0.03125, %v219_v25  ;;  %v232_v30 = vmul.f32 %v19173_v23, %v19173_v23 }
  0x97   :  { %v188_v32 = vsel %vm171_vm0, %v184_v28, 0.0  ;;  %v19462_v28 = vld [vmem:[%s22829_s4 + $0xd0] sm:$0xff] }
  0x98   :  { %v19183_v31 = vsub.f32 %v34_v8, %v225_v27  ;;  %221 = vadd.xlane.f32.xlu0 %v220_v26  ;;  %189 = vadd.xlane.f32.xlu1 %v188_v32  ;;  %v238_v34 = vsel %vm171_vm0, %v232_v30, 0.0  ;;  %v19343_v8 = vld [vmem:[%s22829_s4 + $0xf8] sm:$0xff]  ;;  %v19471_v30 = vld [vmem:[%s22829_s4 + $0xc8] sm:$0xff] }
  0x99   :  { %v19451_v27 = vld [vmem:[%s22829_s4 + $0xd8] sm:$0xff] }
  0x9a   :  { %v233_v35 = vmul.f32 %v19183_v31, %v19183_v31 }
  0x9c   :  { %236 = vadd.xlane.f32.xlu0 %v235_v33  ;;  %239 = vadd.xlane.f32.xlu1 %v238_v34  ;;  %v241_v36 = vsel %vm171_vm0, %v233_v35, 0.0  ;;  %v19480_v33 = vld [vmem:[%s22829_s4 + $0xc0] sm:$0xff] }
  0xa0   :  { %242 = vadd.xlane.f32.xlu0 %v241_v36 }
 0x11d   :  { %v187_v46 = vpop.xlane.xlu0 %186 }
 0x11e   :  { %v191_v47 = vmul.f32 0.03125, %v187_v46 }
 0x120   :  { %v193_v48 = vadd.f32 1e-05, %v191_v47 }
 0x121   :  { %v222_v49 = vpop.xlane.xlu0 %221  ;;  %v190_v56 = vpop.xlane.xlu1 %189 }
 0x122   :  { %18900 = vrsqrt.f32 %v193_v48  ;;  %v226_v50 = vmul.f32 0.03125, %v222_v49  ;;  %v192_v60 = vmul.f32 0.03125, %v190_v56  ;;  %v19596_v48 = vld [vmem:[%s22829_s4 + $0x120] sm:$0xff] }
 0x123   :  { %v19643_v56 = vld [vmem:[%s22829_s4 + $0x160] sm:$0xff] }
 0x124   :  { %v19253_v51 = vsub.f32 %v35_v21, %v226_v50  ;;  %v194_v0 = vadd.f32 1e-05, %v192_v60  ;;  %v19607_v50 = vld [vmem:[%s22829_s4 + $0x178] sm:$0xff]  ;;  %v19678_v60 = vld [vmem:[%s22829_s4 + $0x1b0] sm:$0xff] }
 0x125   :  { %v237_v24 = vpop.xlane.xlu0 %236  ;;  %v240_v32 = vpop.xlane.xlu1 %239 }
 0x126   :  { %v234_v52 = vmul.f32 %v19253_v51, %v19253_v51  ;;  %18902 = vrsqrt.f32 %v194_v0  ;;  %v247_v26 = vmul.f32 0.03125, %v237_v24  ;;  %v248_v34 = vmul.f32 0.03125, %v240_v32  ;;  %v19708_v0 = vld [vmem:[%s22829_s4 + $0x1a0] sm:$0xff]  ;;  %v19982_v32 = vld [vmem:[%s22829_s4 + $0x230] sm:$0xff] }
 0x128   :  { %v244_v53 = vsel %vm171_vm0, %v234_v52, 0.0  ;;  %v251_v29 = vadd.f32 1e-05, %v247_v26  ;;  %v252_v35 = vadd.f32 1e-05, %v248_v34  ;;  %v19998_v34 = vld [vmem:[%s22829_s4 + $0x228] sm:$0xff] }
 0x129   :  { %245 = vadd.xlane.f32.xlu1 %v244_v53  ;;  %v243_v47 = vpop.xlane.xlu0 %242  ;;  %v19624_v53 = vld [vmem:[%s22829_s4 + $0x170] sm:$0xff] }
 0x12a   :  { %18904 = vrsqrt.f32 %v251_v29  ;;  %v249_v49 = vmul.f32 0.03125, %v243_v47  ;;  %v19964_v29 = vld [vmem:[%s22829_s4 + $0x238] sm:$0xff]  ;;  %v20075_v47 = vld [vmem:[%s22829_s4 + $0x240] sm:$0xff] }
 0x12b   :  { %18906 = vrsqrt.f32 %v252_v35  ;;  %v20007_v35 = vld [vmem:[%s22829_s4 + $0x200] sm:$0xff] }
 0x12f   :  { %v18901_v54 = vpop.eup %18900 }
 0x130   :  { %v197_v57 = vmul.f32 %v18901_v54, %v19162_v14  ;;  %v19389_v14 = vld [vmem:[%s22829_s4 + $0xe0] sm:$0xff]  ;;  %v253_v54 = vadd.f32 1e-05, %v249_v49 }
 0x132   :  { %v203_v59 = vmul.f32 %v19261_v55, %v197_v57  ;;  %18908 = vrsqrt.f32 %v253_v54  ;;  %v19652_v57 = vld [vmem:[%s22829_s4 + $0x118] sm:$0xff] }
 0x133   :  { %v18903_v15 = vpop.eup %18902  ;;  %v20096_v54 = vld [vmem:[%s22829_s4 + $0x2b8] sm:$0xff] }
 0x134   :  { %v19271_v61 = vadd.f32 %v19267_v58, %v203_v59  ;;  %v198_v18 = vmul.f32 %v18903_v15, %v19171_v22  ;;  %v19433_v22 = vld [vmem:[%s22829_s4 + $0x80] sm:$0xff]  ;;  %v19673_v59 = vld [vmem:[%s22829_s4 + $0x110] sm:$0xff] }
 0x135   :  { %v19821_v15 = vld [vmem:[%s22829_s4 + $0x180] sm:$0xff] }
 0x136   :  { %17148 = vmatmul.mubr.msk.f32.vlgmr.msra.gmra.mxu0 %vm171_vm0, %v19271_v61  ;;  %17181 = vmatmul.mubr.msk.f32.vlgmr.msra.gmra.mxu1 %vm171_vm0, %v19271_v61  ;;  %v204_v21 = vmul.f32 %v19261_v55, %v198_v18  ;;  %v19634_v55 = vld [vmem:[%s22829_s4 + $0x168] sm:$0xff]  ;;  %v19839_v18 = vld [vmem:[%s22829_s4 + $0x1d0] sm:$0xff] }
 0x137   :  { %17151 = vmatpush3.msra.mxu0 %v19276_v62  ;;  %17195 = vmatpush3.msra.mxu1 %v19281_v63  ;;  %v18905_v36 = vpop.eup %18904 }
 0x138   :  { %17152 = vmatprep.subr.mxu0 %v19092_v37  ;;  %17196 = vmatprep.subr.mxu1 %v19092_v37  ;;  %v19443_v25 = vadd.f32 %v19267_v58, %v204_v21  ;;  %v19659_v58 = vld [vmem:[%s22829_s4 + $0x1b8] sm:$0xff] }
 0x139   :  { %17153 = vmatpush3.msra.mxu0 %v19290_v1  ;;  %17197 = vmatpush3.msra.mxu1 %v19295_v2 }
 0x13a   :  { %17154 = vmatprep.subr.mxu0 %v19092_v37  ;;  %17198 = vmatprep.subr.mxu1 %v19092_v37 }
 0x13b   :  { %17155 = vmatpush3.msra.mxu0 %v19304_v3  ;;  %17199 = vmatpush3.msra.mxu1 %v19309_v4 }
 0x13c   :  { %17156 = vmatprep.subr.mxu0 %v19092_v37  ;;  %17200 = vmatprep.subr.mxu1 %v19092_v37 }
 0x13d   :  { %17157 = vmatpush3.msra.mxu0 %v19318_v5  ;;  %17158 = vmatprep.mubr.msk.f32.mxu0 %vm19093_vm1, %v19092_v37 }
 0x13e   :  { %17201 = vmatpush3.msra.mxu1 %v19325_v6  ;;  %17202 = vmatprep.mubr.msk.f32.mxu1 %vm19093_vm1, %v19092_v37 }
 0x13f   :  { %17159 = vmatmul.mubr.msk.f32.vlgmr.msra.gmra.mxu0 %vm171_vm0, %v19271_v61  ;;  %17161 = vmatprep.subr.mxu0 %v19092_v37 }
 0x140   :  { %17203 = vmatmul.mubr.msk.f32.vlgmr.msra.gmra.mxu1 %vm171_vm0, %v19271_v61  ;;  %17216 = vmatprep.subr.mxu1 %v19092_v37 }
 0x141   :  { %17162 = vmatpush3.msra.mxu0 %v19338_v7  ;;  %17217 = vmatpush3.msra.mxu1 %v19343_v8 }
 0x142   :  { %17163 = vmatprep.subr.mxu0 %v19092_v37  ;;  %17218 = vmatprep.subr.mxu1 %v19092_v37 }
 0x143   :  { %17164 = vmatpush3.msra.mxu0 %v19354_v9  ;;  %17219 = vmatpush3.msra.mxu1 %v19359_v10 }
 0x144   :  { %17165 = vmatprep.subr.mxu0 %v19092_v37  ;;  %17220 = vmatprep.subr.mxu1 %v19092_v37 }
 0x145   :  { %17166 = vmatpush3.msra.mxu0 %v19368_v11  ;;  %17221 = vmatpush3.msra.mxu1 %v19373_v12 }
 0x146   :  { %17167 = vmatprep.subr.mxu0 %v19092_v37  ;;  %17222 = vmatprep.subr.mxu1 %v19092_v37 }
 0x147   :  { %17168 = vmatpush3.msra.mxu0 %v19382_v13  ;;  %17169 = vmatprep.mubr.msk.f32.mxu0 %vm19093_vm1, %v19092_v37 }
 0x148   :  { %17223 = vmatpush3.msra.mxu1 %v19389_v14  ;;  %17224 = vmatprep.mubr.msk.f32.mxu1 %vm19093_vm1, %v19092_v37 }
 0x149   :  { %17170 = vmatmul.mubr.msk.f32.vlgmr.msra.gmra.mxu0 %vm171_vm0, %v19271_v61  ;;  %17183 = vmatprep.subr.mxu0 %v19092_v37 }
 0x14a   :  { %17225 = vmatmul.mubr.msk.f32.vlgmr.msra.gmra.mxu1 %vm171_vm0, %v19271_v61  ;;  %17238 = vmatprep.subr.mxu1 %v19092_v37 }
 0x14b   :  { %17184 = vmatpush3.msra.mxu0 %v19402_v16  ;;  %17239 = vmatpush3.msra.mxu1 %v19276_v62  ;;  %v19694_v62 = vld [vmem:[%s22829_s4 + $0x1a8] sm:$0xff] }
 0x14c   :  { %17185 = vmatprep.subr.mxu0 %v19092_v37  ;;  %17240 = vmatprep.subr.mxu1 %v19092_v37 }
 0x14d   :  { %17186 = vmatpush3.msra.mxu0 %v19414_v19  ;;  %17241 = vmatpush3.msra.mxu1 %v19290_v1  ;;  %v19717_v1 = vld [vmem:[%s22829_s4 + $0x158] sm:$0xff] }
 0x14e   :  { %17187 = vmatprep.subr.mxu0 %v19092_v37  ;;  %17242 = vmatprep.subr.mxu1 %v19092_v37 }
 0x14f   :  { %17188 = vmatpush3.msra.mxu0 %v19423_v20  ;;  %17243 = vmatpush3.msra.mxu1 %v19304_v3 }
 0x150   :  { %17189 = vmatprep.subr.mxu0 %v19092_v37  ;;  %17244 = vmatprep.subr.mxu1 %v19092_v37 }
 0x151   :  { %17190 = vmatpush3.msra.mxu0 %v19433_v22  ;;  %17191 = vmatprep.mubr.msk.f32.mxu0 %vm19093_vm1, %v19092_v37 }
 0x152   :  { %17245 = vmatpush3.msra.mxu1 %v19318_v5  ;;  %17246 = vmatprep.mubr.msk.f32.mxu1 %vm19093_vm1, %v19092_v37  ;;  %v19742_v5 = vld [vmem:[%s22829_s4 + $0x1f0] sm:$0xff] }
 0x153   :  { %17192 = vmatmul.mubr.msk.f32.vlgmr.msra.gmra.mxu0 %vm171_vm0, %v19271_v61  ;;  %17205 = vmatprep.subr.mxu0 %v19092_v37 }
 0x154   :  { %17247 = vmatmul.mubr.msk.f32.vlgmr.msra.gmra.mxu1 %vm171_vm0, %v19443_v25  ;;  %17260 = vmatprep.subr.mxu1 %v19092_v37 }
 0x155   :  { %17206 = vmatpush3.msra.mxu0 %v19451_v27  ;;  %17261 = vmatpush3.msra.mxu1 %v19201_v39  ;;  %v19532_v39 = vld [vmem:[%s22827_s2 + $0x2] ss:$0 sm:$0xff] }
 0x156   :  { %17207 = vmatprep.subr.mxu0 %v19092_v37  ;;  %17262 = vmatprep.subr.mxu1 %v19092_v37 }
 0x157   :  { %17208 = vmatpush3.msra.mxu0 %v19462_v28  ;;  %17263 = vmatpush3.msra.mxu1 %v19215_v41  ;;  %v19547_v41 = vld [vmem:[%s22827_s2 + $0x3] ss:$0 sm:$0xff] }
 0x158   :  { %17209 = vmatprep.subr.mxu0 %v19092_v37  ;;  %17264 = vmatprep.subr.mxu1 %v19092_v37 }
 0x159   :  { %17210 = vmatpush3.msra.mxu0 %v19471_v30  ;;  %17265 = vmatpush3.msra.mxu1 %v19229_v43 }
 0x15a   :  { %17211 = vmatprep.subr.mxu0 %v19092_v37  ;;  %17266 = vmatprep.subr.mxu1 %v19092_v37 }
 0x15b   :  { %17212 = vmatpush3.msra.mxu0 %v19480_v33  ;;  %17213 = vmatprep.mubr.msk.f32.mxu0 %vm19093_vm1, %v19092_v37 }
 0x15c   :  { %17267 = vmatpush3.msra.mxu1 %v19243_v45  ;;  %17268 = vmatprep.mubr.msk.f32.mxu1 %vm19093_vm1, %v19092_v37  ;;  %v19575_v45 = vld [vmem:[%s22829_s4 + $0x130] sm:$0xff] }
 0x15d   :  { %17214 = vmatmul.mubr.msk.f32.vlgmr.msra.gmra.mxu0 %vm171_vm0, %v19271_v61  ;;  %17227 = vmatprep.subr.mxu0 %v19092_v37  ;;  %v19689_v61 = vld [vmem:[%s22829_s4 + $0x108] sm:$0xff] }
 0x15e   :  { %17269 = vmatmul.mubr.msk.f32.vlgmr.msra.gmra.mxu1 %vm171_vm0, %v19443_v25  ;;  %17282 = vmatprep.subr.mxu1 %v19092_v37 }
 0x15f   :  { %17228 = vmatpush3.msra.mxu0 %v19196_v38  ;;  %17283 = vmatpush3.msra.mxu1 %v19281_v63  ;;  %v19525_v38 = vmul.f32 %v18905_v36, %v19164_v17  ;;  %v19703_v63 = vld [vmem:[%s22829_s4 + $0x100] sm:$0xff] }
 0x160   :  { %17229 = vmatprep.subr.mxu0 %v19092_v37  ;;  %17284 = vmatprep.subr.mxu1 %v19092_v37  ;;  %v20012_v36 = vld [vmem:[%s22829_s4 + $0x220] sm:$0xff] }
 0x161   :  { %17230 = vmatpush3.msra.mxu0 %v19210_v40  ;;  %17285 = vmatpush3.msra.mxu1 %v19295_v2  ;;  %v267_v17 = vmul.f32 %v19532_v39, %v19525_v38  ;;  %v18907_v40 = vpop.eup %18906  ;;  %v19724_v2 = vld [vmem:[%s22829_s4 + $0x1f8] sm:$0xff] }
 0x162   :  { %17231 = vmatprep.subr.mxu0 %v19092_v37  ;;  %17286 = vmatprep.subr.mxu1 %v19092_v37  ;;  %v19564_v43 = vmul.f32 %v18907_v40, %v19173_v23  ;;  %v19585_v23 = vld [vmem:[%s22829_s4 + $0x128] sm:$0xff]  ;;  %v18909_v3 = vpop.eup %18908  ;;  %v20041_v40 = vld [vmem:[%s22829_s4 + $0x250] sm:$0xff] }
 0x163   :  { %17232 = vmatpush3.msra.mxu0 %v19224_v42  ;;  %17287 = vmatpush3.msra.mxu1 %v19309_v4  ;;  %v19555_v42 = vld [vmem:[%s22829_s4 + $0x138] sm:$0xff]  ;;  %v19737_v4 = vld [vmem:[%s22829_s4 + $0x150] sm:$0xff] }
 0x164   :  { %17233 = vmatprep.subr.mxu0 %v19092_v37  ;;  %17288 = vmatprep.subr.mxu1 %v19092_v37  ;;  %v268_v46 = vmul.f32 %v19532_v39, %v19564_v43 }
 0x165   :  { %17234 = vmatpush3.msra.mxu0 %v19238_v44  ;;  %17235 = vmatprep.mubr.msk.f32.mxu0 %vm19093_vm1, %v19092_v37  ;;  %v19567_v44 = vadd.f32 %v19547_v41, %v267_v17  ;;  %v20028_v17 = vld [vmem:[%s22829_s4 + $0x278] sm:$0xff] }
 0x166   :  { %17289 = vmatpush3.msra.mxu1 %v19325_v6  ;;  %17290 = vmatprep.mubr.msk.f32.mxu1 %vm19093_vm1, %v19092_v37  ;;  %v19610_v52 = vadd.f32 %v19547_v41, %v268_v46  ;;  %v19745_v6 = vmul.f32 %v18909_v3, %v19183_v31  ;;  %v19761_v31 = vld [vmem:[%s22829_s4 + $0x1e8] sm:$0xff]  ;;  %v20177_v3 = vld [vmem:[%s22829_s4 + $0x2d0] sm:$0xff] }
 0x167   :  { %17236 = vmatmul.mubr.msk.f32.vlgmr.msra.gmra.mxu0 %vm171_vm0, %v19443_v25  ;;  %17249 = vmatprep.subr.mxu0 %v19092_v37 }
 0x168   :  { %17291 = vmatmul.mubr.msk.f32.vlgmr.msra.gmra.mxu1 %vm171_vm0, %v19443_v25  ;;  %17304 = vmatprep.subr.mxu1 %v19092_v37 }
 0x169   :  { %17250 = vmatpush3.msra.mxu0 %v19338_v7  ;;  %17305 = vmatpush3.msra.mxu1 %v19343_v8  ;;  %v19756_v7 = vld [vmem:[%s22829_s4 + $0x148] sm:$0xff]  ;;  %v19770_v8 = vld [vmem:[%s22829_s4 + $0x140] sm:$0xff] }
 0x16a   :  { %17251 = vmatprep.subr.mxu0 %v19092_v37  ;;  %17306 = vmatprep.subr.mxu1 %v19092_v37 }
 0x16b   :  { %17252 = vmatpush3.msra.mxu0 %v19354_v9  ;;  %17307 = vmatpush3.msra.mxu1 %v19359_v10  ;;  %v19775_v9 = vld [vmem:[%s22829_s4 + $0x1e0] sm:$0xff]  ;;  %v269_v10 = vmul.f32 %v19532_v39, %v19745_v6 }
 0x16c   :  { %17253 = vmatprep.subr.mxu0 %v19092_v37  ;;  %17308 = vmatprep.subr.mxu1 %v19092_v37 }
 0x16d   :  { %17254 = vmatpush3.msra.mxu0 %v19368_v11  ;;  %17309 = vmatpush3.msra.mxu1 %v19373_v12  ;;  %v19786_v11 = vld [vmem:[%s22829_s4 + $0x198] sm:$0xff]  ;;  %v19793_v12 = vadd.f32 %v19547_v41, %v269_v10 }
 0x16e   :  { %17255 = vmatprep.subr.mxu0 %v19092_v37  ;;  %17310 = vmatprep.subr.mxu1 %v19092_v37 }
 0x16f   :  { %17256 = vmatpush3.msra.mxu0 %v19382_v13  ;;  %17257 = vmatprep.mubr.msk.f32.mxu0 %vm19093_vm1, %v19092_v37  ;;  %v19801_v13 = vld [vmem:[%s22829_s4 + $0x190] sm:$0xff] }
 0x170   :  { %17311 = vmatpush3.msra.mxu1 %v19389_v14  ;;  %17312 = vmatprep.mubr.msk.f32.mxu1 %vm19093_vm1, %v19092_v37  ;;  %v19813_v14 = vld [vmem:[%s22829_s4 + $0x188] sm:$0xff] }
 0x171   :  { %17258 = vmatmul.mubr.msk.f32.vlgmr.msra.gmra.mxu0 %vm171_vm0, %v19443_v25  ;;  %17271 = vmatprep.subr.mxu0 %v19092_v37 }
 0x172   :  { %17313 = vmatmul.mubr.msk.f32.vlgmr.msra.gmra.mxu1 %vm171_vm0, %v19443_v25  ;;  %17326 = vmatprep.subr.mxu1 %v19555_v42 }
 0x173   :  { %17272 = vmatpush3.msra.mxu0 %v19402_v16  ;;  %17327 = vmatpush3.msra.mxu1 %v19555_v42  ;;  %v19830_v16 = vld [vmem:[%s22829_s4 + $0x1d8] sm:$0xff] }
 0x174   :  { %17334 = vmatprep.mubr.msk.f32.mxu1 %vm171_vm0, %v19567_v44  ;;  %17273 = vmatprep.subr.mxu0 %v19092_v37 }
 0x175   :  { %17328 = vmatprep.subr.mxu1 %v19575_v45  ;;  %17274 = vmatpush3.msra.mxu0 %v19414_v19  ;;  %v19851_v19 = vld [vmem:[%s22829_s4 + $0x1c8] sm:$0xff] }
 0x176   :  { %17329 = vmatpush3.msra.mxu1 %v19575_v45  ;;  %17275 = vmatprep.subr.mxu0 %v19092_v37 }
 0x177   :  { %17330 = vmatprep.subr.mxu1 %v19585_v23  ;;  %17276 = vmatpush3.msra.mxu0 %v19423_v20  ;;  %v19859_v20 = vld [vmem:[%s22829_s4 + $0x1c0] sm:$0xff] }
 0x178   :  { %17331 = vmatpush3.msra.mxu1 %v19585_v23  ;;  %17277 = vmatprep.subr.mxu0 %v19092_v37 }
 0x179   :  { %17332 = vmatprep.subr.mxu1 %v19596_v48  ;;  %17278 = vmatpush3.msra.mxu0 %v19433_v22 }
 0x17a   :  { %17279 = vmatprep.mubr.msk.f32.mxu0 %vm19093_vm1, %v19092_v37  ;;  %17333 = vmatpush3.msra.mxu1 %v19596_v48 }
 0x17b   :  { %17280 = vmatmul.mubr.msk.f32.vlgmr.msra.gmra.mxu0 %vm171_vm0, %v19443_v25  ;;  %17293 = vmatprep.subr.mxu0 %v19092_v37 }
 0x17c   :  { %17335 = vmatmul.mubr.msk.f32.vlgmr.msra.gmra.mxu1 %vm171_vm0, %v19610_v52  ;;  %17348 = vmatprep.subr.mxu1 %v19607_v50 }
 0x17d   :  { %17294 = vmatpush3.msra.mxu0 %v19451_v27  ;;  %17349 = vmatpush3.msra.mxu1 %v19607_v50 }
 0x17e   :  { %17356 = vmatprep.mubr.msk.f32.mxu1 %vm171_vm0, %v19567_v44  ;;  %17295 = vmatprep.subr.mxu0 %v19092_v37 }
 0x17f   :  { %17350 = vmatprep.subr.mxu1 %v19624_v53  ;;  %17296 = vmatpush3.msra.mxu0 %v19462_v28 }
 0x180   :  { %17351 = vmatpush3.msra.mxu1 %v19624_v53  ;;  %17297 = vmatprep.subr.mxu0 %v19092_v37 }
 0x181   :  { %17352 = vmatprep.subr.mxu1 %v19634_v55  ;;  %17298 = vmatpush3.msra.mxu0 %v19471_v30  ;;  %v19977_v30 = vld [vmem:[%s22829_s4 + $0x210] sm:$0xff] }
 0x182   :  { %17353 = vmatpush3.msra.mxu1 %v19634_v55  ;;  %17299 = vmatprep.subr.mxu0 %v19092_v37 }
 0x183   :  { %17354 = vmatprep.subr.mxu1 %v19643_v56  ;;  %17300 = vmatpush3.msra.mxu0 %v19480_v33  ;;  %v19993_v33 = vld [vmem:[%s22829_s4 + $0x208] sm:$0xff] }
 0x184   :  { %17301 = vmatprep.mubr.msk.f32.mxu0 %vm19093_vm1, %v19092_v37  ;;  %17355 = vmatpush3.msra.mxu1 %v19643_v56 }
 0x185   :  { %17302 = vmatmul.mubr.msk.f32.vlgmr.msra.gmra.mxu0 %vm171_vm0, %v19443_v25  ;;  %17315 = vmatprep.subr.mxu0 %v19652_v57 }
 0x186   :  { %17357 = vmatmul.mubr.msk.f32.vlgmr.msra.gmra.mxu1 %vm171_vm0, %v19610_v52  ;;  %17370 = vmatprep.subr.mxu1 %v19659_v58 }
 0x187   :  { %17316 = vmatpush3.msra.mxu0 %v19652_v57  ;;  %17323 = vmatprep.mubr.msk.f32.mxu0 %vm171_vm0, %v19567_v44 }
 0x188   :  { %17371 = vmatpush3.msra.mxu1 %v19659_v58  ;;  %17378 = vmatprep.mubr.msk.f32.mxu1 %vm171_vm0, %v19567_v44 }
 0x189   :  { %17317 = vmatprep.subr.mxu0 %v19673_v59  ;;  %17372 = vmatprep.subr.mxu1 %v19678_v60 }
 0x18a   :  { %17318 = vmatpush3.msra.mxu0 %v19673_v59  ;;  %17373 = vmatpush3.msra.mxu1 %v19678_v60 }
 0x18b   :  { %17319 = vmatprep.subr.mxu0 %v19689_v61  ;;  %17374 = vmatprep.subr.mxu1 %v19694_v62 }
 0x18c   :  { %17320 = vmatpush3.msra.mxu0 %v19689_v61  ;;  %17375 = vmatpush3.msra.mxu1 %v19694_v62 }
 0x18d   :  { %17321 = vmatprep.subr.mxu0 %v19703_v63  ;;  %17376 = vmatprep.subr.mxu1 %v19708_v0 }
 0x18e   :  { %17322 = vmatpush3.msra.mxu0 %v19703_v63  ;;  %17377 = vmatpush3.msra.mxu1 %v19708_v0 }
 0x18f   :  { %17324 = vmatmul.mubr.msk.f32.vlgmr.msra.gmra.mxu0 %vm171_vm0, %v19610_v52  ;;  %17337 = vmatprep.subr.mxu0 %v19717_v1 }
 0x190   :  { %17379 = vmatmul.mubr.msk.f32.vlgmr.msra.gmra.mxu1 %vm171_vm0, %v19610_v52  ;;  %17392 = vmatprep.subr.mxu1 %v19724_v2 }
 0x191   :  { %17338 = vmatpush3.msra.mxu0 %v19717_v1  ;;  %17345 = vmatprep.mubr.msk.f32.mxu0 %vm171_vm0, %v19567_v44 }
 0x192   :  { %17393 = vmatpush3.msra.mxu1 %v19724_v2  ;;  %17400 = vmatprep.mubr.msk.f32.mxu1 %vm171_vm0, %v19567_v44 }
 0x193   :  { %17339 = vmatprep.subr.mxu0 %v19737_v4  ;;  %17394 = vmatprep.subr.mxu1 %v19742_v5 }
 0x194   :  { %17340 = vmatpush3.msra.mxu0 %v19737_v4  ;;  %17395 = vmatpush3.msra.mxu1 %v19742_v5 }
 0x195   :  { %17341 = vmatprep.subr.mxu0 %v19756_v7  ;;  %17396 = vmatprep.subr.mxu1 %v19761_v31 }
 0x196   :  { %17342 = vmatpush3.msra.mxu0 %v19756_v7  ;;  %17397 = vmatpush3.msra.mxu1 %v19761_v31 }
 0x197   :  { %17343 = vmatprep.subr.mxu0 %v19770_v8  ;;  %17398 = vmatprep.subr.mxu1 %v19775_v9 }
 0x198   :  { %17344 = vmatpush3.msra.mxu0 %v19770_v8  ;;  %17399 = vmatpush3.msra.mxu1 %v19775_v9 }
 0x199   :  { %17346 = vmatmul.mubr.msk.f32.vlgmr.msra.gmra.mxu0 %vm171_vm0, %v19610_v52  ;;  %17359 = vmatprep.subr.mxu0 %v19786_v11 }
 0x19a   :  { %17401 = vmatmul.mubr.msk.f32.vlgmr.msra.gmra.mxu1 %vm171_vm0, %v19610_v52  ;;  %17360 = vmatpush3.msra.mxu0 %v19786_v11 }
 0x19b   :  { %17367 = vmatprep.mubr.msk.f32.mxu0 %vm171_vm0, %v19567_v44  ;;  %17422 = vmatprep.mubr.msk.f32.mxu1 %vm171_vm0, %v19793_v12 }
 0x19c   :  { %17361 = vmatprep.subr.mxu0 %v19801_v13  ;;  %17414 = vmatprep.subr.mxu1 %v19555_v42 }
 0x19d   :  { %17362 = vmatpush3.msra.mxu0 %v19801_v13  ;;  %17415 = vmatpush3.msra.mxu1 %v19555_v42  ;;  %v20057_v42 = vld [vmem:[%s22829_s4 + $0x248] sm:$0xff] }
 0x19e   :  { %17363 = vmatprep.subr.mxu0 %v19813_v14  ;;  %17416 = vmatprep.subr.mxu1 %v19575_v45 }
 0x19f   :  { %17364 = vmatpush3.msra.mxu0 %v19813_v14  ;;  %17417 = vmatpush3.msra.mxu1 %v19575_v45  ;;  %v20062_v45 = vld [vmem:[%s22829_s4 + $0x268] sm:$0xff] }
 0x1a0   :  { %17365 = vmatprep.subr.mxu0 %v19821_v15  ;;  %17418 = vmatprep.subr.mxu1 %v19585_v23 }
 0x1a1   :  { %17366 = vmatpush3.msra.mxu0 %v19821_v15  ;;  %17419 = vmatpush3.msra.mxu1 %v19585_v23 }
 0x1a2   :  { %17368 = vmatmul.mubr.msk.f32.vlgmr.msra.gmra.mxu0 %vm171_vm0, %v19610_v52  ;;  %17381 = vmatprep.subr.mxu0 %v19830_v16 }
 0x1a3   :  { %17382 = vmatpush3.msra.mxu0 %v19830_v16  ;;  %17389 = vmatprep.mubr.msk.f32.mxu0 %vm171_vm0, %v19567_v44 }
 0x1a4   :  { %17383 = vmatprep.subr.mxu0 %v19839_v18  ;;  %17420 = vmatprep.subr.mxu1 %v19596_v48 }
 0x1a5   :  { %17384 = vmatpush3.msra.mxu0 %v19839_v18  ;;  %17421 = vmatpush3.msra.mxu1 %v19596_v48  ;;  %v20080_v48 = vld [vmem:[%s22829_s4 + $0x260] sm:$0xff] }
 0x1a6   :  { %17385 = vmatprep.subr.mxu0 %v19851_v19  ;;  %17436 = vmatprep.subr.mxu1 %v19607_v50 }
 0x1a7   :  { %17386 = vmatpush3.msra.mxu0 %v19851_v19 }
 0x1a8   :  { %17387 = vmatprep.subr.mxu0 %v19859_v20 }
 0x1a9   :  { %17388 = vmatpush3.msra.mxu0 %v19859_v20 }
 0x1aa   :  { %17390 = vmatmul.mubr.msk.f32.vlgmr.msra.gmra.mxu0 %vm171_vm0, %v19610_v52  ;;  %17403 = vmatprep.subr.mxu0 %v19652_v57 }
 0x1ab   :  { %17411 = vmatprep.mubr.msk.f32.mxu0 %vm171_vm0, %v19793_v12  ;;  %17404 = vmatpush3.msra.mxu0 %v19652_v57  ;;  %v20125_v57 = vld [vmem:[%s22829_s4 + $0x288] sm:$0xff] }
 0x1ac   :  { %17405 = vmatprep.subr.mxu0 %v19673_v59 }
 0x1ad   :  { %17406 = vmatpush3.msra.mxu0 %v19673_v59 }
 0x1ae   :  { %17407 = vmatprep.subr.mxu0 %v19689_v61 }
 0x1af   :  { %17408 = vmatpush3.msra.mxu0 %v19689_v61  ;;  %v20143_v61 = vld [vmem:[%s22829_s4 + $0x280] sm:$0xff] }
 0x1b0   :  { %17409 = vmatprep.subr.mxu0 %v19703_v63 }
 0x1b1   :  { %17410 = vmatpush3.msra.mxu0 %v19703_v63 }
 0x1b2   :  { %v246_v21 = vpop.xlane.xlu1 %245  ;;  %17425 = vmatprep.subr.mxu0 %v19717_v1 }
 0x1b3   :  { %v250_v22 = vmul.f32 0.03125, %v246_v21 }
 0x1b5   :  { %v254_v24 = vadd.f32 1e-05, %v250_v22 }
 0x1b7   :  { %18910 = vrsqrt.f32 %v254_v24 }
 0x1c4   :  { %v18911_v25 = vpop.eup %18910 }
 0x1c5   :  { %v19881_v26 = vmul.f32 %v18911_v25, %v19253_v51  ;;  %v19959_v51 = vld [vmem:[%s22829_s4 + $0x218] sm:$0xff] }
 0x1c7   :  { %v270_v27 = vmul.f32 %v19532_v39, %v19881_v26  ;;  %v20023_v39 = vld [vmem:[%s22829_s4 + $0x258] sm:$0xff] }
 0x1c9   :  { %v19886_v28 = vadd.f32 %v19547_v41, %v270_v27  ;;  %v20046_v41 = vld [vmem:[%s22829_s4 + $0x270] sm:$0xff] }
 0x1cb   :  { %17412 = vmatmul.mubr.msk.f32.vlgmr.msra.gmra.mxu0 %vm171_vm0, %v19886_v28  ;;  %17423 = vmatmul.mubr.msk.f32.vlgmr.msra.gmra.mxu1 %vm171_vm0, %v19886_v28 }
 0x1cc   :  { %17426 = vmatpush3.msra.mxu0 %v19717_v1  ;;  %17437 = vmatpush3.msra.mxu1 %v19607_v50  ;;  %v20159_v1 = vld [vmem:[%s22829_s4 + $0x2d8] sm:$0xff] }
 0x1cd   :  { %17427 = vmatprep.subr.mxu0 %v19737_v4  ;;  %17433 = vmatprep.mubr.msk.f32.mxu0 %vm171_vm0, %v19793_v12 }
 0x1ce   :  { %17438 = vmatprep.subr.mxu1 %v19624_v53  ;;  %17444 = vmatprep.mubr.msk.f32.mxu1 %vm171_vm0, %v19793_v12 }
 0x1cf   :  { %17428 = vmatpush3.msra.mxu0 %v19737_v4  ;;  %17439 = vmatpush3.msra.mxu1 %v19624_v53  ;;  %v20091_v53 = vld [vmem:[%s22829_s4 + $0x298] sm:$0xff]  ;;  %v20182_v4 = vld [vmem:[%s22829_s4 + $0x2f0] sm:$0xff] }
 0x1d0   :  { %17429 = vmatprep.subr.mxu0 %v19756_v7  ;;  %17440 = vmatprep.subr.mxu1 %v19634_v55 }
 0x1d1   :  { %17430 = vmatpush3.msra.mxu0 %v19756_v7  ;;  %17441 = vmatpush3.msra.mxu1 %v19634_v55  ;;  %v20109_v55 = vld [vmem:[%s22829_s4 + $0x290] sm:$0xff]  ;;  %v20198_v7 = vld [vmem:[%s22829_s4 + $0x2e8] sm:$0xff] }
 0x1d2   :  { %17431 = vmatprep.subr.mxu0 %v19770_v8  ;;  %17442 = vmatprep.subr.mxu1 %v19643_v56 }
 0x1d3   :  { %17432 = vmatpush3.msra.mxu0 %v19770_v8  ;;  %17443 = vmatpush3.msra.mxu1 %v19643_v56  ;;  %v20114_v56 = vld [vmem:[%s22829_s4 + $0x2b0] sm:$0xff] }
 0x1d4   :  { %17434 = vmatmul.mubr.msk.f32.vlgmr.msra.gmra.mxu0 %vm171_vm0, %v19886_v28  ;;  %17445 = vmatmul.mubr.msk.f32.vlgmr.msra.gmra.mxu1 %vm171_vm0, %v19886_v28 }
 0x1d5   :  { %17447 = vmatprep.subr.mxu0 %v19786_v11  ;;  %17458 = vmatprep.subr.mxu1 %v19659_v58 }
 0x1d6   :  { %17448 = vmatpush3.msra.mxu0 %v19786_v11  ;;  %17455 = vmatprep.mubr.msk.f32.mxu0 %vm171_vm0, %v19793_v12 }
 0x1d7   :  { %17459 = vmatpush3.msra.mxu1 %v19659_v58  ;;  %17466 = vmatprep.mubr.msk.f32.mxu1 %vm171_vm0, %v19793_v12  ;;  %v20130_v58 = vld [vmem:[%s22829_s4 + $0x2a8] sm:$0xff] }
 0x1d8   :  { %17449 = vmatprep.subr.mxu0 %v19801_v13  ;;  %17460 = vmatprep.subr.mxu1 %v19678_v60 }
 0x1d9   :  { %17450 = vmatpush3.msra.mxu0 %v19801_v13  ;;  %17461 = vmatpush3.msra.mxu1 %v19678_v60 }
 0x1da   :  { %17451 = vmatprep.subr.mxu0 %v19813_v14  ;;  %17462 = vmatprep.subr.mxu1 %v19694_v62 }
 0x1db   :  { %17452 = vmatpush3.msra.mxu0 %v19813_v14  ;;  %17463 = vmatpush3.msra.mxu1 %v19694_v62  ;;  %v20148_v62 = vld [vmem:[%s22829_s4 + $0x2a0] sm:$0xff] }
 0x1dc   :  { %17453 = vmatprep.subr.mxu0 %v19821_v15  ;;  %17464 = vmatprep.subr.mxu1 %v19708_v0 }
 0x1dd   :  { %17454 = vmatpush3.msra.mxu0 %v19821_v15  ;;  %17465 = vmatpush3.msra.mxu1 %v19708_v0 }
 0x1de   :  { %17456 = vmatmul.mubr.msk.f32.vlgmr.msra.gmra.mxu0 %vm171_vm0, %v19886_v28  ;;  %17467 = vmatmul.mubr.msk.f32.vlgmr.msra.gmra.mxu1 %vm171_vm0, %v19886_v28 }
 0x1df   :  { %17469 = vmatprep.subr.mxu0 %v19830_v16  ;;  %17480 = vmatprep.subr.mxu1 %v19724_v2 }
 0x1e0   :  { %17470 = vmatpush3.msra.mxu0 %v19830_v16  ;;  %17477 = vmatprep.mubr.msk.f32.mxu0 %vm171_vm0, %v19793_v12 }
 0x1e1   :  { %17481 = vmatpush3.msra.mxu1 %v19724_v2  ;;  %17488 = vmatprep.mubr.msk.f32.mxu1 %vm171_vm0, %v19793_v12  ;;  %v20164_v2 = vld [vmem:[%s22829_s4 + $0x2f8] sm:$0xff] }
 0x1e2   :  { %17471 = vmatprep.subr.mxu0 %v19839_v18  ;;  %17482 = vmatprep.subr.mxu1 %v19742_v5 }
 0x1e3   :  { %17472 = vmatpush3.msra.mxu0 %v19839_v18  ;;  %17483 = vmatpush3.msra.mxu1 %v19742_v5  ;;  %v20193_v5 = vld [vmem:[%s22829_s4 + $0x2c8] sm:$0xff] }
 0x1e4   :  { %17473 = vmatprep.subr.mxu0 %v19851_v19  ;;  %17484 = vmatprep.subr.mxu1 %v19761_v31 }
 0x1e5   :  { %17474 = vmatpush3.msra.mxu0 %v19851_v19  ;;  %17485 = vmatpush3.msra.mxu1 %v19761_v31 }
 0x1e6   :  { %17475 = vmatprep.subr.mxu0 %v19859_v20  ;;  %17486 = vmatprep.subr.mxu1 %v19775_v9 }
 0x1e7   :  { %17476 = vmatpush3.msra.mxu0 %v19859_v20  ;;  %17487 = vmatpush3.msra.mxu1 %v19775_v9  ;;  %v20216_v9 = vld [vmem:[%s22829_s4 + $0x2e0] sm:$0xff] }
 0x1e8   :  { %17478 = vmatmul.mubr.msk.f32.vlgmr.msra.gmra.mxu0 %vm171_vm0, %v19886_v28  ;;  %17489 = vmatmul.mubr.msk.f32.vlgmr.msra.gmra.mxu1 %vm171_vm0, %v19886_v28 }
 0x1e9   :  { %17491 = vmatprep.subr.mxu0 %v19959_v51  ;;  %17502 = vmatprep.subr.mxu1 %v19964_v29 }
 0x1ea   :  { %17492 = vmatpush3.msra.mxu0 %v19959_v51  ;;  %17499 = vmatprep.mubr.msk.f32.mxu0 %vm171_vm0, %v19567_v44 }
 0x1eb   :  { %17503 = vmatpush3.msra.mxu1 %v19964_v29  ;;  %17510 = vmatprep.mubr.msk.f32.mxu1 %vm171_vm0, %v19567_v44 }
 0x1ec   :  { %17493 = vmatprep.subr.mxu0 %v19977_v30  ;;  %17504 = vmatprep.subr.mxu1 %v19982_v32 }
 0x1ed   :  { %17494 = vmatpush3.msra.mxu0 %v19977_v30  ;;  %17505 = vmatpush3.msra.mxu1 %v19982_v32 }
 0x1ee   :  { %17495 = vmatprep.subr.mxu0 %v19993_v33  ;;  %17506 = vmatprep.subr.mxu1 %v19998_v34 }
 0x1ef   :  { %17496 = vmatpush3.msra.mxu0 %v19993_v33  ;;  %17507 = vmatpush3.msra.mxu1 %v19998_v34 }
 0x1f0   :  { %17497 = vmatprep.subr.mxu0 %v20007_v35  ;;  %17508 = vmatprep.subr.mxu1 %v20012_v36 }
 0x1f1   :  { %17498 = vmatpush3.msra.mxu0 %v20007_v35  ;;  %17509 = vmatpush3.msra.mxu1 %v20012_v36 }
 0x1f2   :  { %17500 = vmatmul.mubr.msk.f32.vlgmr.msra.gmra.mxu0 %vm171_vm0, %v19610_v52  ;;  %17511 = vmatmul.mubr.msk.f32.vlgmr.msra.gmra.mxu1 %vm171_vm0, %v19610_v52 }
 0x1f3   :  { %17513 = vmatprep.subr.mxu0 %v20023_v39  ;;  %17524 = vmatprep.subr.mxu1 %v20028_v17 }
 0x1f4   :  { %17514 = vmatpush3.msra.mxu0 %v20023_v39  ;;  %17521 = vmatprep.mubr.msk.f32.mxu0 %vm171_vm0, %v19567_v44 }
 0x1f5   :  { %17525 = vmatpush3.msra.mxu1 %v20028_v17  ;;  %17532 = vmatprep.mubr.msk.f32.mxu1 %vm171_vm0, %v19567_v44 }
 0x1f6   :  { %17515 = vmatprep.subr.mxu0 %v20041_v40  ;;  %17526 = vmatprep.subr.mxu1 %v20046_v41  ;;  %v20066_v23 = vpop.f32.mrf.mxu0  ;;  %v20068_v46 = vpop.f32.mrf.mxu1 }
 0x1f7   :  { %17516 = vmatpush3.msra.mxu0 %v20041_v40  ;;  %17527 = vmatpush3.msra.mxu1 %v20046_v41 }
 0x1f8   :  { %17517 = vmatprep.subr.mxu0 %v20057_v42  ;;  %17528 = vmatprep.subr.mxu1 %v20062_v45  ;;  %v17149_v49 = vpop.f32.mrf.mxu0  ;;  %v17182_v50 = vpop.f32.mrf.mxu1 }
 0x1f9   :  { %17518 = vmatpush3.msra.mxu0 %v20057_v42  ;;  %17529 = vmatpush3.msra.mxu1 %v20062_v45 }
 0x1fa   :  { %17519 = vmatprep.subr.mxu0 %v20075_v47  ;;  %17530 = vmatprep.subr.mxu1 %v20080_v48 }
 0x1fb   :  { %17520 = vmatpush3.msra.mxu0 %v20075_v47  ;;  %17531 = vmatpush3.msra.mxu1 %v20080_v48 }
 0x1fc   :  { %17522 = vmatmul.mubr.msk.f32.vlgmr.msra.gmra.mxu0 %vm171_vm0, %v19610_v52  ;;  %17533 = vmatmul.mubr.msk.f32.vlgmr.msra.gmra.mxu1 %vm171_vm0, %v19610_v52 }
 0x1fd   :  { %17535 = vmatprep.subr.mxu0 %v20091_v53  ;;  %17546 = vmatprep.subr.mxu1 %v20096_v54 }
 0x1fe   :  { %17536 = vmatpush3.msra.mxu0 %v20091_v53  ;;  %17543 = vmatprep.mubr.msk.f32.mxu0 %vm171_vm0, %v19567_v44 }
 0x1ff   :  { %17547 = vmatpush3.msra.mxu1 %v20096_v54  ;;  %17554 = vmatprep.mubr.msk.f32.mxu1 %vm171_vm0, %v19567_v44  ;;  %v20132_v59 = vpop.f32.mrf.mxu0 }
 0x200   :  { %17537 = vmatprep.subr.mxu0 %v20109_v55  ;;  %17548 = vmatprep.subr.mxu1 %v20114_v56  ;;  %v20136_v60 = vpop.f32.mrf.mxu1 }
 0x201   :  { %17538 = vmatpush3.msra.mxu0 %v20109_v55  ;;  %17549 = vmatpush3.msra.mxu1 %v20114_v56  ;;  %v17160_v63 = vpop.f32.mrf.mxu0 }
 0x202   :  { %17539 = vmatprep.subr.mxu0 %v20125_v57  ;;  %17550 = vmatprep.subr.mxu1 %v20130_v58  ;;  %v17204_v0 = vpop.f32.mrf.mxu1 }
 0x203   :  { %17540 = vmatpush3.msra.mxu0 %v20125_v57  ;;  %17551 = vmatpush3.msra.mxu1 %v20130_v58 }
 0x204   :  { %17541 = vmatprep.subr.mxu0 %v20143_v61  ;;  %17552 = vmatprep.subr.mxu1 %v20148_v62 }
 0x205   :  { %17542 = vmatpush3.msra.mxu0 %v20143_v61  ;;  %17553 = vmatpush3.msra.mxu1 %v20148_v62 }
 0x206   :  { %17544 = vmatmul.mubr.msk.f32.vlgmr.msra.gmra.mxu0 %vm171_vm0, %v19610_v52  ;;  %17555 = vmatmul.mubr.msk.f32.vlgmr.msra.gmra.mxu1 %vm171_vm0, %v19610_v52 }
 0x207   :  { %17557 = vmatprep.subr.mxu0 %v20159_v1  ;;  %17568 = vmatprep.subr.mxu1 %v20164_v2 }
 0x208   :  { %17558 = vmatpush3.msra.mxu0 %v20159_v1  ;;  %17565 = vmatprep.mubr.msk.f32.mxu0 %vm171_vm0, %v19567_v44 }
 0x209   :  { %17569 = vmatpush3.msra.mxu1 %v20164_v2  ;;  %17576 = vmatprep.mubr.msk.f32.mxu1 %vm171_vm0, %v19567_v44  ;;  %v20200_v31 = vpop.f32.mrf.mxu0  ;;  %v20211_v44 = vld [vmem:[%s22829_s4 + $0x2c0] sm:$0xff] }
 0x20a   :  { %17559 = vmatprep.subr.mxu0 %v20177_v3  ;;  %17570 = vmatprep.subr.mxu1 %v20182_v4  ;;  %v20204_v8 = vpop.f32.mrf.mxu1 }
 0x20b   :  { %17560 = vmatpush3.msra.mxu0 %v20177_v3  ;;  %17571 = vmatpush3.msra.mxu1 %v20182_v4  ;;  %v17171_v10 = vpop.f32.mrf.mxu0 }
 0x20c   :  { %17561 = vmatprep.subr.mxu0 %v20193_v5  ;;  %17572 = vmatprep.subr.mxu1 %v20198_v7  ;;  %v17226_v11 = vpop.f32.mrf.mxu1 }
 0x20d   :  { %17562 = vmatpush3.msra.mxu0 %v20193_v5  ;;  %17573 = vmatpush3.msra.mxu1 %v20198_v7 }
 0x20e   :  { %17563 = vmatprep.subr.mxu0 %v20211_v44  ;;  %17574 = vmatprep.subr.mxu1 %v20216_v9 }
 0x20f   :  { %17564 = vmatpush3.msra.mxu0 %v20211_v44  ;;  %17575 = vmatpush3.msra.mxu1 %v20216_v9 }
 0x210   :  { %17566 = vmatmul.mubr.msk.f32.vlgmr.msra.gmra.mxu0 %vm171_vm0, %v19610_v52  ;;  %17577 = vmatmul.mubr.msk.f32.vlgmr.msra.gmra.mxu1 %vm171_vm0, %v19610_v52 }
 0x211   :  { %17579 = vmatprep.subr.mxu0 %v19959_v51  ;;  %17590 = vmatprep.subr.mxu1 %v19964_v29 }
 0x212   :  { %17580 = vmatpush3.msra.mxu0 %v19959_v51  ;;  %17587 = vmatprep.mubr.msk.f32.mxu0 %vm171_vm0, %v19793_v12 }
 0x213   :  { %17591 = vmatpush3.msra.mxu1 %v19964_v29  ;;  %17598 = vmatprep.mubr.msk.f32.mxu1 %vm171_vm0, %v19793_v12  ;;  %v20238_v13 = vpop.f32.mrf.mxu0 }
 0x214   :  { %17581 = vmatprep.subr.mxu0 %v19977_v30  ;;  %17592 = vmatprep.subr.mxu1 %v19982_v32  ;;  %v20242_v52 = vpop.f32.mrf.mxu1 }
 0x215   :  { %17582 = vmatpush3.msra.mxu0 %v19977_v30  ;;  %17593 = vmatpush3.msra.mxu1 %v19982_v32  ;;  %v17193_v14 = vpop.f32.mrf.mxu0 }
 0x216   :  { %17583 = vmatprep.subr.mxu0 %v19993_v33  ;;  %17594 = vmatprep.subr.mxu1 %v19998_v34  ;;  %v17248_v15 = vpop.f32.mrf.mxu1 }
 0x217   :  { %17584 = vmatpush3.msra.mxu0 %v19993_v33  ;;  %17595 = vmatpush3.msra.mxu1 %v19998_v34  ;;  %v1406_v34 = vmul.f32 0.5, %v20132_v59 }
 0x218   :  { %17585 = vmatprep.subr.mxu0 %v20007_v35  ;;  %17596 = vmatprep.subr.mxu1 %v20012_v36 }
 0x219   :  { %17586 = vmatpush3.msra.mxu0 %v20007_v35  ;;  %17597 = vmatpush3.msra.mxu1 %v20012_v36 }
 0x21a   :  { %17588 = vmatmul.mubr.msk.f32.vlgmr.msra.gmra.mxu0 %vm171_vm0, %v19886_v28  ;;  %17599 = vmatmul.mubr.msk.f32.vlgmr.msra.gmra.mxu1 %vm171_vm0, %v19886_v28 }
 0x21b   :  { %17601 = vmatprep.subr.mxu0 %v20023_v39  ;;  %17612 = vmatprep.subr.mxu1 %v20028_v17 }
 0x21c   :  { %17602 = vmatpush3.msra.mxu0 %v20023_v39  ;;  %17609 = vmatprep.mubr.msk.f32.mxu0 %vm171_vm0, %v19793_v12 }
 0x21d   :  { %17613 = vmatpush3.msra.mxu1 %v20028_v17  ;;  %17620 = vmatprep.mubr.msk.f32.mxu1 %vm171_vm0, %v19793_v12  ;;  %v20266_v16 = vpop.f32.mrf.mxu0 }
 0x21e   :  { %17603 = vmatprep.subr.mxu0 %v20041_v40  ;;  %17614 = vmatprep.subr.mxu1 %v20046_v41  ;;  %v20270_v18 = vpop.f32.mrf.mxu1 }
 0x21f   :  { %17604 = vmatpush3.msra.mxu0 %v20041_v40  ;;  %17615 = vmatpush3.msra.mxu1 %v20046_v41  ;;  %v17215_v19 = vpop.f32.mrf.mxu0  ;;  %v1408_v40 = vmul.f32 0.5, %v20068_v46  ;;  %v1405_v46 = vmul.f32 0.5, %v20066_v23 }
 0x220   :  { %17605 = vmatprep.subr.mxu0 %v20057_v42  ;;  %17616 = vmatprep.subr.mxu1 %v20062_v45  ;;  %v17270_v20 = vpop.f32.mrf.mxu1 }
 0x221   :  { %17606 = vmatpush3.msra.mxu0 %v20057_v42  ;;  %17617 = vmatpush3.msra.mxu1 %v20062_v45 }
 0x222   :  { %17607 = vmatprep.subr.mxu0 %v20075_v47  ;;  %17618 = vmatprep.subr.mxu1 %v20080_v48 }
 0x223   :  { %17608 = vmatpush3.msra.mxu0 %v20075_v47  ;;  %17619 = vmatpush3.msra.mxu1 %v20080_v48  ;;  %v1410_v48 = vmul.f32 0.5, %v20136_v60 }
 0x224   :  { %17610 = vmatmul.mubr.msk.f32.vlgmr.msra.gmra.mxu0 %vm171_vm0, %v19886_v28  ;;  %17621 = vmatmul.mubr.msk.f32.vlgmr.msra.gmra.mxu1 %vm171_vm0, %v19886_v28 }
 0x225   :  { %17623 = vmatprep.subr.mxu0 %v20091_v53  ;;  %17634 = vmatprep.subr.mxu1 %v20096_v54 }
 0x226   :  { %17624 = vmatpush3.msra.mxu0 %v20091_v53  ;;  %17631 = vmatprep.mubr.msk.f32.mxu0 %vm171_vm0, %v19793_v12 }
 0x227   :  { %17635 = vmatpush3.msra.mxu1 %v20096_v54  ;;  %17642 = vmatprep.mubr.msk.f32.mxu1 %vm171_vm0, %v19793_v12  ;;  %v20294_v21 = vpop.f32.mrf.mxu0  ;;  %v1407_v54 = vmul.f32 0.5, %v20200_v31 }
 0x228   :  { %17625 = vmatprep.subr.mxu0 %v20109_v55  ;;  %17636 = vmatprep.subr.mxu1 %v20114_v56  ;;  %v20298_v22 = vpop.f32.mrf.mxu1 }
 0x229   :  { %17626 = vmatpush3.msra.mxu0 %v20109_v55  ;;  %17637 = vmatpush3.msra.mxu1 %v20114_v56  ;;  %v17237_v24 = vpop.f32.mrf.mxu0  ;;  %v1412_v55 = vmul.f32 0.5, %v20204_v8  ;;  %v1416_v8 = vmul.f32 0.5, %v20270_v18 }
 0x22a   :  { %17627 = vmatprep.subr.mxu0 %v20125_v57  ;;  %17638 = vmatprep.subr.mxu1 %v20130_v58  ;;  %v17292_v25 = vpop.f32.mrf.mxu1 }
 0x22b   :  { %17628 = vmatpush3.msra.mxu0 %v20125_v57  ;;  %17639 = vmatpush3.msra.mxu1 %v20130_v58  ;;  %v1409_v58 = vmul.f32 0.5, %v20238_v13 }
 0x22c   :  { %17629 = vmatprep.subr.mxu0 %v20143_v61  ;;  %17640 = vmatprep.subr.mxu1 %v20148_v62 }
 0x22d   :  { %17630 = vmatpush3.msra.mxu0 %v20143_v61  ;;  %17641 = vmatpush3.msra.mxu1 %v20148_v62  ;;  %v1411_v61 = vmul.f32 0.5, %v20266_v16 }
 0x22e   :  { %17632 = vmatmul.mubr.msk.f32.vlgmr.msra.gmra.mxu0 %vm171_vm0, %v19886_v28  ;;  %17643 = vmatmul.mubr.msk.f32.vlgmr.msra.gmra.mxu1 %vm171_vm0, %v19886_v28 }
 0x22f   :  { %17645 = vmatprep.subr.mxu0 %v20159_v1  ;;  %17656 = vmatprep.subr.mxu1 %v20164_v2 }
 0x230   :  { %17646 = vmatpush3.msra.mxu0 %v20159_v1  ;;  %17653 = vmatprep.mubr.msk.f32.mxu0 %vm171_vm0, %v19793_v12 }
 0x231   :  { %17657 = vmatpush3.msra.mxu1 %v20164_v2  ;;  %17664 = vmatprep.mubr.msk.f32.mxu1 %vm171_vm0, %v19793_v12  ;;  %v20322_v27 = vpop.f32.mrf.mxu0  ;;  %v1414_v2 = vmul.f32 0.5, %v20242_v52  ;;  %v1418_v52 = vmul.f32 0.5, %v20298_v22 }
 0x232   :  { %17647 = vmatprep.subr.mxu0 %v20177_v3  ;;  %17658 = vmatprep.subr.mxu1 %v20182_v4  ;;  %v20326_v51 = vpop.f32.mrf.mxu1 }
 0x233   :  { %17648 = vmatpush3.msra.mxu0 %v20177_v3  ;;  %17659 = vmatpush3.msra.mxu1 %v20182_v4  ;;  %v17259_v29 = vpop.f32.mrf.mxu0  ;;  %v1413_v3 = vmul.f32 0.5, %v20294_v21  ;;  %v1420_v20 = vmul.f32 0.5, %v20326_v51 }
 0x234   :  { %17649 = vmatprep.subr.mxu0 %v20193_v5  ;;  %17660 = vmatprep.subr.mxu1 %v20198_v7  ;;  %v17314_v30 = vpop.f32.mrf.mxu1 }
 0x235   :  { %17650 = vmatpush3.msra.mxu0 %v20193_v5  ;;  %17661 = vmatpush3.msra.mxu1 %v20198_v7 }
 0x236   :  { %17651 = vmatprep.subr.mxu0 %v20211_v44  ;;  %17662 = vmatprep.subr.mxu1 %v20216_v9 }
 0x237   :  { %17652 = vmatpush3.msra.mxu0 %v20211_v44  ;;  %17663 = vmatpush3.msra.mxu1 %v20216_v9  ;;  %v1415_v44 = vmul.f32 0.5, %v20322_v27 }
 0x238   :  { %17654 = vmatmul.mubr.msk.f32.vlgmr.msra.gmra.mxu0 %vm171_vm0, %v19886_v28  ;;  %17665 = vmatmul.mubr.msk.f32.vlgmr.msra.gmra.mxu1 %vm171_vm0, %v19886_v28 }
 0x239   :  { %17674 = vmatprep.subr.mxu1 %v19092_v37  ;;  %17678 = vmatprep.mubr.msk.f32.mxu1 %vm19093_vm1, %v19092_v37 }
 0x23a   :  { %17667 = vmatprep.subr.mxu0 %v19092_v37  ;;  %17671 = vmatprep.mubr.msk.f32.mxu0 %vm19093_vm1, %v19092_v37 }
 0x23b   :  { %v20348_v12 = vpop.f32.mrf.mxu0 }
 0x23c   :  { %v17336_v32 = vpop.f32.mrf.mxu1  ;;  %v1417_v14 = vmul.f32 0.5, %v20348_v12 }
 0x23d   :  { %17675 = vmatpush3.xpose.msk.msra.mxu1 %vm3833_vm2, %v17336_v32  ;;  %v17281_v33 = vpop.f32.mrf.mxu0 }
 0x23e   :  { %17676 = vmatprep.subr.mxu1 %v19092_v37  ;;  %v1568_v28 = vpop.f32.mrf.mxu1 }
 0x241   :  { %17677 = vmatpush3.xpose.msk.msra.mxu1 %vm3833_vm2, %v1568_v28 }
 0x242   :  { %17688 = vmatprep.subr.mxu1 %v19092_v37 }
 0x244   :  { %17679 = vmatmul.mubr.msk.f32.vlgmr.msra.gmra.mxu1 %vm3833_vm2, %v1406_v34 }
 0x245   :  { %v20356_v35 = vpop.f32.mrf.mxu0  ;;  %17692 = vmatprep.mubr.msk.f32.mxu1 %vm19093_vm1, %v19092_v37 }
 0x246   :  { %v17358_v36 = vpop.f32.mrf.mxu1  ;;  %v1419_v21 = vmul.f32 0.5, %v20356_v35 }
 0x247   :  { %17689 = vmatpush3.xpose.msk.msra.mxu1 %vm3833_vm2, %v17358_v36  ;;  %v17303_v39 = vpop.f32.mrf.mxu0 }
 0x248   :  { %17690 = vmatprep.subr.mxu1 %v19092_v37  ;;  %v1718_v17 = vpop.f32.mrf.mxu1 }
 0x24b   :  { %17691 = vmatpush3.xpose.msk.msra.mxu1 %vm3833_vm2, %v1718_v17 }
 0x24c   :  { %17702 = vmatprep.subr.mxu1 %v19092_v37 }
 0x24e   :  { %17693 = vmatmul.mubr.msk.f32.vlgmr.msra.gmra.mxu1 %vm3833_vm2, %v1408_v40 }
 0x24f   :  { %v17325_v41 = vpop.f32.mrf.mxu0  ;;  %17706 = vmatprep.mubr.msk.f32.mxu1 %vm19093_vm1, %v19092_v37 }
 0x250   :  { %v17380_v42 = vpop.f32.mrf.mxu1  ;;  %17668 = vmatpush3.xpose.msk.msra.mxu0 %vm3833_vm2, %v17325_v41 }
 0x251   :  { %17703 = vmatpush3.xpose.msk.msra.mxu1 %vm3833_vm2, %v17380_v42  ;;  %17669 = vmatprep.subr.mxu0 %v19092_v37  ;;  %v1493_v45 = vpop.f32.mrf.mxu0 }
 0x252   :  { %17704 = vmatprep.subr.mxu1 %v19092_v37  ;;  %v1868_v47 = vpop.f32.mrf.mxu1 }
 0x254   :  { %17670 = vmatpush3.xpose.msk.msra.mxu0 %vm3833_vm2, %v1493_v45 }
 0x255   :  { %17705 = vmatpush3.xpose.msk.msra.mxu1 %vm3833_vm2, %v1868_v47  ;;  %17681 = vmatprep.subr.mxu0 %v19092_v37 }
 0x256   :  { %17716 = vmatprep.subr.mxu1 %v19092_v37 }
 0x257   :  { %17672 = vmatmul.mubr.msk.f32.vlgmr.msra.gmra.mxu0 %vm3833_vm2, %v1405_v46 }
 0x258   :  { %17707 = vmatmul.mubr.msk.f32.vlgmr.msra.gmra.mxu1 %vm3833_vm2, %v1410_v48  ;;  %17685 = vmatprep.mubr.msk.f32.mxu0 %vm19093_vm1, %v19092_v37 }
 0x259   :  { %v17347_v49 = vpop.f32.mrf.mxu0  ;;  %17720 = vmatprep.mubr.msk.f32.mxu1 %vm19093_vm1, %v19092_v37 }
 0x25a   :  { %v17402_v23 = vpop.f32.mrf.mxu1  ;;  %17682 = vmatpush3.xpose.msk.msra.mxu0 %vm3833_vm2, %v17347_v49 }
 0x25b   :  { %17717 = vmatpush3.xpose.msk.msra.mxu1 %vm3833_vm2, %v17402_v23  ;;  %17683 = vmatprep.subr.mxu0 %v19092_v37  ;;  %v1643_v50 = vpop.f32.mrf.mxu0 }
 0x25c   :  { %17718 = vmatprep.subr.mxu1 %v19092_v37  ;;  %v2018_v53 = vpop.f32.mrf.mxu1 }
 0x25e   :  { %17684 = vmatpush3.xpose.msk.msra.mxu0 %vm3833_vm2, %v1643_v50 }
 0x25f   :  { %17719 = vmatpush3.xpose.msk.msra.mxu1 %vm3833_vm2, %v2018_v53  ;;  %17695 = vmatprep.subr.mxu0 %v19092_v37 }
 0x260   :  { %17730 = vmatprep.subr.mxu1 %v19092_v37 }
 0x261   :  { %17686 = vmatmul.mubr.msk.f32.vlgmr.msra.gmra.mxu0 %vm3833_vm2, %v1407_v54 }
 0x262   :  { %v17369_v56 = vpop.f32.mrf.mxu0  ;;  %17721 = vmatmul.mubr.msk.f32.vlgmr.msra.gmra.mxu1 %vm3833_vm2, %v1412_v55  ;;  %17699 = vmatprep.mubr.msk.f32.mxu0 %vm19093_vm1, %v19092_v37 }
 0x263   :  { %17696 = vmatpush3.xpose.msk.msra.mxu0 %vm3833_vm2, %v17369_v56  ;;  %17734 = vmatprep.mubr.msk.f32.mxu1 %vm19093_vm1, %v19092_v37 }
 0x264   :  { %17697 = vmatprep.subr.mxu0 %v19092_v37  ;;  %v1793_v57 = vpop.f32.mrf.mxu0 }
 0x267   :  { %17698 = vmatpush3.xpose.msk.msra.mxu0 %vm3833_vm2, %v1793_v57 }
 0x268   :  { %17709 = vmatprep.subr.mxu0 %v19092_v37 }
 0x26a   :  { %v17391_v59 = vpop.f32.mrf.mxu0  ;;  %17700 = vmatmul.mubr.msk.f32.vlgmr.msra.gmra.mxu0 %vm3833_vm2, %v1409_v58 }
 0x26b   :  { %17710 = vmatpush3.xpose.msk.msra.mxu0 %vm3833_vm2, %v17391_v59  ;;  %17713 = vmatprep.mubr.msk.f32.mxu0 %vm19093_vm1, %v19092_v37 }
 0x26c   :  { %17711 = vmatprep.subr.mxu0 %v19092_v37  ;;  %v1943_v60 = vpop.f32.mrf.mxu0 }
 0x26f   :  { %17712 = vmatpush3.xpose.msk.msra.mxu0 %vm3833_vm2, %v1943_v60 }
 0x270   :  { %17723 = vmatprep.subr.mxu0 %v19092_v37 }
 0x272   :  { %17714 = vmatmul.mubr.msk.f32.vlgmr.msra.gmra.mxu0 %vm3833_vm2, %v1411_v61 }
 0x273   :  { %17727 = vmatprep.mubr.msk.f32.mxu0 %vm19093_vm1, %v19092_v37 }
 0x28b   :  { %v17413_v62 = vpop.f32.mrf.mxu0  ;;  %v17424_v63 = vpop.f32.mrf.mxu1 }
 0x28c   :  { %17724 = vmatpush3.xpose.msk.msra.mxu0 %vm3833_vm2, %v17413_v62  ;;  %17731 = vmatpush3.xpose.msk.msra.mxu1 %vm3833_vm2, %v17424_v63 }
 0x28d   :  { %17725 = vmatprep.subr.mxu0 %v19092_v37  ;;  %17732 = vmatprep.subr.mxu1 %v19092_v37  ;;  %v2099_v0 = vpop.f32.mrf.mxu0  ;;  %v2174_v1 = vpop.f32.mrf.mxu1 }
 0x290   :  { %17726 = vmatpush3.xpose.msk.msra.mxu0 %vm3833_vm2, %v2099_v0  ;;  %17733 = vmatpush3.xpose.msk.msra.mxu1 %vm3833_vm2, %v2174_v1 }
 0x291   :  { %17737 = vmatprep.subr.mxu0 %v19092_v37  ;;  %17744 = vmatprep.subr.mxu1 %v19092_v37 }
 0x293   :  { %17728 = vmatmul.mubr.msk.f32.vlgmr.msra.gmra.mxu0 %vm3833_vm2, %v1413_v3  ;;  %17735 = vmatmul.mubr.msk.f32.vlgmr.msra.gmra.mxu1 %vm3833_vm2, %v1414_v2 }
 0x294   :  { %v17435_v4 = vpop.f32.mrf.mxu0  ;;  %v17446_v5 = vpop.f32.mrf.mxu1  ;;  %17741 = vmatprep.mubr.msk.f32.mxu0 %vm19093_vm1, %v19092_v37  ;;  %17748 = vmatprep.mubr.msk.f32.mxu1 %vm19093_vm1, %v19092_v37 }
 0x295   :  { %17738 = vmatpush3.xpose.msk.msra.mxu0 %vm3833_vm2, %v17435_v4  ;;  %17745 = vmatpush3.xpose.msk.msra.mxu1 %vm3833_vm2, %v17446_v5 }
 0x296   :  { %17739 = vmatprep.subr.mxu0 %v19092_v37  ;;  %17746 = vmatprep.subr.mxu1 %v19092_v37  ;;  %v2249_v7 = vpop.f32.mrf.mxu0  ;;  %v2324_v31 = vpop.f32.mrf.mxu1 }
 0x299   :  { %17740 = vmatpush3.xpose.msk.msra.mxu0 %vm3833_vm2, %v2249_v7  ;;  %17747 = vmatpush3.xpose.msk.msra.mxu1 %vm3833_vm2, %v2324_v31 }
 0x29a   :  { %17751 = vmatprep.subr.mxu0 %v19092_v37  ;;  %17758 = vmatprep.subr.mxu1 %v19092_v37 }
 0x29c   :  { %17742 = vmatmul.mubr.msk.f32.vlgmr.msra.gmra.mxu0 %vm3833_vm2, %v1415_v44  ;;  %17749 = vmatmul.mubr.msk.f32.vlgmr.msra.gmra.mxu1 %vm3833_vm2, %v1416_v8 }
 0x29d   :  { %17755 = vmatprep.mubr.msk.f32.mxu0 %vm19093_vm1, %v19092_v37  ;;  %17762 = vmatprep.mubr.msk.f32.mxu1 %vm19093_vm1, %v19092_v37 }
 0x29e   :  { %v17457_v9 = vpop.f32.mrf.mxu0  ;;  %v17468_v10 = vpop.f32.mrf.mxu1 }
 0x29f   :  { %17752 = vmatpush3.xpose.msk.msra.mxu0 %vm3833_vm2, %v17457_v9  ;;  %17759 = vmatpush3.xpose.msk.msra.mxu1 %vm3833_vm2, %v17468_v10 }
 0x2a0   :  { %17753 = vmatprep.subr.mxu0 %v19092_v37  ;;  %17760 = vmatprep.subr.mxu1 %v19092_v37  ;;  %v2399_v11 = vpop.f32.mrf.mxu0  ;;  %v2474_v13 = vpop.f32.mrf.mxu1 }
 0x2a3   :  { %17754 = vmatpush3.xpose.msk.msra.mxu0 %vm3833_vm2, %v2399_v11  ;;  %17761 = vmatpush3.xpose.msk.msra.mxu1 %vm3833_vm2, %v2474_v13 }
 0x2a4   :  { %17765 = vmatprep.subr.mxu0 %v19092_v37  ;;  %17772 = vmatprep.subr.mxu1 %v19092_v37 }
 0x2a6   :  { %17756 = vmatmul.mubr.msk.f32.vlgmr.msra.gmra.mxu0 %vm3833_vm2, %v1417_v14  ;;  %17763 = vmatmul.mubr.msk.f32.vlgmr.msra.gmra.mxu1 %vm3833_vm2, %v1418_v52 }
 0x2a7   :  { %17769 = vmatprep.mubr.msk.f32.mxu0 %vm19093_vm1, %v19092_v37  ;;  %17776 = vmatprep.mubr.msk.f32.mxu1 %vm19093_vm1, %v19092_v37 }
 0x2a8   :  { %v17479_v15 = vpop.f32.mrf.mxu0  ;;  %v17490_v16 = vpop.f32.mrf.mxu1 }
 0x2a9   :  { %17766 = vmatpush3.xpose.msk.msra.mxu0 %vm3833_vm2, %v17479_v15  ;;  %17773 = vmatpush3.xpose.msk.msra.mxu1 %vm3833_vm2, %v17490_v16 }
 0x2aa   :  { %17767 = vmatprep.subr.mxu0 %v19092_v37  ;;  %17774 = vmatprep.subr.mxu1 %v19092_v37  ;;  %v2549_v18 = vpop.f32.mrf.mxu0  ;;  %v2624_v19 = vpop.f32.mrf.mxu1 }
 0x2ad   :  { %17768 = vmatpush3.xpose.msk.msra.mxu0 %vm3833_vm2, %v2549_v18  ;;  %17775 = vmatpush3.xpose.msk.msra.mxu1 %vm3833_vm2, %v2624_v19 }
 0x2ae   :  { %17779 = vmatprep.subr.mxu0 %v19092_v37  ;;  %17800 = vmatprep.subr.mxu1 %v19092_v37 }
 0x2b0   :  { %17770 = vmatmul.mubr.msk.f32.vlgmr.msra.gmra.mxu0 %vm3833_vm2, %v1419_v21  ;;  %17777 = vmatmul.mubr.msk.f32.vlgmr.msra.gmra.mxu1 %vm3833_vm2, %v1420_v20 }
 0x2b1   :  { %17804 = vmatprep.mubr.msk.f32.mxu1 %vm19093_vm1, %v19092_v37  ;;  %17783 = vmatprep.mubr.msk.f32.mxu0 %vm19093_vm1, %v19092_v37 }
 0x2b2   :  { %v17501_v22 = vpop.f32.mrf.mxu0  ;;  %v20481_v25 = vpop.f32.mrf.mxu1 }
 0x2b3   :  { %17780 = vmatpush3.msra.mxu0 %v17501_v22 }
 0x2b4   :  { %v2699_v24 = vpop.f32.mrf.mxu0  ;;  %17781 = vmatprep.subr.mxu0 %v19092_v37  ;;  %v20484_v27 = vpop.f32.mrf.mxu1 }
 0x2b5   :  { %17782 = vmatpush3.msra.mxu0 %v2699_v24 }
 0x2b6   :  { %17786 = vmatprep.subr.mxu0 %v19092_v37 }
 0x2bc   :  { %v17534_v51 = vpop.f32.mrf.mxu1  ;;  %v20498_v34 = vpop.f32.mrf.mxu0 }
 0x2bd   :  { %17801 = vmatpush3.msra.mxu1 %v17534_v51 }
 0x2be   :  { %v2924_v29 = vpop.f32.mrf.mxu1  ;;  %17802 = vmatprep.subr.mxu1 %v19092_v37  ;;  %v20502_v36 = vpop.f32.mrf.mxu0 }
 0x2bf   :  { %17803 = vmatpush3.msra.mxu1 %v2924_v29 }
 0x2c0   :  { %17814 = vmatprep.subr.mxu1 %v19092_v37 }
 0x2c6   :  { %v20488_v30 = vpop.f32.mrf.mxu1  ;;  %v20506_v17 = vpop.f32.mrf.mxu0 }
 0x2c8   :  { %v20490_v12 = vpop.f32.mrf.mxu1  ;;  %v20510_v41 = vpop.f32.mrf.mxu0 }
 0x2d0   :  { %v20492_v32 = vpop.f32.mrf.mxu1  ;;  %v20514_v45 = vpop.f32.mrf.mxu0 }
 0x2d2   :  { %v20494_v33 = vpop.f32.mrf.mxu1  ;;  %v20518_v46 = vpop.f32.mrf.mxu0 }
 0x2da   :  { %v20496_v28 = vpop.f32.mrf.mxu1  ;;  %v20522_v49 = vpop.f32.mrf.mxu0 }
 0x2dc   :  { %v20500_v35 = vpop.f32.mrf.mxu1  ;;  %v20526_v50 = vpop.f32.mrf.mxu0 }
 0x2e4   :  { %v20504_v39 = vpop.f32.mrf.mxu1  ;;  %v20530_v54 = vpop.f32.mrf.mxu0 }
 0x2e6   :  { %v20508_v40 = vpop.f32.mrf.mxu1  ;;  %v20534_v57 = vpop.f32.mrf.mxu0 }
 0x2ee   :  { %v20512_v42 = vpop.f32.mrf.mxu1  ;;  %v20536_v58 = vpop.f32.mrf.mxu0 }
 0x2f0   :  { %v20516_v47 = vpop.f32.mrf.mxu1  ;;  %v20540_v60 = vpop.f32.mrf.mxu0 }
 0x2f8   :  { %v20520_v48 = vpop.f32.mrf.mxu1  ;;  %v20544_v63 = vpop.f32.mrf.mxu0 }
 0x2fa   :  { %v20524_v23 = vpop.f32.mrf.mxu1  ;;  %v20546_v0 = vpop.f32.mrf.mxu0 }
 0x304   :  { %v20528_v53 = vpop.f32.mrf.mxu1 }
 0x305   :  { %v5102_v55 = vsel %vm5098_vm3, %v20528_v53, -inf }
 0x306   :  { %5103 = vmax.xlane.f32.xlu1 %v5102_v55  ;;  %v17680_v56 = vpop.f32.mrf.mxu1 }
 0x30e   :  { %v20538_v59 = vpop.f32.mrf.mxu1 }
 0x30f   :  { %v5108_v61 = vsel %vm5098_vm3, %v20538_v59, -inf }
 0x310   :  { %5109 = vmax.xlane.f32.xlu1 %v5108_v61  ;;  %v17694_v62 = vpop.f32.mrf.mxu1 }
 0x317   :  { %v20548_v1 = vpop.f32.mrf.mxu0 }
 0x318   :  { %v20550_v2 = vpop.f32.mrf.mxu1  ;;  %v5099_v3 = vsel %vm5098_vm3, %v20548_v1, -inf }
 0x319   :  { %v5114_v4 = vsel %vm5098_vm3, %v20550_v2, -inf  ;;  %5100 = vmax.xlane.f32.xlu0 %v5099_v3  ;;  %v17673_v5 = vpop.f32.mrf.mxu0 }
 0x31a   :  { %5115 = vmax.xlane.f32.xlu1 %v5114_v4  ;;  %v17708_v7 = vpop.f32.mrf.mxu1 }
 0x321   :  { %v20556_v31 = vpop.f32.mrf.mxu0 }
 0x322   :  { %v20558_v8 = vpop.f32.mrf.mxu1  ;;  %v5105_v44 = vsel %vm5098_vm3, %v20556_v31, -inf }
 0x323   :  { %v5120_v9 = vsel %vm5098_vm3, %v20558_v8, -inf  ;;  %5106 = vmax.xlane.f32.xlu0 %v5105_v44  ;;  %v17687_v10 = vpop.f32.mrf.mxu0 }
 0x324   :  { %5121 = vmax.xlane.f32.xlu1 %v5120_v9  ;;  %v17722_v11 = vpop.f32.mrf.mxu1 }
 0x32a   :  { %v20564_v13 = vpop.f32.mrf.mxu0 }
 0x32b   :  { %v5111_v52 = vsel %vm5098_vm3, %v20564_v13, -inf }
 0x32c   :  { %5112 = vmax.xlane.f32.xlu0 %v5111_v52  ;;  %v17701_v14 = vpop.f32.mrf.mxu0 }
 0x332   :  { %v20568_v15 = vpop.f32.mrf.mxu0 }
 0x333   :  { %v5117_v16 = vsel %vm5098_vm3, %v20568_v15, -inf }
 0x334   :  { %5118 = vmax.xlane.f32.xlu0 %v5117_v16  ;;  %v17715_v18 = vpop.f32.mrf.mxu0 }
 0x353   :  { %v20572_v19 = vpop.f32.mrf.mxu0  ;;  %v20574_v20 = vpop.f32.mrf.mxu1 }
 0x354   :  { %v5126_v21 = vsel %vm5098_vm3, %v20574_v20, -inf  ;;  %v5123_v22 = vsel %vm5098_vm3, %v20572_v19, -inf }
 0x355   :  { %5127 = vmax.xlane.f32.xlu1 %v5126_v21  ;;  %v17736_v24 = vpop.f32.mrf.mxu1  ;;  %5124 = vmax.xlane.f32.xlu0 %v5123_v22  ;;  %v17729_v51 = vpop.f32.mrf.mxu0 }
 0x35c   :  { %v20580_v29 = vpop.f32.mrf.mxu0  ;;  %v20582_v55 = vpop.f32.mrf.mxu1 }
 0x35d   :  { %v5132_v56 = vsel %vm5098_vm3, %v20582_v55, -inf  ;;  %v5129_v61 = vsel %vm5098_vm3, %v20580_v29, -inf }
 0x35e   :  { %5133 = vmax.xlane.f32.xlu1 %v5132_v56  ;;  %v17750_v62 = vpop.f32.mrf.mxu1  ;;  %5130 = vmax.xlane.f32.xlu0 %v5129_v61  ;;  %v17743_v3 = vpop.f32.mrf.mxu0 }
 0x366   :  { %v20588_v4 = vpop.f32.mrf.mxu0  ;;  %v20590_v5 = vpop.f32.mrf.mxu1 }
 0x367   :  { %v5138_v7 = vsel %vm5098_vm3, %v20590_v5, -inf  ;;  %v5135_v44 = vsel %vm5098_vm3, %v20588_v4, -inf }
 0x368   :  { %5139 = vmax.xlane.f32.xlu1 %v5138_v7  ;;  %v17764_v9 = vpop.f32.mrf.mxu1  ;;  %5136 = vmax.xlane.f32.xlu0 %v5135_v44  ;;  %v17757_v10 = vpop.f32.mrf.mxu0 }
 0x370   :  { %v20596_v11 = vpop.f32.mrf.mxu0  ;;  %v20598_v52 = vpop.f32.mrf.mxu1 }
 0x371   :  { %v5144_v14 = vsel %vm5098_vm3, %v20598_v52, -inf  ;;  %v5141_v16 = vsel %vm5098_vm3, %v20596_v11, -inf }
 0x372   :  { %5145 = vmax.xlane.f32.xlu1 %v5144_v14  ;;  %v17778_v18 = vpop.f32.mrf.mxu1  ;;  %5142 = vmax.xlane.f32.xlu0 %v5141_v16  ;;  %v17771_v21 = vpop.f32.mrf.mxu0 }
 0x38f   :  { %v5104_v22 = vpop.xlane.xlu1 %5103 }
 0x390   :  { %v5148_v24 = vsub.f32 %v20528_v53, %v5104_v22 }
 0x392   :  { %v5165_v51 = vmul.f32 1.442695, %v5148_v24 }
 0x394   :  { %18912 = vpow2.f32 %v5165_v51 }
 0x399   :  { %v5110_v56 = vpop.xlane.xlu1 %5109 }
 0x39a   :  { %v5150_v61 = vsub.f32 %v20538_v59, %v5110_v56 }
 0x39c   :  { %v5169_v62 = vmul.f32 1.442695, %v5150_v61 }
 0x39e   :  { %18914 = vpow2.f32 %v5169_v62 }
 0x3a1   :  { %v20606_v3 = vpop.eup %18912 }
 0x3a2   :  { %v5101_v7 = vpop.xlane.xlu0 %5100  ;;  %v5198_v44 = vsel %vm5098_vm3, %v20606_v3, 0.0 }
 0x3a3   :  { %v5116_v9 = vpop.xlane.xlu1 %5115  ;;  %v5147_v10 = vsub.f32 %v20548_v1, %v5101_v7  ;;  %5199 = vadd.xlane.f32.xlu1 %v5198_v44 }
 0x3a4   :  { %v5152_v14 = vsub.f32 %v20550_v2, %v5116_v9 }
 0x3a5   :  { %v5163_v53 = vmul.f32 1.442695, %v5147_v10 }
 0x3a6   :  { %v5173_v16 = vmul.f32 1.442695, %v5152_v14 }
 0x3a7   :  { %18916 = vpow2.f32 %v5163_v53 }
 0x3a8   :  { %18918 = vpow2.f32 %v5173_v16 }
 0x3ab   :  { %v20612_v18 = vpop.eup %18914 }
 0x3ac   :  { %v5107_v59 = vpop.xlane.xlu0 %5106  ;;  %v5204_v21 = vsel %vm5098_vm3, %v20612_v18, 0.0 }
 0x3ad   :  { %v5122_v22 = vpop.xlane.xlu1 %5121  ;;  %v5149_v24 = vsub.f32 %v20556_v31, %v5107_v59  ;;  %5205 = vadd.xlane.f32.xlu1 %v5204_v21 }
 0x3ae   :  { %v5154_v51 = vsub.f32 %v20558_v8, %v5122_v22 }
 0x3af   :  { %v5167_v1 = vmul.f32 1.442695, %v5149_v24 }
 0x3b0   :  { %v5177_v56 = vmul.f32 1.442695, %v5154_v51 }
 0x3b1   :  { %18920 = vpow2.f32 %v5167_v1 }
 0x3b2   :  { %18922 = vpow2.f32 %v5177_v56 }
 0x3b4   :  { %v20618_v2 = vpop.eup %18916 }
 0x3b5   :  { %v20620_v61 = vpop.eup %18918  ;;  %v5113_v62 = vpop.xlane.xlu0 %5112  ;;  %v5195_v7 = vsel %vm5098_vm3, %v20618_v2, 0.0 }
 0x3b6   :  { %v5151_v44 = vsub.f32 %v20564_v13, %v5113_v62  ;;  %v5210_v31 = vsel %vm5098_vm3, %v20620_v61, 0.0  ;;  %5196 = vadd.xlane.f32.xlu0 %v5195_v7 }
 0x3b7   :  { %5211 = vadd.xlane.f32.xlu1 %v5210_v31 }
 0x3b8   :  { %v5171_v8 = vmul.f32 1.442695, %v5151_v44 }
 0x3ba   :  { %18924 = vpow2.f32 %v5171_v8 }
 0x3bd   :  { %v5119_v9 = vpop.xlane.xlu0 %5118 }
 0x3be   :  { %v20627_v10 = vpop.eup %18920  ;;  %v5153_v14 = vsub.f32 %v20568_v15, %v5119_v9 }
 0x3bf   :  { %v20630_v53 = vpop.eup %18922  ;;  %v5201_v16 = vsel %vm5098_vm3, %v20627_v10, 0.0 }
 0x3c0   :  { %v5175_v59 = vmul.f32 1.442695, %v5153_v14  ;;  %v5216_v13 = vsel %vm5098_vm3, %v20630_v53, 0.0  ;;  %5202 = vadd.xlane.f32.xlu0 %v5201_v16 }
 0x3c1   :  { %5217 = vadd.xlane.f32.xlu1 %v5216_v13 }
 0x3c2   :  { %18926 = vpow2.f32 %v5175_v59 }
 0x3c7   :  { %v20636_v21 = vpop.eup %18924 }
 0x3c8   :  { %v5207_v22 = vsel %vm5098_vm3, %v20636_v21, 0.0 }
 0x3c9   :  { %5208 = vadd.xlane.f32.xlu0 %v5207_v22 }
 0x3cf   :  { %v20640_v24 = vpop.eup %18926 }
 0x3d0   :  { %v5213_v15 = vsel %vm5098_vm3, %v20640_v24, 0.0 }
 0x3d1   :  { %5214 = vadd.xlane.f32.xlu0 %v5213_v15 }
 0x3de   :  { %v5128_v51 = vpop.xlane.xlu1 %5127  ;;  %v5125_v1 = vpop.xlane.xlu0 %5124 }
 0x3df   :  { %v5156_v56 = vsub.f32 %v20574_v20, %v5128_v51  ;;  %v5155_v62 = vsub.f32 %v20572_v19, %v5125_v1 }
 0x3e1   :  { %v5181_v7 = vmul.f32 1.442695, %v5156_v56  ;;  %v5179_v44 = vmul.f32 1.442695, %v5155_v62 }
 0x3e3   :  { %18928 = vpow2.f32 %v5181_v7 }
 0x3e4   :  { %18930 = vpow2.f32 %v5179_v44 }
 0x3e7   :  { %v5134_v31 = vpop.xlane.xlu1 %5133  ;;  %v5131_v8 = vpop.xlane.xlu0 %5130 }
 0x3e8   :  { %v5158_v9 = vsub.f32 %v20582_v55, %v5134_v31  ;;  %v5157_v14 = vsub.f32 %v20580_v29, %v5131_v8 }
 0x3ea   :  { %v5185_v16 = vmul.f32 1.442695, %v5158_v9  ;;  %v5183_v59 = vmul.f32 1.442695, %v5157_v14 }
 0x3ec   :  { %18932 = vpow2.f32 %v5185_v16 }
 0x3ed   :  { %18934 = vpow2.f32 %v5183_v59 }
 0x3f0   :  { %v20648_v13 = vpop.eup %18928 }
 0x3f1   :  { %v20650_v22 = vpop.eup %18930  ;;  %v5140_v20 = vpop.xlane.xlu1 %5139  ;;  %v5222_v15 = vsel %vm5098_vm3, %v20648_v13, 0.0 }
 0x3f2   :  { %v5137_v19 = vpop.xlane.xlu0 %5136  ;;  %v5160_v51 = vsub.f32 %v20590_v5, %v5140_v20  ;;  %5223 = vadd.xlane.f32.xlu1 %v5222_v15  ;;  %v5219_v29 = vsel %vm5098_vm3, %v20650_v22, 0.0 }
 0x3f3   :  { %v5159_v1 = vsub.f32 %v20588_v4, %v5137_v19  ;;  %5220 = vadd.xlane.f32.xlu0 %v5219_v29 }
 0x3f4   :  { %v5189_v55 = vmul.f32 1.442695, %v5160_v51 }
 0x3f5   :  { %v5187_v56 = vmul.f32 1.442695, %v5159_v1 }
 0x3f6   :  { %18936 = vpow2.f32 %v5189_v55 }
 0x3f7   :  { %18938 = vpow2.f32 %v5187_v56 }
 0x3f9   :  { %v20658_v62 = vpop.eup %18932 }
 0x3fa   :  { %v20660_v7 = vpop.eup %18934  ;;  %v5228_v44 = vsel %vm5098_vm3, %v20658_v62, 0.0 }
 0x3fb   :  { %v5146_v31 = vpop.xlane.xlu1 %5145  ;;  %v5143_v5 = vpop.xlane.xlu0 %5142  ;;  %5229 = vadd.xlane.f32.xlu1 %v5228_v44  ;;  %v5225_v4 = vsel %vm5098_vm3, %v20660_v7, 0.0 }
 0x3fc   :  { %v5162_v8 = vsub.f32 %v20598_v52, %v5146_v31  ;;  %v5161_v9 = vsub.f32 %v20596_v11, %v5143_v5  ;;  %5226 = vadd.xlane.f32.xlu0 %v5225_v4 }
 0x3fe   :  { %v5193_v14 = vmul.f32 1.442695, %v5162_v8  ;;  %v5191_v16 = vmul.f32 1.442695, %v5161_v9 }
 0x400   :  { %18940 = vpow2.f32 %v5193_v14 }
 0x401   :  { %18942 = vpow2.f32 %v5191_v16 }
 0x403   :  { %v20668_v59 = vpop.eup %18936 }
 0x404   :  { %v20670_v20 = vpop.eup %18938  ;;  %v5234_v19 = vsel %vm5098_vm3, %v20668_v59, 0.0 }
 0x405   :  { %5235 = vadd.xlane.f32.xlu1 %v5234_v19  ;;  %v5231_v15 = vsel %vm5098_vm3, %v20670_v20, 0.0 }
 0x406   :  { %5232 = vadd.xlane.f32.xlu0 %v5231_v15 }
 0x40d   :  { %v20676_v52 = vpop.eup %18940 }
 0x40e   :  { %v20678_v11 = vpop.eup %18942  ;;  %v5240_v51 = vsel %vm5098_vm3, %v20676_v52, 0.0 }
 0x40f   :  { %5241 = vadd.xlane.f32.xlu1 %v5240_v51  ;;  %v5237_v1 = vsel %vm5098_vm3, %v20678_v11, 0.0  ;;  %v146_v51 = vld [vmem:[%s22830_s5 + $0xc] sm:$0xf] }
 0x410   :  { %5238 = vadd.xlane.f32.xlu0 %v5237_v1 }
 0x42c   :  { %v5200_v29 = vpop.xlane.xlu1 %5199 }
 0x436   :  { %v5206_v55 = vpop.xlane.xlu1 %5205 }
 0x437   :  { %18944 = vrcp.f32 %v5206_v55  ;;  %v148_v55 = vld [vmem:[%s22830_s5 + $0x14] sm:$0xf] }
 0x43f   :  { %v5197_v56 = vpop.xlane.xlu0 %5196 }
 0x440   :  { %v5212_v44 = vpop.xlane.xlu1 %5211  ;;  %18946 = vrcp.f32 %v5197_v56 }
 0x441   :  { %18948 = vrcp.f32 %v5212_v44  ;;  %v147_v44 = vld [vmem:[%s22830_s5 + $0x10] sm:$0xf] }
 0x442   :  { %18950 = vrcp.f32 %v5200_v29 }
 0x444   :  { %v18945_v31 = vpop.eup %18944 }
 0x445   :  { %v5262_v5 = vmul.f32 %v18945_v31, %v20612_v18 }
 0x447   :  { %17805 = vmatmul.mubr.msk.f32.vlgmr.msra.gmra.mxu1 %vm5098_vm3, %v5262_v5 }
 0x448   :  { %17815 = vmatpush3.msra.mxu1 %v20488_v30  ;;  %17818 = vmatprep.mubr.msk.f32.mxu1 %vm19093_vm1, %v19092_v37 }
 0x449   :  { %v5203_v4 = vpop.xlane.xlu0 %5202  ;;  %17816 = vmatprep.subr.mxu1 %v19092_v37 }
 0x44a   :  { %v5218_v8 = vpop.xlane.xlu1 %5217  ;;  %18952 = vrcp.f32 %v5203_v4  ;;  %17817 = vmatpush3.msra.mxu1 %v20490_v12  ;;  %v150_v4 = vld [vmem:[%s22830_s5 + $0x1c] sm:$0xf] }
 0x44b   :  { %18954 = vrcp.f32 %v5218_v8  ;;  %17828 = vmatprep.subr.mxu1 %v19092_v37 }
 0x44d   :  { %v18947_v9 = vpop.eup %18946 }
 0x44e   :  { %v18949_v14 = vpop.eup %18948  ;;  %v5259_v18 = vmul.f32 %v18947_v9, %v20618_v2  ;;  %v149_v9 = vld [vmem:[%s22830_s5 + $0x18] sm:$0xf] }
 0x44f   :  { %v5264_v16 = vmul.f32 %v18949_v14, %v20620_v61  ;;  %v18951_v30 = vpop.eup %18950 }
 0x450   :  { %17784 = vmatmul.mubr.msk.f32.vlgmr.msra.gmra.mxu0 %vm5098_vm3, %v5259_v18  ;;  %v5260_v12 = vmul.f32 %v18951_v30, %v20606_v3 }
 0x451   :  { %17787 = vmatpush3.msra.mxu0 %v20481_v25  ;;  %17819 = vmatmul.mubr.msk.f32.vlgmr.msra.gmra.mxu1 %vm5098_vm3, %v5264_v16 }
 0x452   :  { %v5209_v19 = vpop.xlane.xlu0 %5208  ;;  %17829 = vmatpush3.msra.mxu1 %v20492_v32  ;;  %17788 = vmatprep.subr.mxu0 %v19092_v37 }
 0x453   :  { %18956 = vrcp.f32 %v5209_v19  ;;  %17830 = vmatprep.subr.mxu1 %v19092_v37  ;;  %17789 = vmatpush3.msra.mxu0 %v20484_v27 }
 0x454   :  { %17831 = vmatpush3.msra.mxu1 %v20494_v33  ;;  %17790 = vmatprep.mubr.msk.f32.mxu0 %vm19093_vm1, %v19092_v37 }
 0x455   :  { %17793 = vmatprep.subr.mxu0 %v19092_v37  ;;  %17791 = vmatmul.mubr.msk.f32.vlgmr.msra.gmra.mxu0 %vm5098_vm3, %v5260_v12 }
 0x456   :  { %17794 = vmatpush3.msra.mxu0 %v20498_v34  ;;  %17797 = vmatprep.mubr.msk.f32.mxu0 %vm19093_vm1, %v19092_v37 }
 0x457   :  { %v18953_v25 = vpop.eup %18952  ;;  %17795 = vmatprep.subr.mxu0 %v19092_v37  ;;  %17832 = vmatprep.mubr.msk.f32.mxu1 %vm19093_vm1, %v19092_v37 }
 0x458   :  { %v18955_v27 = vpop.eup %18954  ;;  %17796 = vmatpush3.msra.mxu0 %v20502_v36  ;;  %17842 = vmatprep.subr.mxu1 %v19092_v37  ;;  %v5261_v32 = vmul.f32 %v18953_v25, %v20627_v10 }
 0x459   :  { %17807 = vmatprep.subr.mxu0 %v19092_v37  ;;  %v5266_v33 = vmul.f32 %v18955_v27, %v20630_v53 }
 0x45a   :  { %v5215_v34 = vpop.xlane.xlu0 %5214  ;;  %17798 = vmatmul.mubr.msk.f32.vlgmr.msra.gmra.mxu0 %vm5098_vm3, %v5261_v32 }
 0x45b   :  { %18958 = vrcp.f32 %v5215_v34  ;;  %17808 = vmatpush3.msra.mxu0 %v20506_v17  ;;  %17833 = vmatmul.mubr.msk.f32.vlgmr.msra.gmra.mxu1 %vm5098_vm3, %v5266_v33 }
 0x45c   :  { %17843 = vmatpush3.msra.mxu1 %v20496_v28  ;;  %17809 = vmatprep.subr.mxu0 %v19092_v37 }
 0x45d   :  { %17844 = vmatprep.subr.mxu1 %v19092_v37  ;;  %17810 = vmatpush3.msra.mxu0 %v20510_v41 }
 0x45e   :  { %17845 = vmatpush3.msra.mxu1 %v20500_v35  ;;  %17811 = vmatprep.mubr.msk.f32.mxu0 %vm19093_vm1, %v19092_v37 }
 0x45f   :  { %17821 = vmatprep.subr.mxu0 %v19092_v37  ;;  %17846 = vmatprep.mubr.msk.f32.mxu1 %vm19093_vm1, %v19092_v37 }
 0x460   :  { %v18957_v36 = vpop.eup %18956  ;;  %17856 = vmatprep.subr.mxu1 %v19092_v37 }
 0x461   :  { %v5263_v28 = vmul.f32 %v18957_v36, %v20636_v21 }
 0x463   :  { %17812 = vmatmul.mubr.msk.f32.vlgmr.msra.gmra.mxu0 %vm5098_vm3, %v5263_v28 }
 0x464   :  { %17822 = vmatpush3.msra.mxu0 %v20514_v45  ;;  %17825 = vmatprep.mubr.msk.f32.mxu0 %vm19093_vm1, %v19092_v37 }
 0x465   :  { %17823 = vmatprep.subr.mxu0 %v19092_v37 }
 0x466   :  { %17824 = vmatpush3.msra.mxu0 %v20518_v46 }
 0x467   :  { %17835 = vmatprep.subr.mxu0 %v19092_v37 }
 0x468   :  { %v18959_v35 = vpop.eup %18958 }
 0x469   :  { %v5265_v17 = vmul.f32 %v18959_v35, %v20640_v24 }
 0x46b   :  { %17826 = vmatmul.mubr.msk.f32.vlgmr.msra.gmra.mxu0 %vm5098_vm3, %v5265_v17 }
 0x46c   :  { %17836 = vmatpush3.msra.mxu0 %v20522_v49  ;;  %17839 = vmatprep.mubr.msk.f32.mxu0 %vm19093_vm1, %v19092_v37 }
 0x46d   :  { %17837 = vmatprep.subr.mxu0 %v19092_v37 }
 0x46e   :  { %17838 = vmatpush3.msra.mxu0 %v20526_v50 }
 0x46f   :  { %17849 = vmatprep.subr.mxu0 %v19092_v37 }
 0x47b   :  { %v5224_v41 = vpop.xlane.xlu1 %5223 }
 0x47c   :  { %18960 = vrcp.f32 %v5224_v41  ;;  %v5221_v45 = vpop.xlane.xlu0 %5220 }
 0x47d   :  { %18962 = vrcp.f32 %v5221_v45 }
 0x484   :  { %v5230_v46 = vpop.xlane.xlu1 %5229 }
 0x485   :  { %18964 = vrcp.f32 %v5230_v46  ;;  %v5227_v3 = vpop.xlane.xlu0 %5226 }
 0x486   :  { %18966 = vrcp.f32 %v5227_v3 }
 0x489   :  { %v18961_v2 = vpop.eup %18960 }
 0x48a   :  { %v18963_v61 = vpop.eup %18962  ;;  %v5268_v49 = vmul.f32 %v18961_v2, %v20648_v13 }
 0x48b   :  { %v5267_v10 = vmul.f32 %v18963_v61, %v20650_v22  ;;  %v143_v22 = vld [vmem:[%s22830_s5] sm:$0xf] }
 0x48c   :  { %17847 = vmatmul.mubr.msk.f32.vlgmr.msra.gmra.mxu1 %vm5098_vm3, %v5268_v49 }
 0x48d   :  { %17840 = vmatmul.mubr.msk.f32.vlgmr.msra.gmra.mxu0 %vm5098_vm3, %v5267_v10  ;;  %17857 = vmatpush3.msra.mxu1 %v20504_v39 }
 0x48e   :  { %v5236_v50 = vpop.xlane.xlu1 %5235  ;;  %17850 = vmatpush3.msra.mxu0 %v20530_v54  ;;  %17858 = vmatprep.subr.mxu1 %v19092_v37 }
 0x48f   :  { %18968 = vrcp.f32 %v5236_v50  ;;  %v5233_v53 = vpop.xlane.xlu0 %5232  ;;  %17851 = vmatprep.subr.mxu0 %v19092_v37  ;;  %17859 = vmatpush3.msra.mxu1 %v20508_v40 }
 0x490   :  { %18970 = vrcp.f32 %v5233_v53  ;;  %17852 = vmatpush3.msra.mxu0 %v20534_v57  ;;  %17860 = vmatprep.mubr.msk.f32.mxu1 %vm19093_vm1, %v19092_v37 }
 0x491   :  { %17870 = vmatprep.subr.mxu1 %v19092_v37  ;;  %17853 = vmatprep.mubr.msk.f32.mxu0 %vm19093_vm1, %v19092_v37 }
 0x492   :  { %v18965_v39 = vpop.eup %18964  ;;  %17863 = vmatprep.subr.mxu0 %v19092_v37 }
 0x493   :  { %v18967_v54 = vpop.eup %18966  ;;  %v5270_v21 = vmul.f32 %v18965_v39, %v20658_v62 }
 0x494   :  { %v5269_v24 = vmul.f32 %v18967_v54, %v20660_v7 }
 0x495   :  { %17861 = vmatmul.mubr.msk.f32.vlgmr.msra.gmra.mxu1 %vm5098_vm3, %v5270_v21 }
 0x496   :  { %17854 = vmatmul.mubr.msk.f32.vlgmr.msra.gmra.mxu0 %vm5098_vm3, %v5269_v24  ;;  %17871 = vmatpush3.msra.mxu1 %v20512_v42 }
 0x497   :  { %17864 = vmatpush3.msra.mxu0 %v20536_v58  ;;  %17872 = vmatprep.subr.mxu1 %v19092_v37 }
 0x498   :  { %v5242_v40 = vpop.xlane.xlu1 %5241  ;;  %17865 = vmatprep.subr.mxu0 %v19092_v37  ;;  %17873 = vmatpush3.msra.mxu1 %v20516_v47 }
 0x499   :  { %18972 = vrcp.f32 %v5242_v40  ;;  %v5239_v57 = vpop.xlane.xlu0 %5238  ;;  %17866 = vmatpush3.msra.mxu0 %v20540_v60  ;;  %17867 = vmatprep.mubr.msk.f32.mxu0 %vm19093_vm1, %v19092_v37 }
 0x49a   :  { %18974 = vrcp.f32 %v5239_v57  ;;  %17874 = vmatprep.mubr.msk.f32.mxu1 %vm19093_vm1, %v19092_v37  ;;  %17877 = vmatprep.subr.mxu0 %v19092_v37 }
 0x49b   :  { %17884 = vmatprep.subr.mxu1 %v19092_v37 }
 0x49c   :  { %v18969_v42 = vpop.eup %18968 }
 0x49d   :  { %v18971_v58 = vpop.eup %18970  ;;  %v5272_v13 = vmul.f32 %v18969_v42, %v20668_v59  ;;  %v145_v59 = vld [vmem:[%s22830_s5 + $0x8] sm:$0xf] }
 0x49e   :  { %v5271_v47 = vmul.f32 %v18971_v58, %v20670_v20 }
 0x49f   :  { %17875 = vmatmul.mubr.msk.f32.vlgmr.msra.gmra.mxu1 %vm5098_vm3, %v5272_v13 }
 0x4a0   :  { %17868 = vmatmul.mubr.msk.f32.vlgmr.msra.gmra.mxu0 %vm5098_vm3, %v5271_v47  ;;  %17885 = vmatpush3.msra.mxu1 %v20520_v48 }
 0x4a1   :  { %17878 = vmatpush3.msra.mxu0 %v20544_v63  ;;  %17886 = vmatprep.subr.mxu1 %v19092_v37 }
 0x4a2   :  { %17879 = vmatprep.subr.mxu0 %v19092_v37  ;;  %17887 = vmatpush3.msra.mxu1 %v20524_v23  ;;  %v144_v23 = vld [vmem:[%s22830_s5 + $0x4] sm:$0xf] }
 0x4a3   :  { %17880 = vmatpush3.msra.mxu0 %v20546_v0  ;;  %17881 = vmatprep.mubr.msk.f32.mxu0 %vm19093_vm1, %v19092_v37 }
 0x4a4   :  { %17888 = vmatprep.mubr.msk.f32.mxu1 %vm19093_vm1, %v19092_v37  ;;  %17891 = vmatprep.subr.mxu0 %v19092_v37 }
 0x4a5   :  { %17896 = vmatprep.subr.mxu1 %v19092_v37 }
 0x4a6   :  { %v18973_v48 = vpop.eup %18972 }
 0x4a7   :  { %v18975_v60 = vpop.eup %18974  ;;  %v5274_v63 = vmul.f32 %v18973_v48, %v20676_v52 }
 0x4a8   :  { %v5273_v0 = vmul.f32 %v18975_v60, %v20678_v11 }
 0x4a9   :  { %17889 = vmatmul.mubr.msk.f32.vlgmr.msra.gmra.mxu1 %vm5098_vm3, %v5274_v63 }
 0x4aa   :  { %17882 = vmatmul.mubr.msk.f32.vlgmr.msra.gmra.mxu0 %vm5098_vm3, %v5273_v0  ;;  %17897 = vmatpush3.msk.msra.mxu1 %vm6446_vm4, %v144_v23 }
 0x4ab   :  { %17892 = vmatpush3.msk.msra.mxu0 %vm6446_vm4, %v143_v22  ;;  %17893 = vmatprep.mubr.msk.f32.mxu0 %vm19093_vm1, %v19092_v37 }
 0x4ac   :  { %17898 = vmatprep.mubr.msk.f32.mxu1 %vm19093_vm1, %v19092_v37  ;;  %17901 = vmatprep.subr.mxu0 %v19092_v37 }
 0x4ad   :  { %17906 = vmatprep.subr.mxu1 %v19092_v37 }
 0x507   :  { %v5563_v62 = vpop.f32.mrf.mxu1 }
 0x509   :  { %v17806_v7 = vpop.f32.mrf.mxu1 }
 0x510   :  { %v5344_v20 = vpop.f32.mrf.mxu0 }
 0x511   :  { %v5709_v15 = vpop.f32.mrf.mxu1  ;;  %17894 = vmatmul.mubr.msk.f32.vlgmr.msra.gmra.mxu0 %vm3833_vm2, %v5344_v20 }
 0x512   :  { %v17785_v52 = vpop.f32.mrf.mxu0  ;;  %17902 = vmatpush3.msk.msra.mxu0 %vm6446_vm4, %v145_v59  ;;  %17903 = vmatprep.mubr.msk.f32.mxu0 %vm19093_vm1, %v19092_v37 }
 0x513   :  { %v17820_v11 = vpop.f32.mrf.mxu1  ;;  %17911 = vmatprep.subr.mxu0 %v19092_v37 }
 0x515   :  { %v5417_v1 = vpop.f32.mrf.mxu0 }
 0x516   :  { %17899 = vmatmul.mubr.msk.f32.vlgmr.msra.gmra.mxu1 %vm3833_vm2, %v5417_v1 }
 0x517   :  { %v17792_v29 = vpop.f32.mrf.mxu0  ;;  %17907 = vmatpush3.msk.msra.mxu1 %vm6446_vm4, %v146_v51  ;;  %17908 = vmatprep.mubr.msk.f32.mxu1 %vm19093_vm1, %v19092_v37 }
 0x518   :  { %17916 = vmatprep.subr.mxu1 %v19092_v37  ;;  %v15968_v29 = vld [vmem:[%s22827_s2 + $0x6] ss:$0 sm:$0xff] }
 0x51a   :  { %v5490_v56 = vpop.f32.mrf.mxu0  ;;  %17909 = vmatmul.mubr.msk.f32.vlgmr.msra.gmra.mxu1 %vm3833_vm2, %v5563_v62 }
 0x51b   :  { %v5855_v31 = vpop.f32.mrf.mxu1  ;;  %17904 = vmatmul.mubr.msk.f32.vlgmr.msra.gmra.mxu0 %vm3833_vm2, %v5490_v56  ;;  %17917 = vmatpush3.msk.msra.mxu1 %vm6446_vm4, %v148_v55 }
 0x51c   :  { %v17799_v5 = vpop.f32.mrf.mxu0  ;;  %17918 = vmatprep.mubr.msk.f32.mxu1 %vm19093_vm1, %v19092_v37  ;;  %17926 = vmatprep.subr.mxu1 %v19092_v37 }
 0x51d   :  { %v17834_v8 = vpop.f32.mrf.mxu1  ;;  %17912 = vmatpush3.msk.msra.mxu0 %vm6446_vm4, %v147_v44  ;;  %17913 = vmatprep.mubr.msk.f32.mxu0 %vm19093_vm1, %v19092_v37 }
 0x51e   :  { %17919 = vmatmul.mubr.msk.f32.vlgmr.msra.gmra.mxu1 %vm3833_vm2, %v5709_v15  ;;  %17921 = vmatprep.subr.mxu0 %v19092_v37 }
 0x51f   :  { %17927 = vmatpush3.msk.msra.mxu1 %vm6446_vm4, %v150_v4  ;;  %17928 = vmatprep.mubr.msk.f32.mxu1 %vm19093_vm1, %v19092_v37 }
 0x520   :  { %17936 = vmatprep.subr.mxu1 %v19092_v37 }
 0x522   :  { %17929 = vmatmul.mubr.msk.f32.vlgmr.msra.gmra.mxu1 %vm3833_vm2, %v5855_v31 }
 0x523   :  { %v5636_v14 = vpop.f32.mrf.mxu0  ;;  %17937 = vmatpush3.msk.msra.mxu1 %vm6446_vm4, %v144_v23  ;;  %17938 = vmatprep.mubr.msk.f32.mxu1 %vm19093_vm1, %v19092_v37 }
 0x524   :  { %17914 = vmatmul.mubr.msk.f32.vlgmr.msra.gmra.mxu0 %vm3833_vm2, %v5636_v14  ;;  %17946 = vmatprep.subr.mxu1 %v19092_v37 }
 0x525   :  { %v17813_v18 = vpop.f32.mrf.mxu0  ;;  %17922 = vmatpush3.msk.msra.mxu0 %vm6446_vm4, %v149_v9  ;;  %17923 = vmatprep.mubr.msk.f32.mxu0 %vm19093_vm1, %v19092_v37 }
 0x526   :  { %17931 = vmatprep.subr.mxu0 %v19092_v37 }
 0x52b   :  { %v5782_v16 = vpop.f32.mrf.mxu0 }
 0x52c   :  { %17924 = vmatmul.mubr.msk.f32.vlgmr.msra.gmra.mxu0 %vm3833_vm2, %v5782_v16 }
 0x52d   :  { %v17827_v30 = vpop.f32.mrf.mxu0  ;;  %17932 = vmatpush3.msk.msra.mxu0 %vm6446_vm4, %v143_v22  ;;  %17933 = vmatprep.mubr.msk.f32.mxu0 %vm19093_vm1, %v19092_v37 }
 0x52e   :  { %17941 = vmatprep.subr.mxu0 %v19092_v37 }
 0x54c   :  { %v6001_v19 = vpop.f32.mrf.mxu1 }
 0x54d   :  { %v5928_v12 = vpop.f32.mrf.mxu0  ;;  %17939 = vmatmul.mubr.msk.f32.vlgmr.msra.gmra.mxu1 %vm3833_vm2, %v6001_v19 }
 0x54e   :  { %17934 = vmatmul.mubr.msk.f32.vlgmr.msra.gmra.mxu0 %vm3833_vm2, %v5928_v12  ;;  %v17848_v25 = vpop.f32.mrf.mxu1  ;;  %17947 = vmatpush3.msk.msra.mxu1 %vm6446_vm4, %v146_v51 }
 0x54f   :  { %v17841_v27 = vpop.f32.mrf.mxu0  ;;  %17942 = vmatpush3.msk.msra.mxu0 %vm6446_vm4, %v145_v59  ;;  %17943 = vmatprep.mubr.msk.f32.mxu0 %vm19093_vm1, %v19092_v37 }
 0x550   :  { %17948 = vmatprep.mubr.msk.f32.mxu1 %vm19093_vm1, %v19092_v37  ;;  %17951 = vmatprep.subr.mxu0 %v19092_v37 }
 0x551   :  { %17956 = vmatprep.subr.mxu1 %v19092_v37 }
 0x555   :  { %v6147_v32 = vpop.f32.mrf.mxu1 }
 0x556   :  { %v6074_v33 = vpop.f32.mrf.mxu0  ;;  %17949 = vmatmul.mubr.msk.f32.vlgmr.msra.gmra.mxu1 %vm3833_vm2, %v6147_v32 }
 0x557   :  { %17944 = vmatmul.mubr.msk.f32.vlgmr.msra.gmra.mxu0 %vm3833_vm2, %v6074_v33  ;;  %v17862_v34 = vpop.f32.mrf.mxu1  ;;  %17957 = vmatpush3.msk.msra.mxu1 %vm6446_vm4, %v148_v55 }
 0x558   :  { %v17855_v36 = vpop.f32.mrf.mxu0  ;;  %17952 = vmatpush3.msk.msra.mxu0 %vm6446_vm4, %v147_v44  ;;  %17953 = vmatprep.mubr.msk.f32.mxu0 %vm19093_vm1, %v19092_v37  ;;  %v19068_v44 = vld [vmem:[%s22825_s0] sm:$0xff] }
 0x559   :  { %17958 = vmatprep.mubr.msk.f32.mxu1 %vm19093_vm1, %v19092_v37  ;;  %17961 = vmatprep.subr.mxu0 %v19092_v37 }
 0x55a   :  { %17966 = vmatprep.subr.mxu1 %v19092_v37 }
 0x55f   :  { %v6293_v28 = vpop.f32.mrf.mxu1 }
 0x560   :  { %v6220_v35 = vpop.f32.mrf.mxu0  ;;  %17959 = vmatmul.mubr.msk.f32.vlgmr.msra.gmra.mxu1 %vm3833_vm2, %v6293_v28 }
 0x561   :  { %17954 = vmatmul.mubr.msk.f32.vlgmr.msra.gmra.mxu0 %vm3833_vm2, %v6220_v35  ;;  %v17876_v17 = vpop.f32.mrf.mxu1  ;;  %17967 = vmatpush3.msk.msra.mxu1 %vm6446_vm4, %v150_v4 }
 0x562   :  { %v17869_v41 = vpop.f32.mrf.mxu0  ;;  %17962 = vmatpush3.msk.msra.mxu0 %vm6446_vm4, %v149_v9  ;;  %17963 = vmatprep.mubr.msk.f32.mxu0 %vm19093_vm1, %v19092_v37 }
 0x563   :  { %17968 = vmatprep.mubr.msk.f32.mxu1 %vm19093_vm1, %v19092_v37 }
 0x569   :  { %v6439_v45 = vpop.f32.mrf.mxu1 }
 0x56a   :  { %v6366_v46 = vpop.f32.mrf.mxu0  ;;  %17969 = vmatmul.mubr.msk.f32.vlgmr.msra.gmra.mxu1 %vm3833_vm2, %v6439_v45 }
 0x56b   :  { %17964 = vmatmul.mubr.msk.f32.vlgmr.msra.gmra.mxu0 %vm3833_vm2, %v6366_v46  ;;  %v17890_v3 = vpop.f32.mrf.mxu1 }
 0x56c   :  { %v17883_v2 = vpop.f32.mrf.mxu0 }
 0x5d1   :  { %v6516_v61 = vpop.f32.mrf.mxu0 }
 0x5d2   :  { %v7636_v57 = vsel %vm171_vm0, %v6516_v61, 0.0 }
 0x5d3   :  { %v17895_v49 = vpop.f32.mrf.mxu0 }
 0x5d6   :  { %v6592_v10 = vpop.f32.mrf.mxu1 }
 0x5d7   :  { %v7637_v21 = vsel %vm171_vm0, %v6592_v10, 0.0 }
 0x5d8   :  { %v17900_v50 = vpop.f32.mrf.mxu1  ;;  %v7638_v58 = vadd.f32 %v7637_v21, %v7636_v57 }
 0x5da   :  { %v6744_v53 = vpop.f32.mrf.mxu1 }
 0x5db   :  { %v6668_v39 = vpop.f32.mrf.mxu0  ;;  %v7641_v23 = vsel %vm171_vm0, %v6744_v53, 0.0 }
 0x5dc   :  { %v17910_v54 = vpop.f32.mrf.mxu1  ;;  %v7639_v42 = vsel %vm171_vm0, %v6668_v39, 0.0 }
 0x5dd   :  { %v17905_v24 = vpop.f32.mrf.mxu0  ;;  %v7640_v47 = vadd.f32 %v7639_v42, %v7638_v58 }
 0x5de   :  { %v6896_v40 = vpop.f32.mrf.mxu1 }
 0x5df   :  { %v7642_v22 = vadd.f32 %v7641_v23, %v7640_v47  ;;  %v7645_v59 = vsel %vm171_vm0, %v6896_v40, 0.0  ;;  %v19069_v40 = vld [vmem:[%s22825_s0 + $0x8] sm:$0xff] }
 0x5e0   :  { %v17920_v13 = vpop.f32.mrf.mxu1 }
 0x5e2   :  { %v7048_v48 = vpop.f32.mrf.mxu1 }
 0x5e3   :  { %v7649_v1 = vsel %vm171_vm0, %v7048_v48, 0.0 }
 0x5e4   :  { %v6820_v60 = vpop.f32.mrf.mxu0  ;;  %v17930_v63 = vpop.f32.mrf.mxu1 }
 0x5e5   :  { %v7643_v0 = vsel %vm171_vm0, %v6820_v60, 0.0 }
 0x5e6   :  { %v17915_v62 = vpop.f32.mrf.mxu0  ;;  %v7644_v7 = vadd.f32 %v7643_v0, %v7642_v22 }
 0x5e8   :  { %v7646_v15 = vadd.f32 %v7645_v59, %v7644_v7  ;;  %v154_v7 = vld [vmem:[%s22831_s6 + $0x18] sm:$0xff]  ;;  %v153_v59 = vld [vmem:[%s22831_s6 + $0x10] sm:$0xff] }
 0x5e9   :  { %17971 = vmatprep.subr.mxu0 %v154_v7 }
 0x5ea   :  { %17972 = vmatpush3.msra.mxu0 %v154_v7 }
 0x5eb   :  { %17973 = vmatprep.subr.mxu0 %v153_v59 }
 0x5ec   :  { %v6972_v20 = vpop.f32.mrf.mxu0  ;;  %17974 = vmatpush3.msra.mxu0 %v153_v59 }
 0x5ed   :  { %v7647_v52 = vsel %vm171_vm0, %v6972_v20, 0.0  ;;  %v152_v20 = vld [vmem:[%s22831_s6 + $0x8] sm:$0xff] }
 0x5ee   :  { %v7648_v11 = vadd.f32 %v7647_v52, %v7646_v15  ;;  %v17925_v51 = vpop.f32.mrf.mxu0  ;;  %v151_v15 = vld [vmem:[%s22831_s6] sm:$0xff]  ;;  %17975 = vmatprep.subr.mxu0 %v152_v20 }
 0x5ef   :  { %17976 = vmatpush3.msra.mxu0 %v152_v20 }
 0x5f0   :  { %v7650_v55 = vadd.f32 %v7649_v1, %v7648_v11  ;;  %17977 = vmatprep.subr.mxu0 %v151_v15 }
 0x5f1   :  { %17978 = vmatpush3.msra.mxu0 %v151_v15 }
 0x5f2   :  { %v7670_v56 = vadd.f32 %v15968_v29, %v7650_v55  ;;  %18017 = vmatprep.subr.mxu0 %v19092_v37 }
 0x5f4   :  { %v20916_v31 = vadd.f32 %v19068_v44, %v7670_v56  ;;  %v15970_v56 = vld [vmem:[%s22827_s2 + $0x5] ss:$0 sm:$0xff] }
 0x5f6   :  { %v7674_v5 = vsel %vm171_vm0, %v20916_v31, 0.0 }
 0x5f7   :  { %7675 = vadd.xlane.f32.xlu0 %v7674_v5 }
 0x60d   :  { %v7194_v4 = vpop.f32.mrf.mxu1 }
 0x60e   :  { %v7121_v8 = vpop.f32.mrf.mxu0  ;;  %v7652_v25 = vsel %vm171_vm0, %v7194_v4, 0.0 }
 0x60f   :  { %v17940_v9 = vpop.f32.mrf.mxu1  ;;  %v7651_v12 = vsel %vm171_vm0, %v7121_v8, 0.0 }
 0x610   :  { %v17935_v14 = vpop.f32.mrf.mxu0  ;;  %v7653_v32 = vadd.f32 %v7652_v25, %v7651_v12  ;;  %v169_v12 = vld [vmem:[%s22832_s7 + $0x70] sm:$0xff]  ;;  %v168_v25 = vld [vmem:[%s22832_s7 + $0x68] sm:$0xff] }
 0x616   :  { %v7340_v18 = vpop.f32.mrf.mxu1 }
 0x617   :  { %v7267_v16 = vpop.f32.mrf.mxu0  ;;  %v7656_v17 = vsel %vm171_vm0, %v7340_v18, 0.0 }
 0x618   :  { %v17950_v30 = vpop.f32.mrf.mxu1  ;;  %v7654_v27 = vsel %vm171_vm0, %v7267_v16, 0.0 }
 0x619   :  { %v17945_v19 = vpop.f32.mrf.mxu0  ;;  %v7655_v34 = vadd.f32 %v7654_v27, %v7653_v32  ;;  %v167_v27 = vld [vmem:[%s22832_s7 + $0x60] sm:$0xff]  ;;  %v166_v32 = vld [vmem:[%s22832_s7 + $0x58] sm:$0xff] }
 0x61a   :  { %v170_v19 = vld [vmem:[%s22832_s7 + $0x78] sm:$0xff] }
 0x61b   :  { %v7657_v45 = vadd.f32 %v7656_v17, %v7655_v34  ;;  %17982 = vmatprep.subr.mxu1 %v170_v19  ;;  %v164_v34 = vld [vmem:[%s22832_s7 + $0x48] sm:$0xff] }
 0x61c   :  { %17983 = vmatpush3.msra.mxu1 %v170_v19  ;;  %v160_v17 = vld [vmem:[%s22832_s7 + $0x28] sm:$0xff]  ;;  %v21083_v19 = vld [vmem:[%s22829_s4 + $0x380] sm:$0xff] }
 0x61d   :  { %17984 = vmatprep.subr.mxu1 %v169_v12 }
 0x61e   :  { %17985 = vmatpush3.msra.mxu1 %v169_v12 }
 0x61f   :  { %17986 = vmatprep.subr.mxu1 %v168_v25 }
 0x620   :  { %v7486_v33 = vpop.f32.mrf.mxu1  ;;  %17987 = vmatpush3.msra.mxu1 %v168_v25 }
 0x621   :  { %v7413_v36 = vpop.f32.mrf.mxu0  ;;  %v7660_v3 = vsel %vm171_vm0, %v7486_v33, 0.0  ;;  %17988 = vmatprep.subr.mxu1 %v167_v27  ;;  %v165_v33 = vld [vmem:[%s22832_s7 + $0x50] sm:$0xff] }
 0x622   :  { %v17960_v28 = vpop.f32.mrf.mxu1  ;;  %v7658_v41 = vsel %vm171_vm0, %v7413_v36, 0.0  ;;  %17989 = vmatpush3.msra.mxu1 %v167_v27  ;;  %v163_v36 = vld [vmem:[%s22832_s7 + $0x40] sm:$0xff] }
 0x623   :  { %v17955_v35 = vpop.f32.mrf.mxu0  ;;  %v7659_v46 = vadd.f32 %v7658_v41, %v7657_v45  ;;  %17990 = vmatprep.subr.mxu1 %v166_v32  ;;  %v162_v28 = vld [vmem:[%s22832_s7 + $0x38] sm:$0xff]  ;;  %v159_v41 = vld [vmem:[%s22832_s7 + $0x20] sm:$0xff] }
 0x624   :  { %17991 = vmatpush3.msra.mxu1 %v166_v32  ;;  %v161_v35 = vld [vmem:[%s22832_s7 + $0x30] sm:$0xff]  ;;  %v158_v45 = vld [vmem:[%s22832_s7 + $0x18] sm:$0xff] }
 0x625   :  { %v7661_v61 = vadd.f32 %v7660_v3, %v7659_v46  ;;  %17992 = vmatprep.subr.mxu1 %v165_v33  ;;  %v157_v46 = vld [vmem:[%s22832_s7 + $0x10] sm:$0xff]  ;;  %v156_v3 = vld [vmem:[%s22832_s7 + $0x8] sm:$0xff] }
 0x626   :  { %17993 = vmatpush3.msra.mxu1 %v165_v33 }
 0x627   :  { %17994 = vmatprep.subr.mxu1 %v164_v34 }
 0x628   :  { %17995 = vmatpush3.msra.mxu1 %v164_v34 }
 0x629   :  { %17996 = vmatprep.subr.mxu1 %v163_v36 }
 0x62a   :  { %v7632_v2 = vpop.f32.mrf.mxu1  ;;  %17997 = vmatpush3.msra.mxu1 %v163_v36 }
 0x62b   :  { %v7559_v49 = vpop.f32.mrf.mxu0  ;;  %v7664_v54 = vsel %vm171_vm0, %v7632_v2, 0.0  ;;  %17998 = vmatprep.subr.mxu1 %v162_v28  ;;  %v155_v2 = vld [vmem:[%s22832_s7] sm:$0xff] }
 0x62c   :  { %v7662_v10 = vsel %vm171_vm0, %v7559_v49, 0.0  ;;  %v17970_v50 = vpop.f32.mrf.mxu1  ;;  %17999 = vmatpush3.msra.mxu1 %v162_v28 }
 0x62d   :  { %v7663_v53 = vadd.f32 %v7662_v10, %v7661_v61  ;;  %v17965_v39 = vpop.f32.mrf.mxu0  ;;  %18000 = vmatprep.subr.mxu1 %v161_v35  ;;  %v15971_v61 = vld [vmem:[%s22828_s3] ss:$0 sm:$0xff] }
 0x62e   :  { %18001 = vmatpush3.msra.mxu1 %v161_v35  ;;  %v16101_v35 = vld [vmem:[%s22827_s2 + $0x8] ss:$0 sm:$0xff] }
 0x62f   :  { %v7665_v21 = vadd.f32 %v7664_v54, %v7663_v53  ;;  %18002 = vmatprep.subr.mxu1 %v160_v17 }
 0x630   :  { %18003 = vmatpush3.msra.mxu1 %v160_v17 }
 0x631   :  { %v7671_v24 = vadd.f32 %v15968_v29, %v7665_v21  ;;  %v15969_v29 = vld [vmem:[%s22827_s2 + $0x4] ss:$0 sm:$0xff]  ;;  %18004 = vmatprep.subr.mxu1 %v159_v41 }
 0x632   :  { %18005 = vmatpush3.msra.mxu1 %v159_v41  ;;  %v16102_v41 = vld [vmem:[%s22827_s2 + $0x9] ss:$0 sm:$0xff] }
 0x633   :  { %v20931_v57 = vadd.f32 %v19069_v40, %v7671_v24  ;;  %18006 = vmatprep.subr.mxu1 %v158_v45 }
 0x634   :  { %18007 = vmatpush3.msra.mxu1 %v158_v45 }
 0x635   :  { %v7677_v42 = vsel %vm171_vm0, %v20931_v57, 0.0  ;;  %18008 = vmatprep.subr.mxu1 %v157_v46 }
 0x636   :  { %7678 = vadd.xlane.f32.xlu1 %v7677_v42  ;;  %18009 = vmatpush3.msra.mxu1 %v157_v46  ;;  %v21104_v46 = vld [vmem:[%s22829_s4 + $0x338] sm:$0xff] }
 0x637   :  { %18010 = vmatprep.subr.mxu1 %v156_v3 }
 0x638   :  { %18011 = vmatpush3.msra.mxu1 %v156_v3  ;;  %v21109_v3 = vld [vmem:[%s22829_s4 + $0x3d8] sm:$0xff] }
 0x639   :  { %18012 = vmatprep.subr.mxu1 %v155_v2 }
 0x63a   :  { %18013 = vmatpush3.msra.mxu1 %v155_v2  ;;  %v21118_v2 = vld [vmem:[%s22829_s4 + $0x330] sm:$0xff] }
 0x63b   :  { %18061 = vmatprep.subr.mxu1 %v19092_v37 }
 0x680   :  { %v7676_v58 = vpop.xlane.xlu0 %7675 }
 0x681   :  { %v7680_v13 = vmul.f32 0.03125, %v7676_v58 }
 0x683   :  { %v7682_v47 = vsub.f32 %v20916_v31, %v7680_v13 }
 0x685   :  { %v7684_v48 = vmul.f32 %v7682_v47, %v7682_v47 }
 0x687   :  { %v7686_v60 = vsel %vm171_vm0, %v7684_v48, 0.0 }
 0x688   :  { %7687 = vadd.xlane.f32.xlu0 %v7686_v60 }
 0x6bf   :  { %v7679_v63 = vpop.xlane.xlu1 %7678 }
 0x6c0   :  { %v7681_v23 = vmul.f32 0.03125, %v7679_v63 }
 0x6c2   :  { %v7683_v0 = vsub.f32 %v20931_v57, %v7681_v23  ;;  %v15976_v23 = vld [vmem:[%s22827_s2 + $0x7] ss:$0 sm:$0xff] }
 0x6c4   :  { %v7685_v22 = vmul.f32 %v7683_v0, %v7683_v0 }
 0x6c6   :  { %v7689_v62 = vsel %vm171_vm0, %v7685_v22, 0.0 }
 0x6c7   :  { %7690 = vadd.xlane.f32.xlu1 %v7689_v62 }
 0x711   :  { %v7688_v52 = vpop.xlane.xlu0 %7687 }
 0x712   :  { %v7692_v11 = vmul.f32 0.03125, %v7688_v52 }
 0x714   :  { %v7694_v51 = vadd.f32 1e-05, %v7692_v11 }
 0x716   :  { %18976 = vrsqrt.f32 %v7694_v51 }
 0x723   :  { %v18977_v1 = vpop.eup %18976 }
 0x724   :  { %v7698_v55 = vmul.f32 %v18977_v1, %v7682_v47 }
 0x726   :  { %v7704_v44 = vmul.f32 %v15969_v29, %v7698_v55 }
 0x728   :  { %v7710_v5 = vadd.f32 %v15970_v56, %v7704_v44 }
 0x72a   :  { %17979 = vmatprep.mubr.msk.f32.mxu0 %vm171_vm0, %v7710_v5 }
 0x750   :  { %v7691_v4 = vpop.xlane.xlu1 %7690 }
 0x751   :  { %v7693_v8 = vmul.f32 0.03125, %v7691_v4  ;;  %v21040_v4 = vld [vmem:[%s22829_s4 + $0x318] sm:$0xff] }
 0x753   :  { %v7695_v9 = vadd.f32 1e-05, %v7693_v8  ;;  %v21045_v8 = vld [vmem:[%s22829_s4 + $0x398] sm:$0xff] }
 0x755   :  { %18978 = vrsqrt.f32 %v7695_v9  ;;  %v21050_v9 = vld [vmem:[%s22829_s4 + $0x310] sm:$0xff] }
 0x762   :  { %v18979_v14 = vpop.eup %18978 }
 0x763   :  { %v7699_v18 = vmul.f32 %v18979_v14, %v7683_v0  ;;  %v21057_v14 = vld [vmem:[%s22829_s4 + $0x390] sm:$0xff] }
 0x765   :  { %v7705_v16 = vmul.f32 %v15969_v29, %v7699_v18  ;;  %v21064_v18 = vld [vmem:[%s22829_s4 + $0x308] sm:$0xff] }
 0x767   :  { %v7711_v30 = vadd.f32 %v15970_v56, %v7705_v16  ;;  %v21069_v16 = vld [vmem:[%s22829_s4 + $0x388] sm:$0xff] }
 0x769   :  { %17980 = vmatmul.mubr.msk.f32.vlgmr.msra.gmra.mxu0 %vm171_vm0, %v7711_v30  ;;  %v21078_v30 = vld [vmem:[%s22829_s4 + $0x300] sm:$0xff] }
 0x76a   :  { %18025 = vmatprep.mubr.msk.f32.mxu0 %vm19093_vm1, %v19092_v37  ;;  %18018 = vmatpush3.msra.mxu0 %v21040_v4 }
 0x76b   :  { %18019 = vmatprep.subr.mxu0 %v19092_v37 }
 0x76c   :  { %18020 = vmatpush3.msra.mxu0 %v21050_v9 }
 0x76d   :  { %18021 = vmatprep.subr.mxu0 %v19092_v37 }
 0x76e   :  { %18022 = vmatpush3.msra.mxu0 %v21064_v18 }
 0x76f   :  { %18023 = vmatprep.subr.mxu0 %v19092_v37 }
 0x770   :  { %18024 = vmatpush3.msra.mxu0 %v21078_v30 }
 0x771   :  { %18028 = vmatprep.subr.mxu0 %v19092_v37 }
 0x829   :  { %v17981_v49 = vpop.f32.mrf.mxu0 }
 0x82a   :  { %v7794_v10 = vadd.f32 %v17981_v49, %v15971_v61  ;;  %v21132_v49 = vld [vmem:[%s22829_s4 + $0x328] sm:$0xff] }
 0x82b   :  { %v7788_v50 = vpop.f32.mrf.mxu0 }
 0x82c   :  { %v15975_v53 = vmul.f32 -1.702, %v7794_v10  ;;  %v7789_v39 = vadd.f32 %v15971_v61, %v7788_v50  ;;  %v21123_v61 = vld [vmem:[%s22829_s4 + $0x3d0] sm:$0xff]  ;;  %v21146_v50 = vld [vmem:[%s22829_s4 + $0x320] sm:$0xff] }
 0x82e   :  { %v7803_v54 = vmul.f32 1.442695, %v15975_v53  ;;  %v15974_v21 = vmul.f32 -1.702, %v7789_v39  ;;  %v21153_v53 = vld [vmem:[%s22829_s4 + $0x3c0] sm:$0xff] }
 0x830   :  { %18980 = vpow2.f32 %v7803_v54  ;;  %v7801_v24 = vmul.f32 1.442695, %v15974_v21  ;;  %v15988_v54 = vld [vmem:[%s22829_s4 + $0x358] sm:$0xff] }
 0x832   :  { %18982 = vpow2.f32 %v7801_v24  ;;  %v15987_v24 = vld [vmem:[%s22829_s4 + $0x350] sm:$0xff] }
 0x83d   :  { %v18981_v40 = vpop.eup %18980 }
 0x83e   :  { %v7806_v42 = vadd.f32 1.0, %v18981_v40  ;;  %v15986_v40 = vld [vmem:[%s22829_s4 + $0x348] sm:$0xff] }
 0x83f   :  { %v18983_v58 = vpop.eup %18982 }
 0x840   :  { %v7805_v13 = vadd.f32 1.0, %v18983_v58  ;;  %18984 = vrcp.f32 %v7806_v42  ;;  %v15985_v58 = vld [vmem:[%s22829_s4 + $0x340] sm:$0xff] }
 0x842   :  { %18986 = vrcp.f32 %v7805_v13 }
 0x84d   :  { %v18985_v47 = vpop.eup %18984 }
 0x84e   :  { %v7812_v63 = vmul.f32 %v18985_v47, %v7794_v10  ;;  %v21137_v10 = vld [vmem:[%s22829_s4 + $0x3c8] sm:$0xff]  ;;  %v21201_v47 = vld [vmem:[%s22829_s4 + $0x378] sm:$0xff] }
 0x84f   :  { %v18987_v48 = vpop.eup %18986 }
 0x850   :  { %v7811_v60 = vmul.f32 %v18987_v48, %v7789_v39  ;;  %v21212_v48 = vld [vmem:[%s22829_s4 + $0x370] sm:$0xff] }
 0x852   :  { %18014 = vmatprep.mubr.f32.mxu1 %v7811_v60  ;;  %v21220_v60 = vld [vmem:[%s22829_s4 + $0x368] sm:$0xff] }
 0x853   :  { %18015 = vmatmul.mubr.f32.vlgmr.msra.gmra.mxu1 %v7812_v63  ;;  %v21228_v63 = vld [vmem:[%s22829_s4 + $0x360] sm:$0xff] }
 0x854   :  { %18069 = vmatprep.mubr.msk.f32.mxu1 %vm19093_vm1, %v19092_v37  ;;  %18062 = vmatpush3.msra.mxu1 %v21045_v8 }
 0x855   :  { %18063 = vmatprep.subr.mxu1 %v19092_v37 }
 0x856   :  { %18064 = vmatpush3.msra.mxu1 %v21057_v14 }
 0x857   :  { %18065 = vmatprep.subr.mxu1 %v19092_v37 }
 0x858   :  { %18066 = vmatpush3.msra.mxu1 %v21069_v16 }
 0x859   :  { %18067 = vmatprep.subr.mxu1 %v19092_v37 }
 0x85a   :  { %18068 = vmatpush3.msra.mxu1 %v21083_v19 }
 0x85b   :  { %18083 = vmatprep.subr.mxu1 %v19092_v37 }
 0x913   :  { %v18016_v0 = vpop.f32.mrf.mxu1 }
 0x914   :  { %v7889_v22 = vadd.f32 %v18016_v0, %v15976_v23  ;;  %v21252_v0 = vld [vmem:[%s22829_s4 + $0x3b0] sm:$0xff] }
 0x915   :  { %v7883_v62 = vpop.f32.mrf.mxu1 }
 0x916   :  { %v21020_v7 = vadd.f32 %v7889_v22, %v20931_v57  ;;  %v7884_v59 = vadd.f32 %v15976_v23, %v7883_v62  ;;  %v21241_v23 = vld [vmem:[%s22829_s4 + $0x3b8] sm:$0xff]  ;;  %v21261_v22 = vld [vmem:[%s22829_s4 + $0x3a8] sm:$0xff]  ;;  %v21270_v62 = vld [vmem:[%s22829_s4 + $0x3a0] sm:$0xff] }
 0x918   :  { %v21023_v20 = vadd.f32 %v7884_v59, %v20916_v31  ;;  %v8036_v15 = vsel %vm171_vm0, %v21020_v7, 0.0  ;;  %v21285_v59 = vld [vmem:[%s22829_s4 + $0x3f8] sm:$0xff] }
 0x919   :  { %8037 = vadd.xlane.f32.xlu1 %v8036_v15  ;;  %v21296_v15 = vld [vmem:[%s22829_s4 + $0x3f0] sm:$0xff] }
 0x91a   :  { %v8033_v52 = vsel %vm171_vm0, %v21023_v20, 0.0 }
 0x91b   :  { %8034 = vadd.xlane.f32.xlu0 %v8033_v52  ;;  %v21305_v52 = vld [vmem:[%s22829_s4 + $0x3e8] sm:$0xff] }
 0x9a2   :  { %v8038_v11 = vpop.xlane.xlu1 %8037 }
 0x9a3   :  { %v8040_v51 = vmul.f32 0.03125, %v8038_v11  ;;  %v21310_v11 = vld [vmem:[%s22827_s2 + $0xa] ss:$0 sm:$0xff] }
 0x9a4   :  { %v8035_v1 = vpop.xlane.xlu0 %8034 }
 0x9a5   :  { %v21030_v29 = vsub.f32 %v21020_v7, %v8040_v51  ;;  %v8039_v57 = vmul.f32 0.03125, %v8035_v1  ;;  %v21319_v51 = vld [vmem:[%s22829_s4 + $0x3e0] sm:$0xff]  ;;  %v8075_v1 = vmul.f32 %v21310_v11, %v19525_v38 }
 0x9a7   :  { %v8041_v55 = vsub.f32 %v21023_v20, %v8039_v57  ;;  %v8044_v31 = vmul.f32 %v21030_v29, %v21030_v29  ;;  %v21338_v57 = vld [vmem:[%s22829_s4 + $0x418] sm:$0xff] }
 0x9a9   :  { %v8048_v56 = vsel %vm171_vm0, %v8044_v31, 0.0  ;;  %v8043_v44 = vmul.f32 %v8041_v55, %v8041_v55  ;;  %v21365_v31 = vld [vmem:[%s22829_s4 + $0x408] sm:$0xff] }
 0x9aa   :  { %8049 = vadd.xlane.f32.xlu1 %v8048_v56  ;;  %v8076_v56 = vmul.f32 %v21310_v11, %v19564_v43  ;;  %v21387_v43 = vld [vmem:[%s22829_s4 + $0x458] sm:$0xff] }
 0x9ab   :  { %v8045_v5 = vsel %vm171_vm0, %v8043_v44, 0.0  ;;  %v21376_v44 = vld [vmem:[%s22829_s4 + $0x400] sm:$0xff] }
 0x9ac   :  { %8046 = vadd.xlane.f32.xlu0 %v8045_v5 }
 0xa33   :  { %v8050_v32 = vpop.xlane.xlu1 %8049 }
 0xa34   :  { %v8052_v33 = vmul.f32 0.03125, %v8050_v32  ;;  %v8077_v32 = vmul.f32 %v21310_v11, %v19745_v6 }
 0xa35   :  { %v8047_v12 = vpop.xlane.xlu0 %8046 }
 0xa36   :  { %v8051_v25 = vmul.f32 0.03125, %v8047_v12  ;;  %v8054_v34 = vadd.f32 1e-05, %v8052_v33  ;;  %v21492_v12 = vld [vmem:[%s22829_s4 + $0x4d0] sm:$0xff]  ;;  %v21522_v33 = vld [vmem:[%s22829_s4 + $0x438] sm:$0xff] }
 0xa38   :  { %v8053_v27 = vadd.f32 1e-05, %v8051_v25  ;;  %v21502_v25 = vld [vmem:[%s22829_s4 + $0x4c8] sm:$0xff] }
 0xa3a   :  { %18988 = vrsqrt.f32 %v8053_v27  ;;  %v21511_v27 = vld [vmem:[%s22829_s4 + $0x4c0] sm:$0xff] }
 0xa3b   :  { %18990 = vrsqrt.f32 %v8054_v34  ;;  %v21541_v34 = vld [vmem:[%s22829_s4 + $0x430] sm:$0xff] }
 0xa47   :  { %v18989_v36 = vpop.eup %18988 }
 0xa48   :  { %v8057_v28 = vmul.f32 %v18989_v36, %v8041_v55  ;;  %v18991_v39 = vpop.eup %18990  ;;  %v21355_v55 = vld [vmem:[%s22829_s4 + $0x410] sm:$0xff]  ;;  %v21552_v36 = vld [vmem:[%s22829_s4 + $0x428] sm:$0xff] }
 0xa49   :  { %v8058_v21 = vmul.f32 %v18991_v39, %v21030_v29  ;;  %v21330_v29 = vld [vmem:[%s22827_s2 + $0xb] ss:$0 sm:$0xff]  ;;  %v21698_v39 = vld [vmem:[%s22829_s4 + $0x4e0] sm:$0xff] }
 0xa4a   :  { %v8063_v17 = vmul.f32 %v16101_v35, %v8057_v28  ;;  %v21347_v38 = vadd.f32 %v21330_v29, %v8075_v1  ;;  %v21390_v5 = vadd.f32 %v21330_v29, %v8076_v56  ;;  %v21533_v6 = vadd.f32 %v21330_v29, %v8077_v32  ;;  %v21927_v1 = vld [vmem:[%s22829_s4 + $0x578] sm:$0xff]  ;;  %v21986_v56 = vld [vmem:[%s22829_s4 + $0x5b0] sm:$0xff] }
 0xa4b   :  { %v8064_v42 = vmul.f32 %v16101_v35, %v8058_v21  ;;  %v8078_v28 = vmul.f32 %v21310_v11, %v19881_v26  ;;  %v21563_v35 = vld [vmem:[%s22829_s4 + $0x420] sm:$0xff]  ;;  %v21572_v26 = vld [vmem:[%s22829_s4 + $0x478] sm:$0xff]  ;;  %v21722_v21 = vld [vmem:[%s22829_s4 + $0x510] sm:$0xff] }
 0xa4c   :  { %v21099_v45 = vadd.f32 %v16102_v41, %v8063_v17  ;;  %v21909_v11 = vld [vmem:[%s22829_s4 + $0x528] sm:$0xff] }
 0xa4d   :  { %v21193_v13 = vadd.f32 %v16102_v41, %v8064_v42  ;;  %v21577_v17 = vadd.f32 %v21330_v29, %v8078_v28  ;;  %v21590_v41 = vld [vmem:[%s22829_s4 + $0x470] sm:$0xff]  ;;  %v21753_v42 = vld [vmem:[%s22829_s4 + $0x558] sm:$0xff] }
 0xa4e   :  { %18026 = vmatmul.mubr.msk.f32.vlgmr.msra.gmra.mxu0 %vm171_vm0, %v21099_v45  ;;  %18070 = vmatmul.mubr.msk.f32.vlgmr.msra.gmra.mxu1 %vm171_vm0, %v21099_v45  ;;  %v21942_v29 = vld [vmem:[%s22829_s4 + $0x570] sm:$0xff] }
 0xa4f   :  { %18029 = vmatpush3.msra.mxu0 %v21104_v46  ;;  %18084 = vmatpush3.msra.mxu1 %v21109_v3 }
 0xa50   :  { %18030 = vmatprep.subr.mxu0 %v19092_v37  ;;  %18085 = vmatprep.subr.mxu1 %v19092_v37 }
 0xa51   :  { %18031 = vmatpush3.msra.mxu0 %v21118_v2  ;;  %18086 = vmatpush3.msra.mxu1 %v21123_v61 }
 0xa52   :  { %18032 = vmatprep.subr.mxu0 %v19092_v37  ;;  %18087 = vmatprep.subr.mxu1 %v19092_v37 }
 0xa53   :  { %18033 = vmatpush3.msra.mxu0 %v21132_v49  ;;  %18088 = vmatpush3.msra.mxu1 %v21137_v10 }
 0xa54   :  { %18034 = vmatprep.subr.mxu0 %v19092_v37  ;;  %18089 = vmatprep.subr.mxu1 %v19092_v37 }
 0xa55   :  { %18035 = vmatpush3.msra.mxu0 %v21146_v50  ;;  %18036 = vmatprep.mubr.msk.f32.mxu0 %vm19093_vm1, %v19092_v37 }
 0xa56   :  { %18090 = vmatpush3.msra.mxu1 %v21153_v53  ;;  %18091 = vmatprep.mubr.msk.f32.mxu1 %vm19093_vm1, %v19092_v37 }
 0xa57   :  { %18037 = vmatmul.mubr.msk.f32.vlgmr.msra.gmra.mxu0 %vm171_vm0, %v21099_v45  ;;  %18039 = vmatprep.subr.mxu0 %v19092_v37 }
 0xa58   :  { %18092 = vmatmul.mubr.msk.f32.vlgmr.msra.gmra.mxu1 %vm171_vm0, %v21099_v45  ;;  %18105 = vmatprep.subr.mxu1 %v19092_v37 }
 0xa59   :  { %18040 = vmatpush3.msra.mxu0 %v15988_v54  ;;  %18106 = vmatpush3.msra.mxu1 %v21040_v4  ;;  %v21404_v4 = vld [vmem:[%s22829_s4 + $0x450] sm:$0xff] }
 0xa5a   :  { %18041 = vmatprep.subr.mxu0 %v19092_v37  ;;  %18107 = vmatprep.subr.mxu1 %v19092_v37 }
 0xa5b   :  { %18042 = vmatpush3.msra.mxu0 %v15987_v24  ;;  %18108 = vmatpush3.msra.mxu1 %v21050_v9  ;;  %v21423_v9 = vld [vmem:[%s22829_s4 + $0x440] sm:$0xff] }
 0xa5c   :  { %18043 = vmatprep.subr.mxu0 %v19092_v37  ;;  %18109 = vmatprep.subr.mxu1 %v19092_v37 }
 0xa5d   :  { %18044 = vmatpush3.msra.mxu0 %v15986_v40  ;;  %18110 = vmatpush3.msra.mxu1 %v21064_v18  ;;  %v21448_v18 = vld [vmem:[%s22829_s4 + $0x490] sm:$0xff] }
 0xa5e   :  { %18045 = vmatprep.subr.mxu0 %v19092_v37  ;;  %18111 = vmatprep.subr.mxu1 %v19092_v37 }
 0xa5f   :  { %18046 = vmatpush3.msra.mxu0 %v15985_v58  ;;  %18047 = vmatprep.mubr.msk.f32.mxu0 %vm19093_vm1, %v19092_v37 }
 0xa60   :  { %18112 = vmatpush3.msra.mxu1 %v21078_v30  ;;  %18113 = vmatprep.mubr.msk.f32.mxu1 %vm19093_vm1, %v19092_v37  ;;  %v21467_v30 = vld [vmem:[%s22829_s4 + $0x480] sm:$0xff] }
 0xa61   :  { %18048 = vmatmul.mubr.msk.f32.vlgmr.msra.gmra.mxu0 %vm171_vm0, %v21099_v45  ;;  %18050 = vmatprep.subr.mxu0 %v19092_v37 }
 0xa62   :  { %18114 = vmatmul.mubr.msk.f32.vlgmr.msra.gmra.mxu1 %vm171_vm0, %v21193_v13  ;;  %18127 = vmatprep.subr.mxu1 %v19092_v37 }
 0xa63   :  { %18051 = vmatpush3.msra.mxu0 %v21201_v47  ;;  %18128 = vmatpush3.msra.mxu1 %v15988_v54  ;;  %v21709_v54 = vld [vmem:[%s22829_s4 + $0x518] sm:$0xff] }
 0xa64   :  { %18052 = vmatprep.subr.mxu0 %v19092_v37  ;;  %18129 = vmatprep.subr.mxu1 %v19092_v37 }
 0xa65   :  { %18053 = vmatpush3.msra.mxu0 %v21212_v48  ;;  %18130 = vmatpush3.msra.mxu1 %v15987_v24  ;;  %v21733_v24 = vld [vmem:[%s22829_s4 + $0x508] sm:$0xff] }
 0xa66   :  { %18054 = vmatprep.subr.mxu0 %v19092_v37  ;;  %18131 = vmatprep.subr.mxu1 %v19092_v37 }
 0xa67   :  { %18055 = vmatpush3.msra.mxu0 %v21220_v60  ;;  %18132 = vmatpush3.msra.mxu1 %v15986_v40  ;;  %v21742_v40 = vld [vmem:[%s22829_s4 + $0x500] sm:$0xff] }
 0xa68   :  { %18056 = vmatprep.subr.mxu0 %v19092_v37  ;;  %18133 = vmatprep.subr.mxu1 %v19092_v37 }
 0xa69   :  { %18057 = vmatpush3.msra.mxu0 %v21228_v63  ;;  %18058 = vmatprep.mubr.msk.f32.mxu0 %vm19093_vm1, %v19092_v37 }
 0xa6a   :  { %18134 = vmatpush3.msra.mxu1 %v15985_v58  ;;  %18135 = vmatprep.mubr.msk.f32.mxu1 %vm19093_vm1, %v19092_v37  ;;  %v21766_v58 = vld [vmem:[%s22829_s4 + $0x550] sm:$0xff] }
 0xa6b   :  { %18059 = vmatmul.mubr.msk.f32.vlgmr.msra.gmra.mxu0 %vm171_vm0, %v21099_v45  ;;  %18072 = vmatprep.subr.mxu0 %v19092_v37 }
 0xa6c   :  { %18136 = vmatmul.mubr.msk.f32.vlgmr.msra.gmra.mxu1 %vm171_vm0, %v21193_v13  ;;  %18149 = vmatprep.subr.mxu1 %v19092_v37 }
 0xa6d   :  { %18073 = vmatpush3.msra.mxu0 %v21241_v23  ;;  %18150 = vmatpush3.msra.mxu1 %v21045_v8  ;;  %v21414_v8 = vld [vmem:[%s22829_s4 + $0x448] sm:$0xff] }
 0xa6e   :  { %18074 = vmatprep.subr.mxu0 %v19092_v37  ;;  %18151 = vmatprep.subr.mxu1 %v19092_v37 }
 0xa6f   :  { %18075 = vmatpush3.msra.mxu0 %v21252_v0  ;;  %18152 = vmatpush3.msra.mxu1 %v21057_v14  ;;  %v21434_v14 = vld [vmem:[%s22829_s4 + $0x498] sm:$0xff] }
 0xa70   :  { %18076 = vmatprep.subr.mxu0 %v19092_v37  ;;  %18153 = vmatprep.subr.mxu1 %v19092_v37 }
 0xa71   :  { %18077 = vmatpush3.msra.mxu0 %v21261_v22  ;;  %18154 = vmatpush3.msra.mxu1 %v21069_v16  ;;  %v21458_v16 = vld [vmem:[%s22829_s4 + $0x488] sm:$0xff] }
 0xa72   :  { %18078 = vmatprep.subr.mxu0 %v19092_v37  ;;  %18155 = vmatprep.subr.mxu1 %v19092_v37 }
 0xa73   :  { %18079 = vmatpush3.msra.mxu0 %v21270_v62  ;;  %18080 = vmatprep.mubr.msk.f32.mxu0 %vm19093_vm1, %v19092_v37 }
 0xa74   :  { %18156 = vmatpush3.msra.mxu1 %v21083_v19  ;;  %18157 = vmatprep.mubr.msk.f32.mxu1 %vm19093_vm1, %v19092_v37  ;;  %v21478_v19 = vld [vmem:[%s22829_s4 + $0x4d8] sm:$0xff] }
 0xa75   :  { %18081 = vmatmul.mubr.msk.f32.vlgmr.msra.gmra.mxu0 %vm171_vm0, %v21099_v45  ;;  %18094 = vmatprep.subr.mxu0 %v19092_v37 }
 0xa76   :  { %18158 = vmatmul.mubr.msk.f32.vlgmr.msra.gmra.mxu1 %vm171_vm0, %v21193_v13  ;;  %18171 = vmatprep.subr.mxu1 %v19092_v37 }
 0xa77   :  { %18095 = vmatpush3.msra.mxu0 %v21285_v59  ;;  %18172 = vmatpush3.msra.mxu1 %v21109_v3  ;;  %v21619_v3 = vld [vmem:[%s22829_s4 + $0x4b8] sm:$0xff] }
 0xa78   :  { %18096 = vmatprep.subr.mxu0 %v19092_v37  ;;  %18173 = vmatprep.subr.mxu1 %v19092_v37 }
 0xa79   :  { %18097 = vmatpush3.msra.mxu0 %v21296_v15  ;;  %18174 = vmatpush3.msra.mxu1 %v21123_v61  ;;  %v21645_v61 = vld [vmem:[%s22829_s4 + $0x4a8] sm:$0xff] }
 0xa7a   :  { %18098 = vmatprep.subr.mxu0 %v19092_v37  ;;  %18175 = vmatprep.subr.mxu1 %v19092_v37 }
 0xa7b   :  { %18099 = vmatpush3.msra.mxu0 %v21305_v52  ;;  %18176 = vmatpush3.msra.mxu1 %v21137_v10  ;;  %v21663_v10 = vld [vmem:[%s22829_s4 + $0x4f8] sm:$0xff] }
 0xa7c   :  { %18100 = vmatprep.subr.mxu0 %v19092_v37  ;;  %18177 = vmatprep.subr.mxu1 %v19092_v37 }
 0xa7d   :  { %18101 = vmatpush3.msra.mxu0 %v21319_v51  ;;  %18102 = vmatprep.mubr.msk.f32.mxu0 %vm19093_vm1, %v19092_v37 }
 0xa7e   :  { %18178 = vmatpush3.msra.mxu1 %v21153_v53  ;;  %18179 = vmatprep.mubr.msk.f32.mxu1 %vm19093_vm1, %v19092_v37  ;;  %v21689_v53 = vld [vmem:[%s22829_s4 + $0x4e8] sm:$0xff] }
 0xa7f   :  { %18103 = vmatmul.mubr.msk.f32.vlgmr.msra.gmra.mxu0 %vm171_vm0, %v21099_v45  ;;  %18116 = vmatprep.subr.mxu0 %v19092_v37  ;;  %v21601_v45 = vld [vmem:[%s22829_s4 + $0x468] sm:$0xff] }
 0xa80   :  { %18180 = vmatmul.mubr.msk.f32.vlgmr.msra.gmra.mxu1 %vm171_vm0, %v21193_v13  ;;  %18193 = vmatprep.subr.mxu1 %v21338_v57 }
 0xa81   :  { %18117 = vmatpush3.msra.mxu0 %v21104_v46  ;;  %18194 = vmatpush3.msra.mxu1 %v21338_v57  ;;  %v21610_v46 = vld [vmem:[%s22829_s4 + $0x460] sm:$0xff] }
 0xa82   :  { %18201 = vmatprep.mubr.msk.f32.mxu1 %vm171_vm0, %v21347_v38  ;;  %18118 = vmatprep.subr.mxu0 %v19092_v37 }
 0xa83   :  { %18195 = vmatprep.subr.mxu1 %v21355_v55  ;;  %18119 = vmatpush3.msra.mxu0 %v21118_v2  ;;  %v21634_v2 = vld [vmem:[%s22829_s4 + $0x4b0] sm:$0xff] }
 0xa84   :  { %18196 = vmatpush3.msra.mxu1 %v21355_v55  ;;  %18120 = vmatprep.subr.mxu0 %v19092_v37 }
 0xa85   :  { %18197 = vmatprep.subr.mxu1 %v21365_v31  ;;  %18121 = vmatpush3.msra.mxu0 %v21132_v49  ;;  %v21654_v49 = vld [vmem:[%s22829_s4 + $0x4a0] sm:$0xff] }
 0xa86   :  { %18198 = vmatpush3.msra.mxu1 %v21365_v31  ;;  %18122 = vmatprep.subr.mxu0 %v19092_v37 }
 0xa87   :  { %18199 = vmatprep.subr.mxu1 %v21376_v44  ;;  %18123 = vmatpush3.msra.mxu0 %v21146_v50  ;;  %v21678_v50 = vld [vmem:[%s22829_s4 + $0x4f0] sm:$0xff] }
 0xa88   :  { %18124 = vmatprep.mubr.msk.f32.mxu0 %vm19093_vm1, %v19092_v37  ;;  %18200 = vmatpush3.msra.mxu1 %v21376_v44 }
 0xa89   :  { %18125 = vmatmul.mubr.msk.f32.vlgmr.msra.gmra.mxu0 %vm171_vm0, %v21193_v13  ;;  %18138 = vmatprep.subr.mxu0 %v19092_v37 }
 0xa8a   :  { %18202 = vmatmul.mubr.msk.f32.vlgmr.msra.gmra.mxu1 %vm171_vm0, %v21390_v5  ;;  %18215 = vmatprep.subr.mxu1 %v21387_v43 }
 0xa8b   :  { %18139 = vmatpush3.msra.mxu0 %v21201_v47  ;;  %18216 = vmatpush3.msra.mxu1 %v21387_v43  ;;  %v21786_v47 = vld [vmem:[%s22829_s4 + $0x540] sm:$0xff] }
 0xa8c   :  { %18223 = vmatprep.mubr.msk.f32.mxu1 %vm171_vm0, %v21347_v38  ;;  %18140 = vmatprep.subr.mxu0 %v19092_v37 }
 0xa8d   :  { %18217 = vmatprep.subr.mxu1 %v21404_v4  ;;  %18141 = vmatpush3.msra.mxu0 %v21212_v48  ;;  %v21797_v48 = vld [vmem:[%s22829_s4 + $0x598] sm:$0xff] }
 0xa8e   :  { %18218 = vmatpush3.msra.mxu1 %v21404_v4  ;;  %18142 = vmatprep.subr.mxu0 %v19092_v37 }
 0xa8f   :  { %18219 = vmatprep.subr.mxu1 %v21414_v8  ;;  %18143 = vmatpush3.msra.mxu0 %v21220_v60  ;;  %v21810_v60 = vld [vmem:[%s22829_s4 + $0x590] sm:$0xff] }
 0xa90   :  { %18220 = vmatpush3.msra.mxu1 %v21414_v8  ;;  %18144 = vmatprep.subr.mxu0 %v19092_v37 }
 0xa91   :  { %18221 = vmatprep.subr.mxu1 %v21423_v9  ;;  %18145 = vmatpush3.msra.mxu0 %v21228_v63  ;;  %v21821_v63 = vld [vmem:[%s22829_s4 + $0x588] sm:$0xff] }
 0xa92   :  { %18146 = vmatprep.mubr.msk.f32.mxu0 %vm19093_vm1, %v19092_v37  ;;  %18222 = vmatpush3.msra.mxu1 %v21423_v9 }
 0xa93   :  { %18147 = vmatmul.mubr.msk.f32.vlgmr.msra.gmra.mxu0 %vm171_vm0, %v21193_v13  ;;  %18160 = vmatprep.subr.mxu0 %v19092_v37 }
 0xa94   :  { %18224 = vmatmul.mubr.msk.f32.vlgmr.msra.gmra.mxu1 %vm171_vm0, %v21390_v5  ;;  %18237 = vmatprep.subr.mxu1 %v21434_v14 }
 0xa95   :  { %18161 = vmatpush3.msra.mxu0 %v21241_v23  ;;  %18238 = vmatpush3.msra.mxu1 %v21434_v14  ;;  %v21830_v23 = vld [vmem:[%s22829_s4 + $0x580] sm:$0xff] }
 0xa96   :  { %18245 = vmatprep.mubr.msk.f32.mxu1 %vm171_vm0, %v21347_v38  ;;  %18162 = vmatprep.subr.mxu0 %v19092_v37 }
 0xa97   :  { %18239 = vmatprep.subr.mxu1 %v21448_v18  ;;  %18163 = vmatpush3.msra.mxu0 %v21252_v0  ;;  %v21841_v0 = vld [vmem:[%s22829_s4 + $0x5d8] sm:$0xff] }
 0xa98   :  { %18240 = vmatpush3.msra.mxu1 %v21448_v18  ;;  %18164 = vmatprep.subr.mxu0 %v19092_v37 }
 0xa99   :  { %18241 = vmatprep.subr.mxu1 %v21458_v16  ;;  %18165 = vmatpush3.msra.mxu0 %v21261_v22  ;;  %v21854_v22 = vld [vmem:[%s22829_s4 + $0x5d0] sm:$0xff] }
 0xa9a   :  { %18242 = vmatpush3.msra.mxu1 %v21458_v16  ;;  %18166 = vmatprep.subr.mxu0 %v19092_v37 }
 0xa9b   :  { %18243 = vmatprep.subr.mxu1 %v21467_v30  ;;  %18167 = vmatpush3.msra.mxu0 %v21270_v62  ;;  %v21865_v62 = vld [vmem:[%s22829_s4 + $0x5c8] sm:$0xff] }
 0xa9c   :  { %18168 = vmatprep.mubr.msk.f32.mxu0 %vm19093_vm1, %v19092_v37  ;;  %18244 = vmatpush3.msra.mxu1 %v21467_v30 }
 0xa9d   :  { %18169 = vmatmul.mubr.msk.f32.vlgmr.msra.gmra.mxu0 %vm171_vm0, %v21193_v13  ;;  %18182 = vmatprep.subr.mxu0 %v19092_v37 }
 0xa9e   :  { %18246 = vmatmul.mubr.msk.f32.vlgmr.msra.gmra.mxu1 %vm171_vm0, %v21390_v5  ;;  %18259 = vmatprep.subr.mxu1 %v21478_v19 }
 0xa9f   :  { %18183 = vmatpush3.msra.mxu0 %v21285_v59  ;;  %18260 = vmatpush3.msra.mxu1 %v21478_v19  ;;  %v21874_v59 = vld [vmem:[%s22829_s4 + $0x5c0] sm:$0xff] }
 0xaa0   :  { %18267 = vmatprep.mubr.msk.f32.mxu1 %vm171_vm0, %v21347_v38  ;;  %18184 = vmatprep.subr.mxu0 %v19092_v37 }
 0xaa1   :  { %18261 = vmatprep.subr.mxu1 %v21492_v12  ;;  %18185 = vmatpush3.msra.mxu0 %v21296_v15  ;;  %v21883_v15 = vld [vmem:[%s22829_s4 + $0x538] sm:$0xff] }
 0xaa2   :  { %18262 = vmatpush3.msra.mxu1 %v21492_v12  ;;  %18186 = vmatprep.subr.mxu0 %v19092_v37 }
 0xaa3   :  { %18263 = vmatprep.subr.mxu1 %v21502_v25  ;;  %18187 = vmatpush3.msra.mxu0 %v21305_v52  ;;  %v21898_v52 = vld [vmem:[%s22829_s4 + $0x530] sm:$0xff] }
 0xaa4   :  { %18264 = vmatpush3.msra.mxu1 %v21502_v25  ;;  %18188 = vmatprep.subr.mxu0 %v19092_v37 }
 0xaa5   :  { %18265 = vmatprep.subr.mxu1 %v21511_v27  ;;  %18189 = vmatpush3.msra.mxu0 %v21319_v51  ;;  %v21918_v51 = vld [vmem:[%s22829_s4 + $0x520] sm:$0xff] }
 0xaa6   :  { %18190 = vmatprep.mubr.msk.f32.mxu0 %vm19093_vm1, %v19092_v37  ;;  %18266 = vmatpush3.msra.mxu1 %v21511_v27 }
 0xaa7   :  { %18191 = vmatmul.mubr.msk.f32.vlgmr.msra.gmra.mxu0 %vm171_vm0, %v21193_v13  ;;  %18204 = vmatprep.subr.mxu0 %v21522_v33  ;;  %v21777_v13 = vld [vmem:[%s22829_s4 + $0x548] sm:$0xff] }
 0xaa8   :  { %18268 = vmatmul.mubr.msk.f32.vlgmr.msra.gmra.mxu1 %vm171_vm0, %v21390_v5  ;;  %18281 = vmatprep.subr.mxu1 %v21338_v57 }
 0xaa9   :  { %18205 = vmatpush3.msra.mxu0 %v21522_v33  ;;  %18212 = vmatprep.mubr.msk.f32.mxu0 %vm171_vm0, %v21347_v38 }
 0xaaa   :  { %18282 = vmatpush3.msra.mxu1 %v21338_v57  ;;  %18289 = vmatprep.mubr.msk.f32.mxu1 %vm171_vm0, %v21533_v6  ;;  %v21953_v57 = vld [vmem:[%s22829_s4 + $0x568] sm:$0xff] }
 0xaab   :  { %18206 = vmatprep.subr.mxu0 %v21541_v34  ;;  %18283 = vmatprep.subr.mxu1 %v21355_v55 }
 0xaac   :  { %18207 = vmatpush3.msra.mxu0 %v21541_v34  ;;  %18284 = vmatpush3.msra.mxu1 %v21355_v55  ;;  %v21962_v55 = vld [vmem:[%s22829_s4 + $0x560] sm:$0xff] }
 0xaad   :  { %18208 = vmatprep.subr.mxu0 %v21552_v36  ;;  %18285 = vmatprep.subr.mxu1 %v21365_v31 }
 0xaae   :  { %18209 = vmatpush3.msra.mxu0 %v21552_v36  ;;  %18286 = vmatpush3.msra.mxu1 %v21365_v31  ;;  %v21971_v31 = vld [vmem:[%s22829_s4 + $0x5b8] sm:$0xff] }
 0xaaf   :  { %18210 = vmatprep.subr.mxu0 %v21563_v35  ;;  %18287 = vmatprep.subr.mxu1 %v21376_v44 }
 0xab0   :  { %18211 = vmatpush3.msra.mxu0 %v21563_v35  ;;  %18288 = vmatpush3.msra.mxu1 %v21376_v44  ;;  %v21997_v44 = vld [vmem:[%s22829_s4 + $0x5a8] sm:$0xff] }
 0xab1   :  { %18213 = vmatmul.mubr.msk.f32.vlgmr.msra.gmra.mxu0 %vm171_vm0, %v21390_v5  ;;  %18226 = vmatprep.subr.mxu0 %v21572_v26 }
 0xab2   :  { %18290 = vmatmul.mubr.msk.f32.vlgmr.msra.gmra.mxu1 %vm171_vm0, %v21577_v17  ;;  %18303 = vmatprep.subr.mxu1 %v21387_v43 }
 0xab3   :  { %18227 = vmatpush3.msra.mxu0 %v21572_v26  ;;  %18234 = vmatprep.mubr.msk.f32.mxu0 %vm171_vm0, %v21347_v38 }
 0xab4   :  { %18304 = vmatpush3.msra.mxu1 %v21387_v43  ;;  %18311 = vmatprep.mubr.msk.f32.mxu1 %vm171_vm0, %v21533_v6 }
 0xab5   :  { %18228 = vmatprep.subr.mxu0 %v21590_v41  ;;  %18305 = vmatprep.subr.mxu1 %v21404_v4 }
 0xab6   :  { %18229 = vmatpush3.msra.mxu0 %v21590_v41  ;;  %18306 = vmatpush3.msra.mxu1 %v21404_v4 }
 0xab7   :  { %18230 = vmatprep.subr.mxu0 %v21601_v45  ;;  %18307 = vmatprep.subr.mxu1 %v21414_v8 }
 0xab8   :  { %18231 = vmatpush3.msra.mxu0 %v21601_v45  ;;  %18308 = vmatpush3.msra.mxu1 %v21414_v8  ;;  %v22010_v8 = vld [vmem:[%s22829_s4 + $0x5a0] sm:$0xff] }
 0xab9   :  { %18232 = vmatprep.subr.mxu0 %v21610_v46  ;;  %18309 = vmatprep.subr.mxu1 %v21423_v9 }
 0xaba   :  { %18233 = vmatpush3.msra.mxu0 %v21610_v46  ;;  %18310 = vmatpush3.msra.mxu1 %v21423_v9 }
 0xabb   :  { %18235 = vmatmul.mubr.msk.f32.vlgmr.msra.gmra.mxu0 %vm171_vm0, %v21390_v5  ;;  %18248 = vmatprep.subr.mxu0 %v21619_v3 }
 0xabc   :  { %18312 = vmatmul.mubr.msk.f32.vlgmr.msra.gmra.mxu1 %vm171_vm0, %v21577_v17  ;;  %18325 = vmatprep.subr.mxu1 %v21434_v14 }
 0xabd   :  { %18249 = vmatpush3.msra.mxu0 %v21619_v3  ;;  %18256 = vmatprep.mubr.msk.f32.mxu0 %vm171_vm0, %v21347_v38 }
 0xabe   :  { %18326 = vmatpush3.msra.mxu1 %v21434_v14  ;;  %18333 = vmatprep.mubr.msk.f32.mxu1 %vm171_vm0, %v21533_v6 }
 0xabf   :  { %18250 = vmatprep.subr.mxu0 %v21634_v2  ;;  %18327 = vmatprep.subr.mxu1 %v21448_v18 }
 0xac0   :  { %18251 = vmatpush3.msra.mxu0 %v21634_v2  ;;  %18328 = vmatpush3.msra.mxu1 %v21448_v18  ;;  %v22019_v18 = vld [vmem:[%s22829_s4 + $0x5f8] sm:$0xff] }
 0xac1   :  { %18252 = vmatprep.subr.mxu0 %v21645_v61  ;;  %18329 = vmatprep.subr.mxu1 %v21458_v16 }
 0xac2   :  { %18253 = vmatpush3.msra.mxu0 %v21645_v61  ;;  %18330 = vmatpush3.msra.mxu1 %v21458_v16  ;;  %v22034_v16 = vld [vmem:[%s22829_s4 + $0x5f0] sm:$0xff] }
 0xac3   :  { %18254 = vmatprep.subr.mxu0 %v21654_v49  ;;  %18331 = vmatprep.subr.mxu1 %v21467_v30 }
 0xac4   :  { %18255 = vmatpush3.msra.mxu0 %v21654_v49  ;;  %18332 = vmatpush3.msra.mxu1 %v21467_v30 }
 0xac5   :  { %18257 = vmatmul.mubr.msk.f32.vlgmr.msra.gmra.mxu0 %vm171_vm0, %v21390_v5  ;;  %18270 = vmatprep.subr.mxu0 %v21663_v10 }
 0xac6   :  { %18334 = vmatmul.mubr.msk.f32.vlgmr.msra.gmra.mxu1 %vm171_vm0, %v21577_v17  ;;  %18347 = vmatprep.subr.mxu1 %v21478_v19 }
 0xac7   :  { %18271 = vmatpush3.msra.mxu0 %v21663_v10  ;;  %18278 = vmatprep.mubr.msk.f32.mxu0 %vm171_vm0, %v21347_v38 }
 0xac8   :  { %18348 = vmatpush3.msra.mxu1 %v21478_v19  ;;  %18355 = vmatprep.mubr.msk.f32.mxu1 %vm171_vm0, %v21533_v6  ;;  %v22047_v19 = vld [vmem:[%s22829_s4 + $0x5e8] sm:$0xff] }
 0xac9   :  { %18272 = vmatprep.subr.mxu0 %v21678_v50  ;;  %18349 = vmatprep.subr.mxu1 %v21492_v12 }
 0xaca   :  { %18273 = vmatpush3.msra.mxu0 %v21678_v50  ;;  %18350 = vmatpush3.msra.mxu1 %v21492_v12 }
 0xacb   :  { %18274 = vmatprep.subr.mxu0 %v21689_v53  ;;  %18351 = vmatprep.subr.mxu1 %v21502_v25 }
 0xacc   :  { %18275 = vmatpush3.msra.mxu0 %v21689_v53  ;;  %18352 = vmatpush3.msra.mxu1 %v21502_v25 }
 0xacd   :  { %18276 = vmatprep.subr.mxu0 %v21698_v39  ;;  %18353 = vmatprep.subr.mxu1 %v21511_v27 }
 0xace   :  { %18277 = vmatpush3.msra.mxu0 %v21698_v39  ;;  %18354 = vmatpush3.msra.mxu1 %v21511_v27 }
 0xacf   :  { %18279 = vmatmul.mubr.msk.f32.vlgmr.msra.gmra.mxu0 %vm171_vm0, %v21390_v5  ;;  %18292 = vmatprep.subr.mxu0 %v21522_v33 }
 0xad0   :  { %18356 = vmatmul.mubr.msk.f32.vlgmr.msra.gmra.mxu1 %vm171_vm0, %v21577_v17  ;;  %18369 = vmatprep.subr.mxu1 %v21709_v54 }
 0xad1   :  { %18293 = vmatpush3.msra.mxu0 %v21522_v33  ;;  %18300 = vmatprep.mubr.msk.f32.mxu0 %vm171_vm0, %v21533_v6 }
 0xad2   :  { %18370 = vmatpush3.msra.mxu1 %v21709_v54  ;;  %18377 = vmatprep.mubr.msk.f32.mxu1 %vm171_vm0, %v21347_v38 }
 0xad3   :  { %18294 = vmatprep.subr.mxu0 %v21541_v34  ;;  %18371 = vmatprep.subr.mxu1 %v21722_v21 }
 0xad4   :  { %18295 = vmatpush3.msra.mxu0 %v21541_v34  ;;  %18372 = vmatpush3.msra.mxu1 %v21722_v21 }
 0xad5   :  { %18296 = vmatprep.subr.mxu0 %v21552_v36  ;;  %18373 = vmatprep.subr.mxu1 %v21733_v24 }
 0xad6   :  { %18297 = vmatpush3.msra.mxu0 %v21552_v36  ;;  %18374 = vmatpush3.msra.mxu1 %v21733_v24 }
 0xad7   :  { %18298 = vmatprep.subr.mxu0 %v21563_v35  ;;  %18375 = vmatprep.subr.mxu1 %v21742_v40 }
 0xad8   :  { %18299 = vmatpush3.msra.mxu0 %v21563_v35  ;;  %18376 = vmatpush3.msra.mxu1 %v21742_v40 }
 0xad9   :  { %18301 = vmatmul.mubr.msk.f32.vlgmr.msra.gmra.mxu0 %vm171_vm0, %v21577_v17  ;;  %18314 = vmatprep.subr.mxu0 %v21572_v26 }
 0xada   :  { %18378 = vmatmul.mubr.msk.f32.vlgmr.msra.gmra.mxu1 %vm171_vm0, %v21390_v5  ;;  %18391 = vmatprep.subr.mxu1 %v21753_v42 }
 0xadb   :  { %18315 = vmatpush3.msra.mxu0 %v21572_v26  ;;  %18322 = vmatprep.mubr.msk.f32.mxu0 %vm171_vm0, %v21533_v6 }
 0xadc   :  { %18392 = vmatpush3.msra.mxu1 %v21753_v42  ;;  %18399 = vmatprep.mubr.msk.f32.mxu1 %vm171_vm0, %v21347_v38 }
 0xadd   :  { %18316 = vmatprep.subr.mxu0 %v21590_v41  ;;  %18393 = vmatprep.subr.mxu1 %v21766_v58 }
 0xade   :  { %18317 = vmatpush3.msra.mxu0 %v21590_v41  ;;  %18394 = vmatpush3.msra.mxu1 %v21766_v58 }
 0xadf   :  { %18318 = vmatprep.subr.mxu0 %v21601_v45  ;;  %18395 = vmatprep.subr.mxu1 %v21777_v13 }
 0xae0   :  { %18319 = vmatpush3.msra.mxu0 %v21601_v45  ;;  %18396 = vmatpush3.msra.mxu1 %v21777_v13 }
 0xae1   :  { %18320 = vmatprep.subr.mxu0 %v21610_v46  ;;  %18397 = vmatprep.subr.mxu1 %v21786_v47 }
 0xae2   :  { %18321 = vmatpush3.msra.mxu0 %v21610_v46  ;;  %18398 = vmatpush3.msra.mxu1 %v21786_v47 }
 0xae3   :  { %18323 = vmatmul.mubr.msk.f32.vlgmr.msra.gmra.mxu0 %vm171_vm0, %v21577_v17  ;;  %18336 = vmatprep.subr.mxu0 %v21619_v3 }
 0xae4   :  { %18400 = vmatmul.mubr.msk.f32.vlgmr.msra.gmra.mxu1 %vm171_vm0, %v21390_v5  ;;  %18413 = vmatprep.subr.mxu1 %v21797_v48 }
 0xae5   :  { %18337 = vmatpush3.msra.mxu0 %v21619_v3  ;;  %18344 = vmatprep.mubr.msk.f32.mxu0 %vm171_vm0, %v21533_v6 }
 0xae6   :  { %18414 = vmatpush3.msra.mxu1 %v21797_v48  ;;  %18421 = vmatprep.mubr.msk.f32.mxu1 %vm171_vm0, %v21347_v38 }
 0xae7   :  { %18338 = vmatprep.subr.mxu0 %v21634_v2  ;;  %18415 = vmatprep.subr.mxu1 %v21810_v60 }
 0xae8   :  { %18339 = vmatpush3.msra.mxu0 %v21634_v2  ;;  %18416 = vmatpush3.msra.mxu1 %v21810_v60 }
 0xae9   :  { %18340 = vmatprep.subr.mxu0 %v21645_v61  ;;  %18417 = vmatprep.subr.mxu1 %v21821_v63 }
 0xaea   :  { %18341 = vmatpush3.msra.mxu0 %v21645_v61  ;;  %18418 = vmatpush3.msra.mxu1 %v21821_v63 }
 0xaeb   :  { %18342 = vmatprep.subr.mxu0 %v21654_v49  ;;  %18419 = vmatprep.subr.mxu1 %v21830_v23 }
 0xaec   :  { %18343 = vmatpush3.msra.mxu0 %v21654_v49  ;;  %18420 = vmatpush3.msra.mxu1 %v21830_v23 }
 0xaed   :  { %18345 = vmatmul.mubr.msk.f32.vlgmr.msra.gmra.mxu0 %vm171_vm0, %v21577_v17  ;;  %18358 = vmatprep.subr.mxu0 %v21663_v10 }
 0xaee   :  { %18422 = vmatmul.mubr.msk.f32.vlgmr.msra.gmra.mxu1 %vm171_vm0, %v21390_v5  ;;  %18435 = vmatprep.subr.mxu1 %v21841_v0 }
 0xaef   :  { %18359 = vmatpush3.msra.mxu0 %v21663_v10  ;;  %18366 = vmatprep.mubr.msk.f32.mxu0 %vm171_vm0, %v21533_v6 }
 0xaf0   :  { %18436 = vmatpush3.msra.mxu1 %v21841_v0  ;;  %18443 = vmatprep.mubr.msk.f32.mxu1 %vm171_vm0, %v21347_v38 }
 0xaf1   :  { %18360 = vmatprep.subr.mxu0 %v21678_v50  ;;  %18437 = vmatprep.subr.mxu1 %v21854_v22 }
 0xaf2   :  { %18361 = vmatpush3.msra.mxu0 %v21678_v50  ;;  %18438 = vmatpush3.msra.mxu1 %v21854_v22 }
 0xaf3   :  { %18362 = vmatprep.subr.mxu0 %v21689_v53  ;;  %18439 = vmatprep.subr.mxu1 %v21865_v62 }
 0xaf4   :  { %18363 = vmatpush3.msra.mxu0 %v21689_v53  ;;  %18440 = vmatpush3.msra.mxu1 %v21865_v62 }
 0xaf5   :  { %18364 = vmatprep.subr.mxu0 %v21698_v39  ;;  %18441 = vmatprep.subr.mxu1 %v21874_v59 }
 0xaf6   :  { %18365 = vmatpush3.msra.mxu0 %v21698_v39  ;;  %18442 = vmatpush3.msra.mxu1 %v21874_v59 }
 0xaf7   :  { %18367 = vmatmul.mubr.msk.f32.vlgmr.msra.gmra.mxu0 %vm171_vm0, %v21577_v17  ;;  %18380 = vmatprep.subr.mxu0 %v21883_v15 }
 0xaf8   :  { %18444 = vmatmul.mubr.msk.f32.vlgmr.msra.gmra.mxu1 %vm171_vm0, %v21390_v5  ;;  %18457 = vmatprep.subr.mxu1 %v21709_v54 }
 0xaf9   :  { %18381 = vmatpush3.msra.mxu0 %v21883_v15  ;;  %18388 = vmatprep.mubr.msk.f32.mxu0 %vm171_vm0, %v21347_v38 }
 0xafa   :  { %18458 = vmatpush3.msra.mxu1 %v21709_v54  ;;  %18465 = vmatprep.mubr.msk.f32.mxu1 %vm171_vm0, %v21533_v6 }
 0xafb   :  { %18382 = vmatprep.subr.mxu0 %v21898_v52  ;;  %18459 = vmatprep.subr.mxu1 %v21722_v21 }
 0xafc   :  { %18383 = vmatpush3.msra.mxu0 %v21898_v52  ;;  %18460 = vmatpush3.msra.mxu1 %v21722_v21 }
 0xafd   :  { %18384 = vmatprep.subr.mxu0 %v21909_v11  ;;  %18461 = vmatprep.subr.mxu1 %v21733_v24 }
 0xafe   :  { %18385 = vmatpush3.msra.mxu0 %v21909_v11  ;;  %18462 = vmatpush3.msra.mxu1 %v21733_v24 }
 0xaff   :  { %18386 = vmatprep.subr.mxu0 %v21918_v51  ;;  %18463 = vmatprep.subr.mxu1 %v21742_v40 }
 0xb00   :  { %18387 = vmatpush3.msra.mxu0 %v21918_v51  ;;  %18464 = vmatpush3.msra.mxu1 %v21742_v40 }
 0xb01   :  { %18389 = vmatmul.mubr.msk.f32.vlgmr.msra.gmra.mxu0 %vm171_vm0, %v21390_v5  ;;  %18402 = vmatprep.subr.mxu0 %v21927_v1 }
 0xb02   :  { %18466 = vmatmul.mubr.msk.f32.vlgmr.msra.gmra.mxu1 %vm171_vm0, %v21577_v17  ;;  %18479 = vmatprep.subr.mxu1 %v21753_v42 }
 0xb03   :  { %18403 = vmatpush3.msra.mxu0 %v21927_v1  ;;  %18410 = vmatprep.mubr.msk.f32.mxu0 %vm171_vm0, %v21347_v38 }
 0xb04   :  { %18480 = vmatpush3.msra.mxu1 %v21753_v42  ;;  %18487 = vmatprep.mubr.msk.f32.mxu1 %vm171_vm0, %v21533_v6 }
 0xb05   :  { %18404 = vmatprep.subr.mxu0 %v21942_v29  ;;  %18481 = vmatprep.subr.mxu1 %v21766_v58 }
 0xb06   :  { %18405 = vmatpush3.msra.mxu0 %v21942_v29  ;;  %18482 = vmatpush3.msra.mxu1 %v21766_v58 }
 0xb07   :  { %18406 = vmatprep.subr.mxu0 %v21953_v57  ;;  %18483 = vmatprep.subr.mxu1 %v21777_v13 }
 0xb08   :  { %18407 = vmatpush3.msra.mxu0 %v21953_v57  ;;  %18484 = vmatpush3.msra.mxu1 %v21777_v13 }
 0xb09   :  { %18408 = vmatprep.subr.mxu0 %v21962_v55  ;;  %18485 = vmatprep.subr.mxu1 %v21786_v47 }
 0xb0a   :  { %18409 = vmatpush3.msra.mxu0 %v21962_v55  ;;  %18486 = vmatpush3.msra.mxu1 %v21786_v47 }
 0xb0b   :  { %18411 = vmatmul.mubr.msk.f32.vlgmr.msra.gmra.mxu0 %vm171_vm0, %v21390_v5  ;;  %18424 = vmatprep.subr.mxu0 %v21971_v31 }
 0xb0c   :  { %18488 = vmatmul.mubr.msk.f32.vlgmr.msra.gmra.mxu1 %vm171_vm0, %v21577_v17  ;;  %18501 = vmatprep.subr.mxu1 %v21797_v48 }
 0xb0d   :  { %18425 = vmatpush3.msra.mxu0 %v21971_v31  ;;  %18432 = vmatprep.mubr.msk.f32.mxu0 %vm171_vm0, %v21347_v38 }
 0xb0e   :  { %18502 = vmatpush3.msra.mxu1 %v21797_v48  ;;  %18509 = vmatprep.mubr.msk.f32.mxu1 %vm171_vm0, %v21533_v6  ;;  %v21999_v43 = vpop.f32.mrf.mxu0  ;;  %v22001_v4 = vpop.f32.mrf.mxu1 }
 0xb0f   :  { %18426 = vmatprep.subr.mxu0 %v21986_v56  ;;  %18503 = vmatprep.subr.mxu1 %v21810_v60  ;;  %v9213_v39 = vmul.f32 0.5, %v21999_v43 }
 0xb10   :  { %18427 = vmatpush3.msra.mxu0 %v21986_v56  ;;  %18504 = vmatpush3.msra.mxu1 %v21810_v60  ;;  %v18027_v9 = vpop.f32.mrf.mxu0  ;;  %v18071_v14 = vpop.f32.mrf.mxu1  ;;  %v9217_v60 = vmul.f32 0.5, %v22001_v4 }
 0xb11   :  { %18428 = vmatprep.subr.mxu0 %v21997_v44  ;;  %18505 = vmatprep.subr.mxu1 %v21821_v63 }
 0xb12   :  { %18429 = vmatpush3.msra.mxu0 %v21997_v44  ;;  %18506 = vmatpush3.msra.mxu1 %v21821_v63 }
 0xb13   :  { %18430 = vmatprep.subr.mxu0 %v22010_v8  ;;  %18507 = vmatprep.subr.mxu1 %v21830_v23 }
 0xb14   :  { %18431 = vmatpush3.msra.mxu0 %v22010_v8  ;;  %18508 = vmatpush3.msra.mxu1 %v21830_v23 }
 0xb15   :  { %18433 = vmatmul.mubr.msk.f32.vlgmr.msra.gmra.mxu0 %vm171_vm0, %v21390_v5  ;;  %18446 = vmatprep.subr.mxu0 %v22019_v18 }
 0xb16   :  { %18510 = vmatmul.mubr.msk.f32.vlgmr.msra.gmra.mxu1 %vm171_vm0, %v21577_v17  ;;  %18523 = vmatprep.subr.mxu1 %v21841_v0 }
 0xb17   :  { %18447 = vmatpush3.msra.mxu0 %v22019_v18  ;;  %18454 = vmatprep.mubr.msk.f32.mxu0 %vm171_vm0, %v21347_v38  ;;  %v22039_v30 = vpop.f32.mrf.mxu0  ;;  %v22058_v38 = vld [vmem:[%s22829_s4 + $0x5e0] sm:$0xff] }
 0xb18   :  { %18524 = vmatpush3.msra.mxu1 %v21841_v0  ;;  %18531 = vmatprep.mubr.msk.f32.mxu1 %vm171_vm0, %v21533_v6  ;;  %v22049_v12 = vpop.f32.mrf.mxu1 }
 0xb19   :  { %18448 = vmatprep.subr.mxu0 %v22034_v16  ;;  %18525 = vmatprep.subr.mxu1 %v21854_v22  ;;  %v18038_v25 = vpop.f32.mrf.mxu0 }
 0xb1a   :  { %18449 = vmatpush3.msra.mxu0 %v22034_v16  ;;  %18526 = vmatpush3.msra.mxu1 %v21854_v22  ;;  %v18093_v27 = vpop.f32.mrf.mxu1 }
 0xb1b   :  { %18450 = vmatprep.subr.mxu0 %v22047_v19  ;;  %18527 = vmatprep.subr.mxu1 %v21865_v62 }
 0xb1c   :  { %18451 = vmatpush3.msra.mxu0 %v22047_v19  ;;  %18528 = vmatpush3.msra.mxu1 %v21865_v62  ;;  %v9219_v62 = vmul.f32 0.5, %v22049_v12 }
 0xb1d   :  { %18452 = vmatprep.subr.mxu0 %v22058_v38  ;;  %18529 = vmatprep.subr.mxu1 %v21874_v59 }
 0xb1e   :  { %18453 = vmatpush3.msra.mxu0 %v22058_v38  ;;  %18530 = vmatpush3.msra.mxu1 %v21874_v59 }
 0xb1f   :  { %18455 = vmatmul.mubr.msk.f32.vlgmr.msra.gmra.mxu0 %vm171_vm0, %v21390_v5  ;;  %18468 = vmatprep.subr.mxu0 %v21883_v15 }
 0xb20   :  { %18532 = vmatmul.mubr.msk.f32.vlgmr.msra.gmra.mxu1 %vm171_vm0, %v21577_v17  ;;  %18469 = vmatpush3.msra.mxu0 %v21883_v15 }
 0xb21   :  { %18476 = vmatprep.mubr.msk.f32.mxu0 %vm171_vm0, %v21533_v6  ;;  %18470 = vmatprep.subr.mxu0 %v21898_v52  ;;  %v22077_v32 = vpop.f32.mrf.mxu0 }
 0xb22   :  { %18471 = vmatpush3.msra.mxu0 %v21898_v52  ;;  %v22080_v33 = vpop.f32.mrf.mxu1  ;;  %18545 = vmatprep.subr.mxu1 %v19092_v37  ;;  %v9215_v42 = vmul.f32 0.5, %v22077_v32 }
 0xb23   :  { %18472 = vmatprep.subr.mxu0 %v21909_v11  ;;  %v18049_v5 = vpop.f32.mrf.mxu0  ;;  %18549 = vmatprep.mubr.msk.f32.mxu1 %vm19093_vm1, %v19092_v37 }
 0xb24   :  { %18473 = vmatpush3.msra.mxu0 %v21909_v11  ;;  %v18115_v34 = vpop.f32.mrf.mxu1 }
 0xb25   :  { %18474 = vmatprep.subr.mxu0 %v21918_v51 }
 0xb26   :  { %18475 = vmatpush3.msra.mxu0 %v21918_v51  ;;  %v9214_v51 = vmul.f32 0.5, %v22039_v30 }
 0xb27   :  { %18477 = vmatmul.mubr.msk.f32.vlgmr.msra.gmra.mxu0 %vm171_vm0, %v21577_v17  ;;  %18490 = vmatprep.subr.mxu0 %v21927_v1 }
 0xb28   :  { %18491 = vmatpush3.msra.mxu0 %v21927_v1  ;;  %18498 = vmatprep.mubr.msk.f32.mxu0 %vm171_vm0, %v21533_v6  ;;  %v9221_v1 = vmul.f32 0.5, %v22080_v33 }
 0xb29   :  { %18492 = vmatprep.subr.mxu0 %v21942_v29 }
 0xb2a   :  { %18493 = vmatpush3.msra.mxu0 %v21942_v29 }
 0xb2b   :  { %18494 = vmatprep.subr.mxu0 %v21953_v57  ;;  %v22098_v36 = vpop.f32.mrf.mxu0 }
 0xb2c   :  { %18495 = vmatpush3.msra.mxu0 %v21953_v57  ;;  %v22101_v28 = vpop.f32.mrf.mxu1 }
 0xb2d   :  { %18496 = vmatprep.subr.mxu0 %v21962_v55  ;;  %v18060_v35 = vpop.f32.mrf.mxu0 }
 0xb2e   :  { %18497 = vmatpush3.msra.mxu0 %v21962_v55  ;;  %v18137_v26 = vpop.f32.mrf.mxu1 }
 0xb2f   :  { %18499 = vmatmul.mubr.msk.f32.vlgmr.msra.gmra.mxu0 %vm171_vm0, %v21577_v17  ;;  %18512 = vmatprep.subr.mxu0 %v21971_v31 }
 0xb30   :  { %18513 = vmatpush3.msra.mxu0 %v21971_v31  ;;  %18520 = vmatprep.mubr.msk.f32.mxu0 %vm171_vm0, %v21533_v6 }
 0xb31   :  { %18514 = vmatprep.subr.mxu0 %v21986_v56 }
 0xb32   :  { %18515 = vmatpush3.msra.mxu0 %v21986_v56  ;;  %v9216_v56 = vmul.f32 0.5, %v22098_v36 }
 0xb33   :  { %18516 = vmatprep.subr.mxu0 %v21997_v44 }
 0xb34   :  { %18517 = vmatpush3.msra.mxu0 %v21997_v44  ;;  %v9223_v44 = vmul.f32 0.5, %v22101_v28 }
 0xb35   :  { %18518 = vmatprep.subr.mxu0 %v22010_v8  ;;  %v22116_v41 = vpop.f32.mrf.mxu0 }
 0xb36   :  { %18519 = vmatpush3.msra.mxu0 %v22010_v8  ;;  %v22119_v45 = vpop.f32.mrf.mxu1  ;;  %v9218_v14 = vmul.f32 0.5, %v22116_v41 }
 0xb37   :  { %18521 = vmatmul.mubr.msk.f32.vlgmr.msra.gmra.mxu0 %vm171_vm0, %v21577_v17  ;;  %18534 = vmatprep.subr.mxu0 %v22019_v18  ;;  %v18082_v46 = vpop.f32.mrf.mxu0 }
 0xb38   :  { %18535 = vmatpush3.msra.mxu0 %v22019_v18  ;;  %18542 = vmatprep.mubr.msk.f32.mxu0 %vm171_vm0, %v21533_v6  ;;  %v18159_v3 = vpop.f32.mrf.mxu1  ;;  %v9225_v18 = vmul.f32 0.5, %v22119_v45 }
 0xb39   :  { %18536 = vmatprep.subr.mxu0 %v22034_v16 }
 0xb3a   :  { %18537 = vmatpush3.msra.mxu0 %v22034_v16 }
 0xb3b   :  { %18538 = vmatprep.subr.mxu0 %v22047_v19 }
 0xb3c   :  { %18539 = vmatpush3.msra.mxu0 %v22047_v19 }
 0xb3d   :  { %18540 = vmatprep.subr.mxu0 %v22058_v38 }
 0xb3e   :  { %18541 = vmatpush3.msra.mxu0 %v22058_v38 }
 0xb3f   :  { %18543 = vmatmul.mubr.msk.f32.vlgmr.msra.gmra.mxu0 %vm171_vm0, %v21577_v17  ;;  %v22135_v2 = vpop.f32.mrf.mxu0  ;;  %18552 = vmatprep.subr.mxu0 %v19092_v37 }
 0xb40   :  { %v22138_v6 = vpop.f32.mrf.mxu1  ;;  %18556 = vmatprep.mubr.msk.f32.mxu0 %vm19093_vm1, %v19092_v37  ;;  %v9220_v25 = vmul.f32 0.5, %v22135_v2 }
 0xb41   :  { %v18104_v61 = vpop.f32.mrf.mxu0  ;;  %v9227_v38 = vmul.f32 0.5, %v22138_v6 }
 0xb42   :  { %v18181_v49 = vpop.f32.mrf.mxu1 }
 0xb49   :  { %v22142_v10 = vpop.f32.mrf.mxu0 }
 0xb4a   :  { %v18203_v50 = vpop.f32.mrf.mxu1  ;;  %v9222_v34 = vmul.f32 0.5, %v22142_v10 }
 0xb4b   :  { %18546 = vmatpush3.xpose.msk.msra.mxu1 %vm3833_vm2, %v18203_v50  ;;  %v18126_v53 = vpop.f32.mrf.mxu0 }
 0xb4c   :  { %18547 = vmatprep.subr.mxu1 %v19092_v37  ;;  %v9301_v17 = vpop.f32.mrf.mxu1 }
 0xb4f   :  { %18548 = vmatpush3.xpose.msk.msra.mxu1 %vm3833_vm2, %v9301_v17 }
 0xb50   :  { %18559 = vmatprep.subr.mxu1 %v19092_v37 }
 0xb52   :  { %18550 = vmatmul.mubr.msk.f32.vlgmr.msra.gmra.mxu1 %vm3833_vm2, %v9213_v39 }
 0xb53   :  { %v22150_v54 = vpop.f32.mrf.mxu0  ;;  %18563 = vmatprep.mubr.msk.f32.mxu1 %vm19093_vm1, %v19092_v37 }
 0xb54   :  { %v18225_v21 = vpop.f32.mrf.mxu1  ;;  %v9224_v35 = vmul.f32 0.5, %v22150_v54 }
 0xb55   :  { %18560 = vmatpush3.xpose.msk.msra.mxu1 %vm3833_vm2, %v18225_v21  ;;  %v18148_v24 = vpop.f32.mrf.mxu0 }
 0xb56   :  { %18561 = vmatprep.subr.mxu1 %v19092_v37  ;;  %v9451_v40 = vpop.f32.mrf.mxu1 }
 0xb59   :  { %18562 = vmatpush3.xpose.msk.msra.mxu1 %vm3833_vm2, %v9451_v40 }
 0xb5a   :  { %18573 = vmatprep.subr.mxu1 %v19092_v37 }
 0xb5c   :  { %18564 = vmatmul.mubr.msk.f32.vlgmr.msra.gmra.mxu1 %vm3833_vm2, %v9215_v42 }
 0xb5d   :  { %v22160_v58 = vpop.f32.mrf.mxu0  ;;  %18577 = vmatprep.mubr.msk.f32.mxu1 %vm19093_vm1, %v19092_v37 }
 0xb5e   :  { %v18247_v13 = vpop.f32.mrf.mxu1  ;;  %v9226_v45 = vmul.f32 0.5, %v22160_v58 }
 0xb5f   :  { %18574 = vmatpush3.xpose.msk.msra.mxu1 %vm3833_vm2, %v18247_v13  ;;  %v18170_v47 = vpop.f32.mrf.mxu0 }
 0xb60   :  { %18575 = vmatprep.subr.mxu1 %v19092_v37  ;;  %v9601_v48 = vpop.f32.mrf.mxu1 }
 0xb63   :  { %18576 = vmatpush3.xpose.msk.msra.mxu1 %vm3833_vm2, %v9601_v48 }
 0xb64   :  { %18587 = vmatprep.subr.mxu1 %v19092_v37 }
 0xb66   :  { %18578 = vmatmul.mubr.msk.f32.vlgmr.msra.gmra.mxu1 %vm3833_vm2, %v9217_v60 }
 0xb67   :  { %v22170_v63 = vpop.f32.mrf.mxu0  ;;  %18591 = vmatprep.mubr.msk.f32.mxu1 %vm19093_vm1, %v19092_v37 }
 0xb68   :  { %v18269_v23 = vpop.f32.mrf.mxu1  ;;  %v9228_v2 = vmul.f32 0.5, %v22170_v63 }
 0xb69   :  { %18588 = vmatpush3.xpose.msk.msra.mxu1 %vm3833_vm2, %v18269_v23  ;;  %v18192_v0 = vpop.f32.mrf.mxu0 }
 0xb6a   :  { %18589 = vmatprep.subr.mxu1 %v19092_v37  ;;  %v9751_v22 = vpop.f32.mrf.mxu1 }
 0xb6d   :  { %18590 = vmatpush3.xpose.msk.msra.mxu1 %vm3833_vm2, %v9751_v22 }
 0xb6e   :  { %18601 = vmatprep.subr.mxu1 %v19092_v37 }
 0xb70   :  { %18592 = vmatmul.mubr.msk.f32.vlgmr.msra.gmra.mxu1 %vm3833_vm2, %v9219_v62 }
 0xb71   :  { %v18214_v59 = vpop.f32.mrf.mxu0  ;;  %18605 = vmatprep.mubr.msk.f32.mxu1 %vm19093_vm1, %v19092_v37 }
 0xb72   :  { %v18291_v15 = vpop.f32.mrf.mxu1  ;;  %18553 = vmatpush3.xpose.msk.msra.mxu0 %vm3833_vm2, %v18214_v59 }
 0xb73   :  { %18602 = vmatpush3.xpose.msk.msra.mxu1 %vm3833_vm2, %v18291_v15  ;;  %18554 = vmatprep.subr.mxu0 %v19092_v37  ;;  %v9376_v52 = vpop.f32.mrf.mxu0 }
 0xb74   :  { %18603 = vmatprep.subr.mxu1 %v19092_v37  ;;  %v9907_v11 = vpop.f32.mrf.mxu1 }
 0xb76   :  { %18555 = vmatpush3.xpose.msk.msra.mxu0 %vm3833_vm2, %v9376_v52 }
 0xb77   :  { %18604 = vmatpush3.xpose.msk.msra.mxu1 %vm3833_vm2, %v9907_v11  ;;  %18566 = vmatprep.subr.mxu0 %v19092_v37 }
 0xb78   :  { %18615 = vmatprep.subr.mxu1 %v19092_v37 }
 0xb79   :  { %18557 = vmatmul.mubr.msk.f32.vlgmr.msra.gmra.mxu0 %vm3833_vm2, %v9214_v51 }
 0xb7a   :  { %18606 = vmatmul.mubr.msk.f32.vlgmr.msra.gmra.mxu1 %vm3833_vm2, %v9221_v1  ;;  %18570 = vmatprep.mubr.msk.f32.mxu0 %vm19093_vm1, %v19092_v37 }
 0xb7b   :  { %v18236_v29 = vpop.f32.mrf.mxu0  ;;  %18619 = vmatprep.mubr.msk.f32.mxu1 %vm19093_vm1, %v19092_v37 }
 0xb7c   :  { %v18313_v57 = vpop.f32.mrf.mxu1  ;;  %18567 = vmatpush3.xpose.msk.msra.mxu0 %vm3833_vm2, %v18236_v29 }
 0xb7d   :  { %18616 = vmatpush3.xpose.msk.msra.mxu1 %vm3833_vm2, %v18313_v57  ;;  %18568 = vmatprep.subr.mxu0 %v19092_v37  ;;  %v9526_v55 = vpop.f32.mrf.mxu0 }
 0xb7e   :  { %18617 = vmatprep.subr.mxu1 %v19092_v37  ;;  %v10057_v31 = vpop.f32.mrf.mxu1 }
 0xb80   :  { %18569 = vmatpush3.xpose.msk.msra.mxu0 %vm3833_vm2, %v9526_v55 }
 0xb81   :  { %18618 = vmatpush3.xpose.msk.msra.mxu1 %vm3833_vm2, %v10057_v31  ;;  %18580 = vmatprep.subr.mxu0 %v19092_v37 }
 0xb82   :  { %18629 = vmatprep.subr.mxu1 %v19092_v37 }
 0xb83   :  { %18571 = vmatmul.mubr.msk.f32.vlgmr.msra.gmra.mxu0 %vm3833_vm2, %v9216_v56 }
 0xb84   :  { %18620 = vmatmul.mubr.msk.f32.vlgmr.msra.gmra.mxu1 %vm3833_vm2, %v9223_v44  ;;  %18584 = vmatprep.mubr.msk.f32.mxu0 %vm19093_vm1, %v19092_v37 }
 0xb85   :  { %v18258_v43 = vpop.f32.mrf.mxu0  ;;  %18633 = vmatprep.mubr.msk.f32.mxu1 %vm19093_vm1, %v19092_v37 }
 0xb86   :  { %v18335_v4 = vpop.f32.mrf.mxu1  ;;  %18581 = vmatpush3.xpose.msk.msra.mxu0 %vm3833_vm2, %v18258_v43 }
 0xb87   :  { %18630 = vmatpush3.xpose.msk.msra.mxu1 %vm3833_vm2, %v18335_v4  ;;  %18582 = vmatprep.subr.mxu0 %v19092_v37  ;;  %v9676_v8 = vpop.f32.mrf.mxu0 }
 0xb88   :  { %18631 = vmatprep.subr.mxu1 %v19092_v37  ;;  %v10207_v9 = vpop.f32.mrf.mxu1 }
 0xb8a   :  { %18583 = vmatpush3.xpose.msk.msra.mxu0 %vm3833_vm2, %v9676_v8 }
 0xb8b   :  { %18632 = vmatpush3.xpose.msk.msra.mxu1 %vm3833_vm2, %v10207_v9  ;;  %18594 = vmatprep.subr.mxu0 %v19092_v37 }
 0xb8c   :  { %18643 = vmatprep.subr.mxu1 %v19092_v37 }
 0xb8d   :  { %18585 = vmatmul.mubr.msk.f32.vlgmr.msra.gmra.mxu0 %vm3833_vm2, %v9218_v14 }
 0xb8e   :  { %18634 = vmatmul.mubr.msk.f32.vlgmr.msra.gmra.mxu1 %vm3833_vm2, %v9225_v18  ;;  %18598 = vmatprep.mubr.msk.f32.mxu0 %vm19093_vm1, %v19092_v37 }
 0xb8f   :  { %v18280_v16 = vpop.f32.mrf.mxu0  ;;  %18647 = vmatprep.mubr.msk.f32.mxu1 %vm19093_vm1, %v19092_v37 }
 0xb90   :  { %v18357_v30 = vpop.f32.mrf.mxu1  ;;  %18595 = vmatpush3.xpose.msk.msra.mxu0 %vm3833_vm2, %v18280_v16 }
 0xb91   :  { %18644 = vmatpush3.xpose.msk.msra.mxu1 %vm3833_vm2, %v18357_v30  ;;  %18596 = vmatprep.subr.mxu0 %v19092_v37  ;;  %v9826_v19 = vpop.f32.mrf.mxu0 }
 0xb92   :  { %18645 = vmatprep.subr.mxu1 %v19092_v37  ;;  %v10357_v12 = vpop.f32.mrf.mxu1 }
 0xb94   :  { %18597 = vmatpush3.xpose.msk.msra.mxu0 %vm3833_vm2, %v9826_v19 }
 0xb95   :  { %18646 = vmatpush3.xpose.msk.msra.mxu1 %vm3833_vm2, %v10357_v12  ;;  %18608 = vmatprep.subr.mxu0 %v19092_v37 }
 0xb96   :  { %18657 = vmatprep.subr.mxu1 %v19092_v37 }
 0xb97   :  { %18599 = vmatmul.mubr.msk.f32.vlgmr.msra.gmra.mxu0 %vm3833_vm2, %v9220_v25 }
 0xb98   :  { %18648 = vmatmul.mubr.msk.f32.vlgmr.msra.gmra.mxu1 %vm3833_vm2, %v9227_v38  ;;  %18612 = vmatprep.mubr.msk.f32.mxu0 %vm19093_vm1, %v19092_v37 }
 0xb99   :  { %v18302_v27 = vpop.f32.mrf.mxu0  ;;  %18661 = vmatprep.mubr.msk.f32.mxu1 %vm19093_vm1, %v19092_v37 }
 0xb9a   :  { %v18379_v32 = vpop.f32.mrf.mxu1  ;;  %18609 = vmatpush3.xpose.msk.msra.mxu0 %vm3833_vm2, %v18302_v27 }
 0xb9b   :  { %18658 = vmatpush3.msra.mxu1 %v18379_v32  ;;  %18610 = vmatprep.subr.mxu0 %v19092_v37  ;;  %v9982_v5 = vpop.f32.mrf.mxu0 }
 0xb9c   :  { %v10507_v33 = vpop.f32.mrf.mxu1  ;;  %18659 = vmatprep.subr.mxu1 %v19092_v37 }
 0xb9d   :  { %18660 = vmatpush3.msra.mxu1 %v10507_v33 }
 0xb9e   :  { %18611 = vmatpush3.xpose.msk.msra.mxu0 %vm3833_vm2, %v9982_v5  ;;  %18664 = vmatprep.subr.mxu1 %v19092_v37 }
 0xb9f   :  { %18622 = vmatprep.subr.mxu0 %v19092_v37 }
 0xba1   :  { %18613 = vmatmul.mubr.msk.f32.vlgmr.msra.gmra.mxu0 %vm3833_vm2, %v9222_v34 }
 0xba2   :  { %18626 = vmatprep.mubr.msk.f32.mxu0 %vm19093_vm1, %v19092_v37 }
 0xba3   :  { %v18324_v36 = vpop.f32.mrf.mxu0 }
 0xba4   :  { %18623 = vmatpush3.xpose.msk.msra.mxu0 %vm3833_vm2, %v18324_v36  ;;  %v18401_v6 = vpop.f32.mrf.mxu1 }
 0xba5   :  { %18624 = vmatprep.subr.mxu0 %v19092_v37  ;;  %v10132_v28 = vpop.f32.mrf.mxu0 }
 0xba6   :  { %v10657_v61 = vpop.f32.mrf.mxu1 }
 0xba8   :  { %18625 = vmatpush3.xpose.msk.msra.mxu0 %vm3833_vm2, %v10132_v28 }
 0xba9   :  { %18636 = vmatprep.subr.mxu0 %v19092_v37 }
 0xbab   :  { %18627 = vmatmul.mubr.msk.f32.vlgmr.msra.gmra.mxu0 %vm3833_vm2, %v9224_v35 }
 0xbac   :  { %18640 = vmatprep.mubr.msk.f32.mxu0 %vm19093_vm1, %v19092_v37 }
 0xbad   :  { %v18346_v26 = vpop.f32.mrf.mxu0 }
 0xbae   :  { %18637 = vmatpush3.xpose.msk.msra.mxu0 %vm3833_vm2, %v18346_v26  ;;  %v22282_v49 = vpop.f32.mrf.mxu1 }
 0xbaf   :  { %18638 = vmatprep.subr.mxu0 %v19092_v37  ;;  %v10282_v41 = vpop.f32.mrf.mxu0 }
 0xbb0   :  { %v22284_v10 = vpop.f32.mrf.mxu1 }
 0xbb2   :  { %18639 = vmatpush3.xpose.msk.msra.mxu0 %vm3833_vm2, %v10282_v41 }
 0xbb3   :  { %18650 = vmatprep.subr.mxu0 %v19092_v37 }
 0xbb5   :  { %18641 = vmatmul.mubr.msk.f32.vlgmr.msra.gmra.mxu0 %vm3833_vm2, %v9226_v45 }
 0xbb6   :  { %18654 = vmatprep.mubr.msk.f32.mxu0 %vm19093_vm1, %v19092_v37 }
 0xbb7   :  { %v18368_v46 = vpop.f32.mrf.mxu0 }
 0xbb8   :  { %18651 = vmatpush3.xpose.msk.msra.mxu0 %vm3833_vm2, %v18368_v46  ;;  %v22286_v50 = vpop.f32.mrf.mxu1 }
 0xbb9   :  { %18652 = vmatprep.subr.mxu0 %v19092_v37  ;;  %v10432_v3 = vpop.f32.mrf.mxu0 }
 0xbba   :  { %v22288_v53 = vpop.f32.mrf.mxu1 }
 0xbbc   :  { %18653 = vmatpush3.xpose.msk.msra.mxu0 %vm3833_vm2, %v10432_v3 }
 0xbbd   :  { %18671 = vmatprep.subr.mxu0 %v19092_v37 }
 0xbbf   :  { %18655 = vmatmul.mubr.msk.f32.vlgmr.msra.gmra.mxu0 %vm3833_vm2, %v9228_v2 }
 0xbc0   :  { %18672 = vmatpush3.msra.mxu0 %v18401_v6  ;;  %18675 = vmatprep.mubr.msk.f32.mxu0 %vm19093_vm1, %v19092_v37 }
 0xbc1   :  { %18673 = vmatprep.subr.mxu0 %v19092_v37  ;;  %v22300_v40 = vpop.f32.mrf.mxu0 }
 0xbc2   :  { %18674 = vmatpush3.msra.mxu0 %v10657_v61  ;;  %v22290_v17 = vpop.f32.mrf.mxu1 }
 0xbc3   :  { %18685 = vmatprep.subr.mxu0 %v19092_v37  ;;  %v22306_v13 = vpop.f32.mrf.mxu0 }
 0xbc4   :  { %v22292_v39 = vpop.f32.mrf.mxu1 }
 0xbcb   :  { %v22308_v47 = vpop.f32.mrf.mxu0 }
 0xbcc   :  { %v22294_v54 = vpop.f32.mrf.mxu1 }
 0xbcd   :  { %v22314_v63 = vpop.f32.mrf.mxu0 }
 0xbce   :  { %v22296_v21 = vpop.f32.mrf.mxu1 }
 0xbd5   :  { %v22318_v22 = vpop.f32.mrf.mxu0 }
 0xbd6   :  { %v22298_v24 = vpop.f32.mrf.mxu1 }
 0xbd7   :  { %v22320_v62 = vpop.f32.mrf.mxu0 }
 0xbd8   :  { %v22302_v42 = vpop.f32.mrf.mxu1 }
 0xbdf   :  { %v22322_v59 = vpop.f32.mrf.mxu0 }
 0xbe0   :  { %v22304_v58 = vpop.f32.mrf.mxu1 }
 0xbe1   :  { %v22328_v51 = vpop.f32.mrf.mxu0 }
 0xbe2   :  { %v22310_v48 = vpop.f32.mrf.mxu1 }
 0xbe7   :  { %v22330_v1 = vpop.f32.mrf.mxu0 }
 0xbe9   :  { %v22332_v29 = vpop.f32.mrf.mxu0 }
 0xbef   :  { %v22336_v55 = vpop.f32.mrf.mxu0 }
 0xbf1   :  { %v22340_v44 = vpop.f32.mrf.mxu0 }
 0xbf7   :  { %v22342_v43 = vpop.f32.mrf.mxu0 }
 0xbf9   :  { %v22346_v8 = vpop.f32.mrf.mxu0 }
 0xbff   :  { %v22350_v18 = vpop.f32.mrf.mxu0 }
 0xc01   :  { %v22352_v16 = vpop.f32.mrf.mxu0 }
 0xc12   :  { %v22312_v60 = vpop.f32.mrf.mxu1 }
 0xc13   :  { %v12905_v23 = vsel %vm5098_vm3, %v22312_v60, -inf }
 0xc14   :  { %12906 = vmax.xlane.f32.xlu0 %v12905_v23  ;;  %v18551_v0 = vpop.f32.mrf.mxu1 }
 0xc1c   :  { %v22324_v15 = vpop.f32.mrf.mxu1 }
 0xc1d   :  { %v12911_v52 = vsel %vm5098_vm3, %v22324_v15, -inf }
 0xc1e   :  { %12912 = vmax.xlane.f32.xlu0 %v12911_v52  ;;  %v18565_v11 = vpop.f32.mrf.mxu1 }
 0xc26   :  { %v22334_v57 = vpop.f32.mrf.mxu1 }
 0xc27   :  { %v12917_v31 = vsel %vm5098_vm3, %v22334_v57, -inf }
 0xc28   :  { %12918 = vmax.xlane.f32.xlu0 %v12917_v31  ;;  %v18579_v56 = vpop.f32.mrf.mxu1 }
 0xc30   :  { %v22344_v4 = vpop.f32.mrf.mxu1 }
 0xc31   :  { %v12923_v9 = vsel %vm5098_vm3, %v22344_v4, -inf }
 0xc32   :  { %12924 = vmax.xlane.f32.xlu0 %v12923_v9  ;;  %v18593_v14 = vpop.f32.mrf.mxu1 }
 0xc39   :  { %v22354_v30 = vpop.f32.mrf.mxu0 }
 0xc3a   :  { %v22356_v19 = vpop.f32.mrf.mxu1  ;;  %v12908_v12 = vsel %vm5098_vm3, %v22354_v30, -inf }
 0xc3b   :  { %v12929_v25 = vsel %vm5098_vm3, %v22356_v19, -inf  ;;  %12909 = vmax.xlane.f32.xlu1 %v12908_v12  ;;  %v18558_v38 = vpop.f32.mrf.mxu0 }
 0xc3c   :  { %12930 = vmax.xlane.f32.xlu0 %v12929_v25  ;;  %v18607_v27 = vpop.f32.mrf.mxu1 }
 0xc43   :  { %v22362_v32 = vpop.f32.mrf.mxu0 }
 0xc44   :  { %v22364_v33 = vpop.f32.mrf.mxu1  ;;  %v12914_v5 = vsel %vm5098_vm3, %v22362_v32, -inf }
 0xc45   :  { %v12935_v34 = vsel %vm5098_vm3, %v22364_v33, -inf  ;;  %12915 = vmax.xlane.f32.xlu1 %v12914_v5  ;;  %v18572_v36 = vpop.f32.mrf.mxu0 }
 0xc46   :  { %12936 = vmax.xlane.f32.xlu0 %v12935_v34  ;;  %v18621_v28 = vpop.f32.mrf.mxu1 }
 0xc4d   :  { %v22370_v35 = vpop.f32.mrf.mxu0 }
 0xc4e   :  { %v22372_v26 = vpop.f32.mrf.mxu1  ;;  %v12920_v41 = vsel %vm5098_vm3, %v22370_v35, -inf }
 0xc4f   :  { %v12941_v45 = vsel %vm5098_vm3, %v22372_v26, -inf  ;;  %12921 = vmax.xlane.f32.xlu1 %v12920_v41  ;;  %v18586_v46 = vpop.f32.mrf.mxu0 }
 0xc50   :  { %12942 = vmax.xlane.f32.xlu0 %v12941_v45  ;;  %v18635_v3 = vpop.f32.mrf.mxu1 }
 0xc57   :  { %v22378_v2 = vpop.f32.mrf.mxu0 }
 0xc58   :  { %v22380_v6 = vpop.f32.mrf.mxu1  ;;  %v12926_v61 = vsel %vm5098_vm3, %v22378_v2, -inf }
 0xc59   :  { %v12947_v23 = vsel %vm5098_vm3, %v22380_v6, -inf  ;;  %12927 = vmax.xlane.f32.xlu1 %v12926_v61  ;;  %v18600_v0 = vpop.f32.mrf.mxu0 }
 0xc5a   :  { %12948 = vmax.xlane.f32.xlu0 %v12947_v23  ;;  %v18649_v52 = vpop.f32.mrf.mxu1 }
 0xc61   :  { %v22386_v11 = vpop.f32.mrf.mxu0 }
 0xc62   :  { %v12932_v31 = vsel %vm5098_vm3, %v22386_v11, -inf }
 0xc63   :  { %12933 = vmax.xlane.f32.xlu1 %v12932_v31  ;;  %v18614_v56 = vpop.f32.mrf.mxu0 }
 0xc6b   :  { %v22390_v9 = vpop.f32.mrf.mxu0 }
 0xc6c   :  { %v12938_v14 = vsel %vm5098_vm3, %v22390_v9, -inf }
 0xc6d   :  { %12939 = vmax.xlane.f32.xlu1 %v12938_v14  ;;  %v18628_v12 = vpop.f32.mrf.mxu0 }
 0xc75   :  { %v22394_v25 = vpop.f32.mrf.mxu0 }
 0xc76   :  { %v12944_v38 = vsel %vm5098_vm3, %v22394_v25, -inf }
 0xc77   :  { %12945 = vmax.xlane.f32.xlu1 %v12944_v38  ;;  %v18642_v27 = vpop.f32.mrf.mxu0 }
 0xc7f   :  { %v22398_v5 = vpop.f32.mrf.mxu0 }
 0xc80   :  { %v12950_v34 = vsel %vm5098_vm3, %v22398_v5, -inf }
 0xc81   :  { %12951 = vmax.xlane.f32.xlu1 %v12950_v34  ;;  %v18656_v36 = vpop.f32.mrf.mxu0 }
 0xc9d   :  { %v12907_v28 = vpop.xlane.xlu0 %12906 }
 0xc9e   :  { %v12953_v41 = vsub.f32 %v22312_v60, %v12907_v28 }
 0xca0   :  { %v12969_v45 = vmul.f32 1.442695, %v12953_v41 }
 0xca2   :  { %18992 = vpow2.f32 %v12969_v45 }
 0xca7   :  { %v12913_v46 = vpop.xlane.xlu0 %12912 }
 0xca8   :  { %v12955_v3 = vsub.f32 %v22324_v15, %v12913_v46 }
 0xcaa   :  { %v12973_v61 = vmul.f32 1.442695, %v12955_v3 }
 0xcac   :  { %18994 = vpow2.f32 %v12973_v61 }
 0xcaf   :  { %v22404_v23 = vpop.eup %18992 }
 0xcb0   :  { %v13001_v0 = vsel %vm5098_vm3, %v22404_v23, 0.0 }
 0xcb1   :  { %v12919_v52 = vpop.xlane.xlu0 %12918  ;;  %13002 = vadd.xlane.f32.xlu0 %v13001_v0 }
 0xcb2   :  { %v12957_v31 = vsub.f32 %v22334_v57, %v12919_v52 }
 0xcb4   :  { %v12977_v56 = vmul.f32 1.442695, %v12957_v31 }
 0xcb6   :  { %18996 = vpow2.f32 %v12977_v56 }
 0xcb9   :  { %v22409_v14 = vpop.eup %18994 }
 0xcba   :  { %v13007_v60 = vsel %vm5098_vm3, %v22409_v14, 0.0 }
 0xcbb   :  { %v12925_v12 = vpop.xlane.xlu0 %12924  ;;  %13008 = vadd.xlane.f32.xlu0 %v13007_v60 }
 0xcbc   :  { %v12959_v15 = vsub.f32 %v22344_v4, %v12925_v12 }
 0xcbe   :  { %v12981_v38 = vmul.f32 1.442695, %v12959_v15 }
 0xcc0   :  { %18998 = vpow2.f32 %v12981_v38 }
 0xcc3   :  { %v22414_v27 = vpop.eup %18996 }
 0xcc4   :  { %v12910_v34 = vpop.xlane.xlu1 %12909  ;;  %v13013_v36 = vsel %vm5098_vm3, %v22414_v27, 0.0 }
 0xcc5   :  { %v12931_v57 = vpop.xlane.xlu0 %12930  ;;  %v12954_v28 = vsub.f32 %v22354_v30, %v12910_v34  ;;  %13014 = vadd.xlane.f32.xlu0 %v13013_v36 }
 0xcc6   :  { %v12961_v41 = vsub.f32 %v22356_v19, %v12931_v57 }
 0xcc7   :  { %v12971_v45 = vmul.f32 1.442695, %v12954_v28 }
 0xcc8   :  { %v12985_v46 = vmul.f32 1.442695, %v12961_v41 }
 0xcc9   :  { %19000 = vpow2.f32 %v12971_v45 }
 0xcca   :  { %19002 = vpow2.f32 %v12985_v46 }
 0xccd   :  { %v22420_v3 = vpop.eup %18998 }
 0xcce   :  { %v12916_v4 = vpop.xlane.xlu1 %12915  ;;  %v13019_v61 = vsel %vm5098_vm3, %v22420_v3, 0.0 }
 0xccf   :  { %v12937_v0 = vpop.xlane.xlu0 %12936  ;;  %v12956_v52 = vsub.f32 %v22362_v32, %v12916_v4  ;;  %13020 = vadd.xlane.f32.xlu0 %v13019_v61 }
 0xcd0   :  { %v12963_v31 = vsub.f32 %v22364_v33, %v12937_v0 }
 0xcd1   :  { %v12975_v30 = vmul.f32 1.442695, %v12956_v52 }
 0xcd2   :  { %v12989_v56 = vmul.f32 1.442695, %v12963_v31 }
 0xcd3   :  { %19004 = vpow2.f32 %v12975_v30 }
 0xcd4   :  { %19006 = vpow2.f32 %v12989_v56 }
 0xcd6   :  { %v22426_v19 = vpop.eup %19000 }
 0xcd7   :  { %v22428_v60 = vpop.eup %19002  ;;  %v13004_v12 = vsel %vm5098_vm3, %v22426_v19, 0.0 }
 0xcd8   :  { %v12922_v15 = vpop.xlane.xlu1 %12921  ;;  %v13025_v38 = vsel %vm5098_vm3, %v22428_v60, 0.0  ;;  %13005 = vadd.xlane.f32.xlu1 %v13004_v12 }
 0xcd9   :  { %v12943_v32 = vpop.xlane.xlu0 %12942  ;;  %v12958_v34 = vsub.f32 %v22370_v35, %v12922_v15  ;;  %13026 = vadd.xlane.f32.xlu0 %v13025_v38 }
 0xcda   :  { %v12965_v33 = vsub.f32 %v22372_v26, %v12943_v32 }
 0xcdb   :  { %v12979_v36 = vmul.f32 1.442695, %v12958_v34 }
 0xcdc   :  { %v12993_v57 = vmul.f32 1.442695, %v12965_v33 }
 0xcdd   :  { %19008 = vpow2.f32 %v12979_v36 }
 0xcde   :  { %19010 = vpow2.f32 %v12993_v57 }
 0xce0   :  { %v22436_v28 = vpop.eup %19004 }
 0xce1   :  { %v22438_v41 = vpop.eup %19006  ;;  %v13010_v45 = vsel %vm5098_vm3, %v22436_v28, 0.0 }
 0xce2   :  { %v12928_v46 = vpop.xlane.xlu1 %12927  ;;  %v13031_v4 = vsel %vm5098_vm3, %v22438_v41, 0.0  ;;  %13011 = vadd.xlane.f32.xlu1 %v13010_v45 }
 0xce3   :  { %v12949_v35 = vpop.xlane.xlu0 %12948  ;;  %v12960_v61 = vsub.f32 %v22378_v2, %v12928_v46  ;;  %13032 = vadd.xlane.f32.xlu0 %v13031_v4 }
 0xce4   :  { %v12967_v26 = vsub.f32 %v22380_v6, %v12949_v35 }
 0xce5   :  { %v12983_v0 = vmul.f32 1.442695, %v12960_v61 }
 0xce6   :  { %v12997_v52 = vmul.f32 1.442695, %v12967_v26 }
 0xce7   :  { %19012 = vpow2.f32 %v12983_v0 }
 0xce8   :  { %19014 = vpow2.f32 %v12997_v52 }
 0xcea   :  { %v22446_v31 = vpop.eup %19008 }
 0xceb   :  { %v22448_v30 = vpop.eup %19010  ;;  %v13016_v56 = vsel %vm5098_vm3, %v22446_v31, 0.0 }
 0xcec   :  { %v12934_v12 = vpop.xlane.xlu1 %12933  ;;  %v13037_v15 = vsel %vm5098_vm3, %v22448_v30, 0.0  ;;  %13017 = vadd.xlane.f32.xlu1 %v13016_v56 }
 0xced   :  { %v12962_v2 = vsub.f32 %v22386_v11, %v12934_v12  ;;  %13038 = vadd.xlane.f32.xlu0 %v13037_v15 }
 0xcef   :  { %v12987_v6 = vmul.f32 1.442695, %v12962_v2 }
 0xcf1   :  { %19016 = vpow2.f32 %v12987_v6 }
 0xcf4   :  { %v22455_v38 = vpop.eup %19012 }
 0xcf5   :  { %v22457_v32 = vpop.eup %19014  ;;  %v13022_v34 = vsel %vm5098_vm3, %v22455_v38, 0.0 }
 0xcf6   :  { %v12940_v33 = vpop.xlane.xlu1 %12939  ;;  %v13043_v36 = vsel %vm5098_vm3, %v22457_v32, 0.0  ;;  %13023 = vadd.xlane.f32.xlu1 %v13022_v34 }
 0xcf7   :  { %v12964_v57 = vsub.f32 %v22390_v9, %v12940_v33  ;;  %13044 = vadd.xlane.f32.xlu0 %v13043_v36 }
 0xcf9   :  { %v12991_v45 = vmul.f32 1.442695, %v12964_v57 }
 0xcfb   :  { %19018 = vpow2.f32 %v12991_v45 }
 0xcfe   :  { %v22464_v11 = vpop.eup %19016 }
 0xcff   :  { %v13028_v46 = vsel %vm5098_vm3, %v22464_v11, 0.0 }
 0xd00   :  { %v12946_v4 = vpop.xlane.xlu1 %12945  ;;  %13029 = vadd.xlane.f32.xlu1 %v13028_v46 }
 0xd01   :  { %v12966_v35 = vsub.f32 %v22394_v25, %v12946_v4 }
 0xd03   :  { %v12995_v61 = vmul.f32 1.442695, %v12966_v35 }
 0xd05   :  { %19020 = vpow2.f32 %v12995_v61  ;;  %v22610_v61 = vld [vmem:[%s22830_s5 + $0x24] sm:$0xf] }
 0xd08   :  { %v22469_v26 = vpop.eup %19018 }
 0xd09   :  { %v13034_v0 = vsel %vm5098_vm3, %v22469_v26, 0.0 }
 0xd0a   :  { %v12952_v9 = vpop.xlane.xlu1 %12951  ;;  %13035 = vadd.xlane.f32.xlu1 %v13034_v0  ;;  %v16077_v0 = vld [vmem:[%s22830_s5 + $0x30] sm:$0xf] }
 0xd0b   :  { %v12968_v52 = vsub.f32 %v22398_v5, %v12952_v9 }
 0xd0d   :  { %v12999_v56 = vmul.f32 1.442695, %v12968_v52 }
 0xd0f   :  { %19022 = vpow2.f32 %v12999_v56  ;;  %v16079_v56 = vld [vmem:[%s22830_s5 + $0x38] sm:$0xf] }
 0xd12   :  { %v22474_v12 = vpop.eup %19020 }
 0xd13   :  { %v13040_v15 = vsel %vm5098_vm3, %v22474_v12, 0.0 }
 0xd14   :  { %13041 = vadd.xlane.f32.xlu1 %v13040_v15 }
 0xd1c   :  { %v22478_v25 = vpop.eup %19022 }
 0xd1d   :  { %v13046_v2 = vsel %vm5098_vm3, %v22478_v25, 0.0 }
 0xd1e   :  { %13047 = vadd.xlane.f32.xlu1 %v13046_v2 }
 0xd3a   :  { %v13003_v6 = vpop.xlane.xlu0 %13002 }
 0xd3b   :  { %19024 = vrcp.f32 %v13003_v6  ;;  %v16076_v6 = vld [vmem:[%s22830_s5 + $0x2c] sm:$0xf] }
 0xd44   :  { %v13009_v34 = vpop.xlane.xlu0 %13008 }
 0xd45   :  { %19026 = vrcp.f32 %v13009_v34 }
 0xd48   :  { %v19025_v33 = vpop.eup %19024 }
 0xd49   :  { %v13065_v5 = vmul.f32 %v19025_v33, %v22404_v23 }
 0xd4b   :  { %18662 = vmatmul.mubr.msk.f32.vlgmr.msra.gmra.mxu1 %vm5098_vm3, %v13065_v5 }
 0xd4c   :  { %18665 = vmatpush3.msra.mxu1 %v22300_v40  ;;  %18668 = vmatprep.mubr.msk.f32.mxu1 %vm19093_vm1, %v19092_v37 }
 0xd4d   :  { %18666 = vmatprep.subr.mxu1 %v19092_v37 }
 0xd4e   :  { %v13015_v36 = vpop.xlane.xlu0 %13014  ;;  %18667 = vmatpush3.msra.mxu1 %v22306_v13 }
 0xd4f   :  { %19028 = vrcp.f32 %v13015_v36  ;;  %18678 = vmatprep.subr.mxu1 %v19092_v37 }
 0xd52   :  { %v19027_v57 = vpop.eup %19026 }
 0xd53   :  { %v13067_v45 = vmul.f32 %v19027_v57, %v22409_v14  ;;  %v16078_v57 = vld [vmem:[%s22830_s5 + $0x34] sm:$0xf] }
 0xd55   :  { %18676 = vmatmul.mubr.msk.f32.vlgmr.msra.gmra.mxu0 %vm5098_vm3, %v13067_v45 }
 0xd56   :  { %18686 = vmatpush3.msra.mxu0 %v22282_v49  ;;  %18689 = vmatprep.mubr.msk.f32.mxu0 %vm19093_vm1, %v19092_v37 }
 0xd57   :  { %18687 = vmatprep.subr.mxu0 %v19092_v37 }
 0xd58   :  { %v13021_v40 = vpop.xlane.xlu0 %13020  ;;  %18688 = vmatpush3.msra.mxu0 %v22284_v10 }
 0xd59   :  { %19030 = vrcp.f32 %v13021_v40  ;;  %18699 = vmatprep.subr.mxu0 %v19092_v37 }
 0xd5c   :  { %v19029_v13 = vpop.eup %19028 }
 0xd5d   :  { %v13069_v23 = vmul.f32 %v19029_v13, %v22414_v27 }
 0xd5f   :  { %18690 = vmatmul.mubr.msk.f32.vlgmr.msra.gmra.mxu0 %vm5098_vm3, %v13069_v23 }
 0xd60   :  { %18700 = vmatpush3.msra.mxu0 %v22286_v50  ;;  %18703 = vmatprep.mubr.msk.f32.mxu0 %vm19093_vm1, %v19092_v37 }
 0xd61   :  { %v13006_v49 = vpop.xlane.xlu1 %13005  ;;  %18701 = vmatprep.subr.mxu0 %v19092_v37 }
 0xd62   :  { %v13027_v14 = vpop.xlane.xlu0 %13026  ;;  %19032 = vrcp.f32 %v13006_v49  ;;  %18702 = vmatpush3.msra.mxu0 %v22288_v53  ;;  %v16080_v49 = vld [vmem:[%s22830_s5 + $0x3c] sm:$0xf] }
 0xd63   :  { %19034 = vrcp.f32 %v13027_v14  ;;  %18713 = vmatprep.subr.mxu0 %v19092_v37 }
 0xd66   :  { %v19031_v10 = vpop.eup %19030 }
 0xd67   :  { %v13071_v27 = vmul.f32 %v19031_v10, %v22420_v3 }
 0xd69   :  { %18704 = vmatmul.mubr.msk.f32.vlgmr.msra.gmra.mxu0 %vm5098_vm3, %v13071_v27 }
 0xd6a   :  { %18714 = vmatpush3.msra.mxu0 %v22290_v17  ;;  %18717 = vmatprep.mubr.msk.f32.mxu0 %vm19093_vm1, %v19092_v37 }
 0xd6b   :  { %v13012_v50 = vpop.xlane.xlu1 %13011  ;;  %18715 = vmatprep.subr.mxu0 %v19092_v37 }
 0xd6c   :  { %v13033_v46 = vpop.xlane.xlu0 %13032  ;;  %19036 = vrcp.f32 %v13012_v50  ;;  %18716 = vmatpush3.msra.mxu0 %v22292_v39 }
 0xd6d   :  { %19038 = vrcp.f32 %v13033_v46  ;;  %18727 = vmatprep.subr.mxu0 %v19092_v37 }
 0xd6f   :  { %v19033_v53 = vpop.eup %19032 }
 0xd70   :  { %v19035_v4 = vpop.eup %19034  ;;  %v13066_v3 = vmul.f32 %v19033_v53, %v22426_v19 }
 0xd71   :  { %v13073_v35 = vmul.f32 %v19035_v4, %v22428_v60 }
 0xd72   :  { %18669 = vmatmul.mubr.msk.f32.vlgmr.msra.gmra.mxu1 %vm5098_vm3, %v13066_v3 }
 0xd73   :  { %18679 = vmatpush3.msra.mxu1 %v22308_v47  ;;  %18718 = vmatmul.mubr.msk.f32.vlgmr.msra.gmra.mxu0 %vm5098_vm3, %v13073_v35 }
 0xd74   :  { %18728 = vmatpush3.msra.mxu0 %v22294_v54  ;;  %18680 = vmatprep.subr.mxu1 %v19092_v37 }
 0xd75   :  { %v13018_v17 = vpop.xlane.xlu1 %13017  ;;  %18729 = vmatprep.subr.mxu0 %v19092_v37  ;;  %18681 = vmatpush3.msra.mxu1 %v22314_v63 }
 0xd76   :  { %v13039_v39 = vpop.xlane.xlu0 %13038  ;;  %19040 = vrcp.f32 %v13018_v17  ;;  %18730 = vmatpush3.msra.mxu0 %v22296_v21  ;;  %18682 = vmatprep.mubr.msk.f32.mxu1 %vm19093_vm1, %v19092_v37 }
 0xd77   :  { %19042 = vrcp.f32 %v13039_v39  ;;  %18692 = vmatprep.subr.mxu1 %v19092_v37  ;;  %18731 = vmatprep.mubr.msk.f32.mxu0 %vm19093_vm1, %v19092_v37 }
 0xd78   :  { %18741 = vmatprep.subr.mxu0 %v19092_v37 }
 0xd79   :  { %v19037_v54 = vpop.eup %19036 }
 0xd7a   :  { %v19039_v47 = vpop.eup %19038  ;;  %v13068_v19 = vmul.f32 %v19037_v54, %v22436_v28 }
 0xd7b   :  { %v13075_v63 = vmul.f32 %v19039_v47, %v22438_v41 }
 0xd7c   :  { %18683 = vmatmul.mubr.msk.f32.vlgmr.msra.gmra.mxu1 %vm5098_vm3, %v13068_v19 }
 0xd7d   :  { %18693 = vmatpush3.msra.mxu1 %v22318_v22  ;;  %18732 = vmatmul.mubr.msk.f32.vlgmr.msra.gmra.mxu0 %vm5098_vm3, %v13075_v63 }
 0xd7e   :  { %18742 = vmatpush3.msra.mxu0 %v22298_v24  ;;  %18694 = vmatprep.subr.mxu1 %v19092_v37 }
 0xd7f   :  { %v13024_v21 = vpop.xlane.xlu1 %13023  ;;  %18743 = vmatprep.subr.mxu0 %v19092_v37  ;;  %18695 = vmatpush3.msra.mxu1 %v22320_v62 }
 0xd80   :  { %v13045_v60 = vpop.xlane.xlu0 %13044  ;;  %19044 = vrcp.f32 %v13024_v21  ;;  %18744 = vmatpush3.msra.mxu0 %v22302_v42  ;;  %18696 = vmatprep.mubr.msk.f32.mxu1 %vm19093_vm1, %v19092_v37 }
 0xd81   :  { %19046 = vrcp.f32 %v13045_v60  ;;  %18706 = vmatprep.subr.mxu1 %v19092_v37  ;;  %18745 = vmatprep.mubr.msk.f32.mxu0 %vm19093_vm1, %v19092_v37 }
 0xd82   :  { %18755 = vmatprep.subr.mxu0 %v19092_v37 }
 0xd83   :  { %v19041_v24 = vpop.eup %19040 }
 0xd84   :  { %v19043_v22 = vpop.eup %19042  ;;  %v13070_v28 = vmul.f32 %v19041_v24, %v22446_v31 }
 0xd85   :  { %v13077_v62 = vmul.f32 %v19043_v22, %v22448_v30 }
 0xd86   :  { %18697 = vmatmul.mubr.msk.f32.vlgmr.msra.gmra.mxu1 %vm5098_vm3, %v13070_v28 }
 0xd87   :  { %18707 = vmatpush3.msra.mxu1 %v22322_v59  ;;  %18746 = vmatmul.mubr.msk.f32.vlgmr.msra.gmra.mxu0 %vm5098_vm3, %v13077_v62 }
 0xd88   :  { %18756 = vmatpush3.msra.mxu0 %v22304_v58  ;;  %18708 = vmatprep.subr.mxu1 %v19092_v37 }
 0xd89   :  { %v13030_v42 = vpop.xlane.xlu1 %13029  ;;  %18757 = vmatprep.subr.mxu0 %v19092_v37  ;;  %18709 = vmatpush3.msra.mxu1 %v22328_v51 }
 0xd8a   :  { %19048 = vrcp.f32 %v13030_v42  ;;  %18758 = vmatpush3.msra.mxu0 %v22310_v48  ;;  %18710 = vmatprep.mubr.msk.f32.mxu1 %vm19093_vm1, %v19092_v37  ;;  %v22568_v48 = vld [vmem:[%s22830_s5 + $0x20] sm:$0xf] }
 0xd8b   :  { %18720 = vmatprep.subr.mxu1 %v19092_v37  ;;  %18759 = vmatprep.mubr.msk.f32.mxu0 %vm19093_vm1, %v19092_v37 }
 0xd8c   :  { %18769 = vmatprep.subr.mxu0 %v19092_v37 }
 0xd8d   :  { %v19045_v58 = vpop.eup %19044 }
 0xd8e   :  { %v19047_v59 = vpop.eup %19046  ;;  %v13072_v41 = vmul.f32 %v19045_v58, %v22455_v38 }
 0xd8f   :  { %v13079_v31 = vmul.f32 %v19047_v59, %v22457_v32 }
 0xd90   :  { %18711 = vmatmul.mubr.msk.f32.vlgmr.msra.gmra.mxu1 %vm5098_vm3, %v13072_v41 }
 0xd91   :  { %18721 = vmatpush3.msra.mxu1 %v22330_v1  ;;  %18760 = vmatmul.mubr.msk.f32.vlgmr.msra.gmra.mxu0 %vm5098_vm3, %v13079_v31 }
 0xd92   :  { %18722 = vmatprep.subr.mxu1 %v19092_v37  ;;  %18724 = vmatprep.mubr.msk.f32.mxu1 %vm19093_vm1, %v19092_v37 }
 0xd93   :  { %v13036_v51 = vpop.xlane.xlu1 %13035  ;;  %18723 = vmatpush3.msra.mxu1 %v22332_v29  ;;  %18770 = vmatpush3.msk.msra.mxu0 %vm6446_vm4, %v22568_v48 }
 0xd94   :  { %19050 = vrcp.f32 %v13036_v51  ;;  %18734 = vmatprep.subr.mxu1 %v19092_v37  ;;  %18771 = vmatprep.mubr.msk.f32.mxu0 %vm19093_vm1, %v19092_v37 }
 0xd95   :  { %18779 = vmatprep.subr.mxu0 %v19092_v37 }
 0xd97   :  { %v19049_v1 = vpop.eup %19048 }
 0xd98   :  { %v13074_v30 = vmul.f32 %v19049_v1, %v22464_v11 }
 0xd9a   :  { %18725 = vmatmul.mubr.msk.f32.vlgmr.msra.gmra.mxu1 %vm5098_vm3, %v13074_v30 }
 0xd9b   :  { %18735 = vmatpush3.msra.mxu1 %v22336_v55  ;;  %18738 = vmatprep.mubr.msk.f32.mxu1 %vm19093_vm1, %v19092_v37 }
 0xd9c   :  { %18736 = vmatprep.subr.mxu1 %v19092_v37 }
 0xd9d   :  { %v13042_v29 = vpop.xlane.xlu1 %13041  ;;  %18737 = vmatpush3.msra.mxu1 %v22340_v44 }
 0xd9e   :  { %19052 = vrcp.f32 %v13042_v29  ;;  %18748 = vmatprep.subr.mxu1 %v19092_v37 }
 0xda1   :  { %v19051_v38 = vpop.eup %19050 }
 0xda2   :  { %v13076_v32 = vmul.f32 %v19051_v38, %v22469_v26 }
 0xda4   :  { %18739 = vmatmul.mubr.msk.f32.vlgmr.msra.gmra.mxu1 %vm5098_vm3, %v13076_v32 }
 0xda5   :  { %18749 = vmatpush3.msra.mxu1 %v22342_v43  ;;  %18752 = vmatprep.mubr.msk.f32.mxu1 %vm19093_vm1, %v19092_v37 }
 0xda6   :  { %18750 = vmatprep.subr.mxu1 %v19092_v37 }
 0xda7   :  { %v13048_v55 = vpop.xlane.xlu1 %13047  ;;  %18751 = vmatpush3.msra.mxu1 %v22346_v8 }
 0xda8   :  { %19054 = vrcp.f32 %v13048_v55  ;;  %18762 = vmatprep.subr.mxu1 %v19092_v37 }
 0xdab   :  { %v19053_v44 = vpop.eup %19052 }
 0xdac   :  { %v13078_v11 = vmul.f32 %v19053_v44, %v22474_v12 }
 0xdae   :  { %18753 = vmatmul.mubr.msk.f32.vlgmr.msra.gmra.mxu1 %vm5098_vm3, %v13078_v11 }
 0xdaf   :  { %18763 = vmatpush3.msra.mxu1 %v22350_v18  ;;  %18766 = vmatprep.mubr.msk.f32.mxu1 %vm19093_vm1, %v19092_v37  ;;  %v16075_v18 = vld [vmem:[%s22830_s5 + $0x28] sm:$0xf] }
 0xdb0   :  { %18764 = vmatprep.subr.mxu1 %v19092_v37 }
 0xdb1   :  { %18765 = vmatpush3.msra.mxu1 %v22352_v16 }
 0xdb2   :  { %18774 = vmatprep.subr.mxu1 %v19092_v37 }
 0xdb5   :  { %v19055_v43 = vpop.eup %19054 }
 0xdb6   :  { %v13080_v8 = vmul.f32 %v19055_v43, %v22478_v25 }
 0xdb8   :  { %18767 = vmatmul.mubr.msk.f32.vlgmr.msra.gmra.mxu1 %vm5098_vm3, %v13080_v8 }
 0xdb9   :  { %18775 = vmatpush3.msk.msra.mxu1 %vm6446_vm4, %v22610_v61  ;;  %18776 = vmatprep.mubr.msk.f32.mxu1 %vm19093_vm1, %v19092_v37 }
 0xdba   :  { %18784 = vmatprep.subr.mxu1 %v19092_v37 }
 0xe0b   :  { %v13150_v16 = vpop.f32.mrf.mxu1 }
 0xe0c   :  { %18772 = vmatmul.mubr.msk.f32.vlgmr.msra.gmra.mxu0 %vm3833_vm2, %v13150_v16 }
 0xe0d   :  { %v18663_v26 = vpop.f32.mrf.mxu1  ;;  %18780 = vmatpush3.msk.msra.mxu0 %vm6446_vm4, %v16075_v18  ;;  %18781 = vmatprep.mubr.msk.f32.mxu0 %vm19093_vm1, %v19092_v37 }
 0xe0e   :  { %18789 = vmatprep.subr.mxu0 %v19092_v37 }
 0xe15   :  { %v13296_v9 = vpop.f32.mrf.mxu0 }
 0xe16   :  { %18782 = vmatmul.mubr.msk.f32.vlgmr.msra.gmra.mxu0 %vm3833_vm2, %v13296_v9 }
 0xe17   :  { %v18677_v52 = vpop.f32.mrf.mxu0  ;;  %18790 = vmatpush3.msk.msra.mxu0 %vm6446_vm4, %v16077_v0  ;;  %18791 = vmatprep.mubr.msk.f32.mxu0 %vm19093_vm1, %v19092_v37 }
 0xe18   :  { %18799 = vmatprep.subr.mxu0 %v19092_v37 }
 0xe1f   :  { %v13442_v12 = vpop.f32.mrf.mxu0 }
 0xe20   :  { %18792 = vmatmul.mubr.msk.f32.vlgmr.msra.gmra.mxu0 %vm3833_vm2, %v13442_v12 }
 0xe21   :  { %v18691_v15 = vpop.f32.mrf.mxu0  ;;  %18800 = vmatpush3.msk.msra.mxu0 %vm6446_vm4, %v16079_v56  ;;  %18801 = vmatprep.mubr.msk.f32.mxu0 %vm19093_vm1, %v19092_v37 }
 0xe22   :  { %18809 = vmatprep.subr.mxu0 %v19092_v37 }
 0xe29   :  { %v13588_v25 = vpop.f32.mrf.mxu0 }
 0xe2a   :  { %18802 = vmatmul.mubr.msk.f32.vlgmr.msra.gmra.mxu0 %vm3833_vm2, %v13588_v25 }
 0xe2b   :  { %v18705_v2 = vpop.f32.mrf.mxu0  ;;  %18810 = vmatpush3.msk.msra.mxu0 %vm6446_vm4, %v22568_v48  ;;  %18811 = vmatprep.mubr.msk.f32.mxu0 %vm19093_vm1, %v19092_v37 }
 0xe2c   :  { %18819 = vmatprep.subr.mxu0 %v19092_v37  ;;  %v16281_v2 = vld [vmem:[%s22827_s2 + $0xe] ss:$0 sm:$0xff] }
 0xe32   :  { %v13223_v34 = vpop.f32.mrf.mxu1 }
 0xe33   :  { %v13734_v33 = vpop.f32.mrf.mxu0  ;;  %18777 = vmatmul.mubr.msk.f32.vlgmr.msra.gmra.mxu1 %vm3833_vm2, %v13223_v34 }
 0xe34   :  { %18812 = vmatmul.mubr.msk.f32.vlgmr.msra.gmra.mxu0 %vm3833_vm2, %v13734_v33  ;;  %v18670_v5 = vpop.f32.mrf.mxu1  ;;  %18785 = vmatpush3.msk.msra.mxu1 %vm6446_vm4, %v16076_v6 }
 0xe35   :  { %v18719_v36 = vpop.f32.mrf.mxu0  ;;  %18786 = vmatprep.mubr.msk.f32.mxu1 %vm19093_vm1, %v19092_v37  ;;  %18820 = vmatpush3.msk.msra.mxu0 %vm6446_vm4, %v16075_v18 }
 0xe36   :  { %18821 = vmatprep.mubr.msk.f32.mxu0 %vm19093_vm1, %v19092_v37  ;;  %18794 = vmatprep.subr.mxu1 %v19092_v37 }
 0xe37   :  { %18829 = vmatprep.subr.mxu0 %v19092_v37 }
 0xe3c   :  { %v13369_v45 = vpop.f32.mrf.mxu1 }
 0xe3d   :  { %v13880_v40 = vpop.f32.mrf.mxu0  ;;  %18787 = vmatmul.mubr.msk.f32.vlgmr.msra.gmra.mxu1 %vm3833_vm2, %v13369_v45 }
 0xe3e   :  { %18822 = vmatmul.mubr.msk.f32.vlgmr.msra.gmra.mxu0 %vm3833_vm2, %v13880_v40  ;;  %v18684_v13 = vpop.f32.mrf.mxu1  ;;  %18795 = vmatpush3.msk.msra.mxu1 %vm6446_vm4, %v16078_v57 }
 0xe3f   :  { %v18733_v23 = vpop.f32.mrf.mxu0  ;;  %18796 = vmatprep.mubr.msk.f32.mxu1 %vm19093_vm1, %v19092_v37  ;;  %18830 = vmatpush3.msk.msra.mxu0 %vm6446_vm4, %v16077_v0 }
 0xe40   :  { %18831 = vmatprep.mubr.msk.f32.mxu0 %vm19093_vm1, %v19092_v37  ;;  %18804 = vmatprep.subr.mxu1 %v19092_v37 }
 0xe41   :  { %18839 = vmatprep.subr.mxu0 %v19092_v37 }
 0xe46   :  { %v13515_v14 = vpop.f32.mrf.mxu1 }
 0xe47   :  { %v14026_v10 = vpop.f32.mrf.mxu0  ;;  %18797 = vmatmul.mubr.msk.f32.vlgmr.msra.gmra.mxu1 %vm3833_vm2, %v13515_v14 }
 0xe48   :  { %18832 = vmatmul.mubr.msk.f32.vlgmr.msra.gmra.mxu0 %vm3833_vm2, %v14026_v10  ;;  %v18698_v27 = vpop.f32.mrf.mxu1  ;;  %18805 = vmatpush3.msk.msra.mxu1 %vm6446_vm4, %v16080_v49 }
 0xe49   :  { %v18747_v50 = vpop.f32.mrf.mxu0  ;;  %18806 = vmatprep.mubr.msk.f32.mxu1 %vm19093_vm1, %v19092_v37  ;;  %18840 = vmatpush3.msk.msra.mxu0 %vm6446_vm4, %v16079_v56 }
 0xe4a   :  { %18841 = vmatprep.mubr.msk.f32.mxu0 %vm19093_vm1, %v19092_v37  ;;  %18814 = vmatprep.subr.mxu1 %v19092_v37 }
 0xe50   :  { %v13661_v46 = vpop.f32.mrf.mxu1 }
 0xe51   :  { %v14172_v53 = vpop.f32.mrf.mxu0  ;;  %18807 = vmatmul.mubr.msk.f32.vlgmr.msra.gmra.mxu1 %vm3833_vm2, %v13661_v46 }
 0xe52   :  { %18842 = vmatmul.mubr.msk.f32.vlgmr.msra.gmra.mxu0 %vm3833_vm2, %v14172_v53  ;;  %v18712_v4 = vpop.f32.mrf.mxu1  ;;  %18815 = vmatpush3.msk.msra.mxu1 %vm6446_vm4, %v22610_v61 }
 0xe53   :  { %v18761_v3 = vpop.f32.mrf.mxu0  ;;  %18816 = vmatprep.mubr.msk.f32.mxu1 %vm19093_vm1, %v19092_v37  ;;  %18824 = vmatprep.subr.mxu1 %v19092_v37 }
 0xe5a   :  { %v13807_v35 = vpop.f32.mrf.mxu1 }
 0xe5b   :  { %18817 = vmatmul.mubr.msk.f32.vlgmr.msra.gmra.mxu1 %vm3833_vm2, %v13807_v35 }
 0xe5c   :  { %v18726_v17 = vpop.f32.mrf.mxu1  ;;  %18825 = vmatpush3.msk.msra.mxu1 %vm6446_vm4, %v16076_v6  ;;  %18826 = vmatprep.mubr.msk.f32.mxu1 %vm19093_vm1, %v19092_v37 }
 0xe5d   :  { %18834 = vmatprep.subr.mxu1 %v19092_v37 }
 0xe64   :  { %v13953_v39 = vpop.f32.mrf.mxu1 }
 0xe65   :  { %18827 = vmatmul.mubr.msk.f32.vlgmr.msra.gmra.mxu1 %vm3833_vm2, %v13953_v39 }
 0xe66   :  { %v18740_v54 = vpop.f32.mrf.mxu1  ;;  %18835 = vmatpush3.msk.msra.mxu1 %vm6446_vm4, %v16078_v57  ;;  %18836 = vmatprep.mubr.msk.f32.mxu1 %vm19093_vm1, %v19092_v37 }
 0xe67   :  { %18844 = vmatprep.subr.mxu1 %v19092_v37 }
 0xe6e   :  { %v14099_v47 = vpop.f32.mrf.mxu1 }
 0xe6f   :  { %18837 = vmatmul.mubr.msk.f32.vlgmr.msra.gmra.mxu1 %vm3833_vm2, %v14099_v47 }
 0xe70   :  { %v18754_v19 = vpop.f32.mrf.mxu1  ;;  %18845 = vmatpush3.msk.msra.mxu1 %vm6446_vm4, %v16080_v49  ;;  %18846 = vmatprep.mubr.msk.f32.mxu1 %vm19093_vm1, %v19092_v37 }
 0xe78   :  { %v14245_v63 = vpop.f32.mrf.mxu1 }
 0xe79   :  { %18847 = vmatmul.mubr.msk.f32.vlgmr.msra.gmra.mxu1 %vm3833_vm2, %v14245_v63 }
 0xe7a   :  { %v18768_v21 = vpop.f32.mrf.mxu1 }
 0xecc   :  { %v14321_v60 = vpop.f32.mrf.mxu0 }
 0xecd   :  { %v15441_v38 = vsel %vm171_vm0, %v14321_v60, 0.0 }
 0xece   :  { %v18773_v24 = vpop.f32.mrf.mxu0 }
 0xed6   :  { %v14473_v22 = vpop.f32.mrf.mxu0 }
 0xed7   :  { %v15444_v44 = vsel %vm171_vm0, %v14473_v22, 0.0 }
 0xed8   :  { %v18783_v28 = vpop.f32.mrf.mxu0 }
 0xee0   :  { %v14625_v62 = vpop.f32.mrf.mxu0 }
 0xee1   :  { %v15448_v26 = vsel %vm171_vm0, %v14625_v62, 0.0 }
 0xee2   :  { %v18793_v42 = vpop.f32.mrf.mxu0 }
 0xeea   :  { %v14777_v58 = vpop.f32.mrf.mxu0 }
 0xeeb   :  { %v15452_v12 = vsel %vm171_vm0, %v14777_v58, 0.0 }
 0xeec   :  { %v18803_v59 = vpop.f32.mrf.mxu0 }
 0xef3   :  { %v14397_v41 = vpop.f32.mrf.mxu1 }
 0xef4   :  { %v14926_v31 = vpop.f32.mrf.mxu0  ;;  %v15442_v30 = vsel %vm171_vm0, %v14397_v41, 0.0 }
 0xef5   :  { %v18778_v48 = vpop.f32.mrf.mxu1  ;;  %v15443_v55 = vadd.f32 %v15442_v30, %v15441_v38  ;;  %v15456_v27 = vsel %vm171_vm0, %v14926_v31, 0.0  ;;  %v16083_v38 = vld [vmem:[%s22831_s6 + $0x30] sm:$0xff] }
 0xef6   :  { %v18813_v51 = vpop.f32.mrf.mxu0 }
 0xef7   :  { %v15445_v43 = vadd.f32 %v15444_v44, %v15443_v55  ;;  %v16081_v55 = vld [vmem:[%s22831_s6 + $0x20] sm:$0xff] }
 0xefd   :  { %v14549_v1 = vpop.f32.mrf.mxu1 }
 0xefe   :  { %v15072_v37 = vpop.f32.mrf.mxu0  ;;  %v15446_v11 = vsel %vm171_vm0, %v14549_v1, 0.0 }
 0xeff   :  { %v18788_v29 = vpop.f32.mrf.mxu1  ;;  %v15447_v8 = vadd.f32 %v15446_v11, %v15445_v43  ;;  %v15459_v46 = vsel %vm171_vm0, %v15072_v37, 0.0 }
 0xf00   :  { %v18823_v32 = vpop.f32.mrf.mxu0  ;;  %v16084_v29 = vld [vmem:[%s22831_s6 + $0x38] sm:$0xff] }
 0xf01   :  { %v15449_v52 = vadd.f32 %v15448_v26, %v15447_v8  ;;  %18849 = vmatprep.subr.mxu0 %v16084_v29  ;;  %v16082_v32 = vld [vmem:[%s22831_s6 + $0x28] sm:$0xff] }
 0xf02   :  { %18850 = vmatpush3.msra.mxu0 %v16084_v29 }
 0xf03   :  { %18851 = vmatprep.subr.mxu0 %v16083_v38 }
 0xf04   :  { %18852 = vmatpush3.msra.mxu0 %v16083_v38 }
 0xf05   :  { %18853 = vmatprep.subr.mxu0 %v16082_v32 }
 0xf06   :  { %18854 = vmatpush3.msra.mxu0 %v16082_v32 }
 0xf07   :  { %v14701_v61 = vpop.f32.mrf.mxu1  ;;  %18855 = vmatprep.subr.mxu0 %v16081_v55 }
 0xf08   :  { %v15218_v18 = vpop.f32.mrf.mxu0  ;;  %v15450_v0 = vsel %vm171_vm0, %v14701_v61, 0.0  ;;  %18856 = vmatpush3.msra.mxu0 %v16081_v55  ;;  %v16282_v61 = vld [vmem:[%s22827_s2 + $0xc] ss:$0 sm:$0xff] }
 0xf09   :  { %v18798_v16 = vpop.f32.mrf.mxu1  ;;  %v15451_v56 = vadd.f32 %v15450_v0, %v15449_v52  ;;  %v15463_v17 = vsel %vm171_vm0, %v15218_v18, 0.0 }
 0xf0a   :  { %v18833_v9 = vpop.f32.mrf.mxu0  ;;  %v16283_v16 = vld [vmem:[%s22827_s2 + $0xd] ss:$0 sm:$0xff] }
 0xf0b   :  { %v15453_v25 = vadd.f32 %v15452_v12, %v15451_v56 }
 0xf11   :  { %v14853_v15 = vpop.f32.mrf.mxu1 }
 0xf12   :  { %v15454_v6 = vsel %vm171_vm0, %v14853_v15, 0.0  ;;  %v15364_v34 = vpop.f32.mrf.mxu0 }
 0xf13   :  { %v15455_v33 = vadd.f32 %v15454_v6, %v15453_v25  ;;  %v18808_v5 = vpop.f32.mrf.mxu1  ;;  %v15467_v19 = vsel %vm171_vm0, %v15364_v34, 0.0  ;;  %v16100_v6 = vld [vmem:[%s22832_s7 + $0xf8] sm:$0xff]  ;;  %v16099_v34 = vld [vmem:[%s22832_s7 + $0xf0] sm:$0xff] }
 0xf14   :  { %v18843_v36 = vpop.f32.mrf.mxu0  ;;  %18860 = vmatprep.subr.mxu1 %v16100_v6  ;;  %v16097_v5 = vld [vmem:[%s22832_s7 + $0xe0] sm:$0xff] }
 0xf15   :  { %v15475_v57 = vadd.f32 %v16281_v2, %v15455_v33  ;;  %18861 = vmatpush3.msra.mxu1 %v16100_v6  ;;  %v16098_v33 = vld [vmem:[%s22832_s7 + $0xe8] sm:$0xff]  ;;  %v16096_v36 = vld [vmem:[%s22832_s7 + $0xd8] sm:$0xff] }
 0xf16   :  { %18862 = vmatprep.subr.mxu1 %v16099_v34 }
 0xf17   :  { %v22720_v45 = vadd.f32 %v15475_v57, %v21023_v20  ;;  %18863 = vmatpush3.msra.mxu1 %v16099_v34  ;;  %v16095_v57 = vld [vmem:[%s22832_s7 + $0xd0] sm:$0xff] }
 0xf18   :  { %18864 = vmatprep.subr.mxu1 %v16098_v33 }
 0xf19   :  { %v15479_v40 = vsel %vm171_vm0, %v22720_v45, 0.0  ;;  %18865 = vmatpush3.msra.mxu1 %v16098_v33 }
 0xf1a   :  { %15480 = vadd.xlane.f32.xlu0 %v15479_v40  ;;  %18866 = vmatprep.subr.mxu1 %v16097_v5  ;;  %v16094_v40 = vld [vmem:[%s22832_s7 + $0xc8] sm:$0xff] }
 0xf1b   :  { %v14999_v13 = vpop.f32.mrf.mxu1  ;;  %18867 = vmatpush3.msra.mxu1 %v16097_v5 }
 0xf1c   :  { %v15457_v14 = vsel %vm171_vm0, %v14999_v13, 0.0  ;;  %18868 = vmatprep.subr.mxu1 %v16096_v36  ;;  %v16093_v13 = vld [vmem:[%s22832_s7 + $0xc0] sm:$0xff] }
 0xf1d   :  { %v18818_v23 = vpop.f32.mrf.mxu1  ;;  %v15458_v50 = vadd.f32 %v15457_v14, %v15456_v27  ;;  %18869 = vmatpush3.msra.mxu1 %v16096_v36  ;;  %v16090_v14 = vld [vmem:[%s22832_s7 + $0xa8] sm:$0xff]  ;;  %v16088_v27 = vld [vmem:[%s22832_s7 + $0x98] sm:$0xff] }
 0xf1e   :  { %18870 = vmatprep.subr.mxu1 %v16095_v57  ;;  %v16092_v23 = vld [vmem:[%s22832_s7 + $0xb8] sm:$0xff] }
 0xf1f   :  { %v15460_v4 = vadd.f32 %v15459_v46, %v15458_v50  ;;  %18871 = vmatpush3.msra.mxu1 %v16095_v57  ;;  %v16087_v50 = vld [vmem:[%s22832_s7 + $0x90] sm:$0xff]  ;;  %v16086_v46 = vld [vmem:[%s22832_s7 + $0x88] sm:$0xff] }
 0xf20   :  { %18872 = vmatprep.subr.mxu1 %v16094_v40 }
 0xf21   :  { %18873 = vmatpush3.msra.mxu1 %v16094_v40 }
 0xf22   :  { %18874 = vmatprep.subr.mxu1 %v16093_v13 }
 0xf23   :  { %18875 = vmatpush3.msra.mxu1 %v16093_v13 }
 0xf24   :  { %18876 = vmatprep.subr.mxu1 %v16092_v23 }
 0xf25   :  { %v15145_v49 = vpop.f32.mrf.mxu1  ;;  %18877 = vmatpush3.msra.mxu1 %v16092_v23 }
 0xf26   :  { %v15461_v53 = vsel %vm171_vm0, %v15145_v49, 0.0  ;;  %v16091_v49 = vld [vmem:[%s22832_s7 + $0xb0] sm:$0xff] }
 0xf27   :  { %v18828_v10 = vpop.f32.mrf.mxu1  ;;  %v15462_v20 = vadd.f32 %v15461_v53, %v15460_v4  ;;  %18878 = vmatprep.subr.mxu1 %v16091_v49  ;;  %v16085_v53 = vld [vmem:[%s22832_s7 + $0x80] sm:$0xff] }
 0xf28   :  { %18879 = vmatpush3.msra.mxu1 %v16091_v49  ;;  %v16089_v10 = vld [vmem:[%s22832_s7 + $0xa0] sm:$0xff] }
 0xf29   :  { %v15464_v54 = vadd.f32 %v15463_v17, %v15462_v20  ;;  %18880 = vmatprep.subr.mxu1 %v16090_v14  ;;  %v16284_v4 = vld [vmem:[%s22828_s3 + $0x1] ss:$0 sm:$0xff] }
 0xf2a   :  { %18881 = vmatpush3.msra.mxu1 %v16090_v14 }
 0xf2b   :  { %18882 = vmatprep.subr.mxu1 %v16089_v10 }
 0xf2c   :  { %18883 = vmatpush3.msra.mxu1 %v16089_v10 }
 0xf2d   :  { %18884 = vmatprep.subr.mxu1 %v16088_v27 }
 0xf2e   :  { %18885 = vmatpush3.msra.mxu1 %v16088_v27 }
 0xf2f   :  { %v15291_v3 = vpop.f32.mrf.mxu1  ;;  %18886 = vmatprep.subr.mxu1 %v16087_v50 }
 0xf30   :  { %v15465_v39 = vsel %vm171_vm0, %v15291_v3, 0.0  ;;  %18887 = vmatpush3.msra.mxu1 %v16087_v50 }
 0xf31   :  { %v18838_v35 = vpop.f32.mrf.mxu1  ;;  %v15466_v47 = vadd.f32 %v15465_v39, %v15464_v54  ;;  %18888 = vmatprep.subr.mxu1 %v16086_v46 }
 0xf32   :  { %18889 = vmatpush3.msra.mxu1 %v16086_v46 }
 0xf33   :  { %v15468_v21 = vadd.f32 %v15467_v19, %v15466_v47  ;;  %18890 = vmatprep.subr.mxu1 %v16085_v53 }
 0xf34   :  { %18891 = vmatpush3.msra.mxu1 %v16085_v53 }
 0xf39   :  { %v15437_v63 = vpop.f32.mrf.mxu1 }
 0xf3a   :  { %v15469_v60 = vsel %vm171_vm0, %v15437_v63, 0.0 }
 0xf3b   :  { %v15470_v24 = vadd.f32 %v15469_v60, %v15468_v21  ;;  %v18848_v22 = vpop.f32.mrf.mxu1 }
 0xf3d   :  { %v15476_v28 = vadd.f32 %v16281_v2, %v15470_v24 }
 0xf3f   :  { %v22733_v62 = vadd.f32 %v15476_v28, %v21020_v7 }
 0xf41   :  { %v15482_v42 = vsel %vm171_vm0, %v22733_v62, 0.0 }
 0xf42   :  { %15483 = vadd.xlane.f32.xlu1 %v15482_v42 }
 0xfa3   :  { %v15481_v58 = vpop.xlane.xlu0 %15480 }
 0xfa4   :  { %v15485_v59 = vmul.f32 0.03125, %v15481_v58 }
 0xfa6   :  { %v15487_v41 = vsub.f32 %v22720_v45, %v15485_v59  ;;  %v16289_v59 = vld [vmem:[%s22827_s2 + $0xf] ss:$0 sm:$0xff] }
 0xfa8   :  { %v15489_v31 = vmul.f32 %v15487_v41, %v15487_v41 }
 0xfaa   :  { %v15491_v48 = vsel %vm171_vm0, %v15489_v31, 0.0 }
 0xfab   :  { %15492 = vadd.xlane.f32.xlu0 %v15491_v48  ;;  %v16290_v48 = vld [vmem:[%s22827_s2 + $0x10] ss:$0 sm:$0xff] }
 0xfcb   :  { %v15484_v51 = vpop.xlane.xlu1 %15483 }
 0xfcc   :  { %v15486_v1 = vmul.f32 0.03125, %v15484_v51 }
 0xfce   :  { %v15488_v30 = vsub.f32 %v22733_v62, %v15486_v1 }
 0xfd0   :  { %v15490_v37 = vmul.f32 %v15488_v30, %v15488_v30 }
 0xfd2   :  { %v15494_v7 = vsel %vm171_vm0, %v15490_v37, 0.0 }
 0xfd3   :  { %15495 = vadd.xlane.f32.xlu1 %v15494_v7 }
0x1034   :  { %v15493_v44 = vpop.xlane.xlu0 %15492 }
0x1035   :  { %v15497_v11 = vmul.f32 0.03125, %v15493_v44 }
0x1037   :  { %v15499_v43 = vadd.f32 1e-05, %v15497_v11 }
0x1039   :  { %19056 = vrsqrt.f32 %v15499_v43 }
0x1046   :  { %v19057_v8 = vpop.eup %19056 }
0x1047   :  { %v15503_v18 = vmul.f32 %v19057_v8, %v15487_v41 }
0x1049   :  { %v15509_v26 = vmul.f32 %v16282_v61, %v15503_v18 }
0x104b   :  { %v15515_v0 = vadd.f32 %v16283_v16, %v15509_v26 }
0x104d   :  { %18857 = vmatprep.mubr.msk.f32.mxu0 %vm171_vm0, %v15515_v0 }
0x105c   :  { %v15496_v9 = vpop.xlane.xlu1 %15495 }
0x105d   :  { %v15498_v52 = vmul.f32 0.03125, %v15496_v9 }
0x105f   :  { %v15500_v56 = vadd.f32 1e-05, %v15498_v52 }
0x1061   :  { %19058 = vrsqrt.f32 %v15500_v56 }
0x106e   :  { %v19059_v12 = vpop.eup %19058 }
0x106f   :  { %v15504_v15 = vmul.f32 %v19059_v12, %v15488_v30 }
0x1071   :  { %v15510_v25 = vmul.f32 %v16282_v61, %v15504_v15 }
0x1073   :  { %v15516_v2 = vadd.f32 %v16283_v16, %v15510_v25 }
0x1075   :  { %18858 = vmatmul.mubr.msk.f32.vlgmr.msra.gmra.mxu0 %vm171_vm0, %v15516_v2 }
0x1135   :  { %v18859_v20 = vpop.f32.mrf.mxu0 }
0x1136   :  { %v15599_v3 = vadd.f32 %v18859_v20, %v16284_v4 }
0x1137   :  { %v15593_v35 = vpop.f32.mrf.mxu0 }
0x1138   :  { %v16288_v17 = vmul.f32 -1.702, %v15599_v3  ;;  %v15594_v39 = vadd.f32 %v16284_v4, %v15593_v35 }
0x113a   :  { %v15608_v54 = vmul.f32 1.442695, %v16288_v17  ;;  %v16287_v47 = vmul.f32 -1.702, %v15594_v39 }
0x113c   :  { %19060 = vpow2.f32 %v15608_v54  ;;  %v15606_v19 = vmul.f32 1.442695, %v16287_v47 }
0x113e   :  { %19062 = vpow2.f32 %v15606_v19 }
0x1149   :  { %v19061_v63 = vpop.eup %19060 }
0x114a   :  { %v15611_v21 = vadd.f32 1.0, %v19061_v63 }
0x114b   :  { %v19063_v60 = vpop.eup %19062 }
0x114c   :  { %v15610_v24 = vadd.f32 1.0, %v19063_v60  ;;  %19064 = vrcp.f32 %v15611_v21 }
0x114e   :  { %19066 = vrcp.f32 %v15610_v24 }
0x1159   :  { %v19065_v22 = vpop.eup %19064 }
0x115a   :  { %v15617_v58 = vmul.f32 %v19065_v22, %v15599_v3 }
0x115b   :  { %v19067_v28 = vpop.eup %19066 }
0x115c   :  { %v15616_v42 = vmul.f32 %v19067_v28, %v15594_v39 }
0x115e   :  { %18892 = vmatprep.mubr.f32.mxu1 %v15616_v42 }
0x115f   :  { %18893 = vmatmul.mubr.f32.vlgmr.msra.gmra.mxu1 %v15617_v58 }
0x121f   :  { %v18894_v41 = vpop.f32.mrf.mxu1 }
0x1220   :  { %v15694_v31 = vadd.f32 %v18894_v41, %v16289_v59 }
0x1221   :  { %v15688_v51 = vpop.f32.mrf.mxu1 }
0x1222   :  { %v15698_v1 = vadd.f32 %v15694_v31, %v22733_v62  ;;  %v15689_v30 = vadd.f32 %v16289_v59, %v15688_v51 }
0x1224   :  { %v15705_v37 = vmul.f32 %v16290_v48, %v15698_v1  ;;  %v15697_v7 = vadd.f32 %v15689_v30, %v22720_v45 }
0x1226   :  { %15707 = vst.msk [vmem:[#allocation2 + $0x8] sm:$0xff] %vm171_vm0, %v15705_v37  ;;  %v15704_v29 = vmul.f32 %v16290_v48, %v15697_v7 }
0x1228   :  { %15706 = vst.msk [vmem:[#allocation2] sm:$0xff] %vm171_vm0, %v15704_v29 }
0x1229   :  { %19081 = shalt.err (!%p19078_p4)
}
0x122a   :  { %s19095_s2 = smov 128   ;;  %s19096_s29 = smov 8  }
0x122b   :  { %15719 = dma.vmem_to_hbm [thread:$0]  %s15714_s27, 256, %s22833_s8, [#allocation3], %s19095_s2, %s19095_s2, %s19096_s29  }
0x122c   :  { %19090 = dma.done.wait [#allocation3], 256  }
0x122d   :  { %19091 = vsyncadd [#allocation3], 4294967040 }
0x122e   :  { %15723 = vsyncpa [#allocation3], 1 }

</bundles_post_ra>
